<compile_context>
chip_gen: v7x
topology: tpu7x:2x2x1
jax: 0.10.0
libtpu: 0.0.40
codegen_flags: <defaults>
</compile_context>

<pallas_src>
import numpy as np

import jax
import jax.numpy as jnp
from jax import lax
from jax.experimental import pallas as pl
from jax.experimental.pallas import tpu as pltpu


def _pick_row_block(H, W):
    """Rows per epilogue block: slab width R*4W >= 128 (aligned, unmasked stores)
    and, when possible, contraction R*W >= 256 (good MXU utilization)."""
    divisors = [r for r in range(1, H + 1) if H % r == 0]
    for want in (256, 128):
        for r in divisors:
            if r * 4 * W >= 128 and r * W >= want:
                return r
    for r in divisors:
        if r * 4 * W >= 128:
            return r
    return H


def _build_scatter(R, W):
    """One-hot scatter, shape (4, R*W, 4*R*W):
    S[g, r*W + j, r*4W + dy*2W + 2j + dx] = 1 with g = 2*dy + dx, so
    act_g (Cout, R*W) @ S[g] places rows i0..i0+R-1 of group (dy,dx) at their
    row-major NCHW positions inside an R*4W-wide output slab."""
    RW = R * W
    S = np.zeros((4, RW, 4 * RW), np.float32)
    src = np.arange(RW)
    r, j = src // W, src % W
    for dy in range(2):
        for dx in range(2):
            g = 2 * dy + dx
            S[g, src, r * 4 * W + dy * 2 * W + 2 * j + dx] = 1.0
    return jnp.asarray(S)


def _make_kernel(H, W, Cin, Cout, R):
    HW = H * W
    RW = R * W
    n_blk = H // R
    inv_n = 1.0 / float(4 * HW)

    def kernel(x_ref, w_ref, scat_ref, o_ref, act_ref):
        # x_ref:    (1, Cin, H*W)        f32  one sample, spatial flattened (lane-dense)
        # w_ref:    (4*Cout, Cin)        f32  row r = (2*dy+dx)*Cout + c holds w[:, c, dy, dx]
        # scat_ref: (4, R*W, 4*R*W)      f32  one-hot scatter matrices (resident)
        # o_ref:    (1, Cout, 4*H*W)     f32  row-major-flattened (2H, 2W) spatial
        # act_ref:  (4, Cout, H*W)       f32  scratch: normalized activation per group
        x = x_ref[0]                                           # (Cin, HW)

        # ---- ConvTranspose2d(k=2, s=2, bias=False) as a channel contraction ----
        if Cin <= 8:
            # Tiny contraction: exact f32 outer-product accumulation on the VPU
            # (precision-default-proof; the MXU would be <2% utilized anyway).
            y = w_ref[:, 0:1] * x[0:1, :]                      # (4*Cout, HW)
            for cin in range(1, Cin):
                y = y + w_ref[:, cin:cin + 1] * x[cin:cin + 1, :]
        else:
            # Real UNet channel counts: one f32 MXU matmul (full precision).
            y = jnp.dot(w_ref[...], x,
                        preferred_element_type=jnp.float32,
                        precision=lax.Precision.HIGHEST)       # (4*Cout, HW)

        # ---- InstanceNorm2d (eps=1e-5, no affine), two-pass per-channel stats ----
        row_sum = jnp.sum(y, axis=1, keepdims=True)            # (4*Cout, 1)
        mean = (row_sum[0 * Cout:1 * Cout] + row_sum[1 * Cout:2 * Cout]
                + row_sum[2 * Cout:3 * Cout] + row_sum[3 * Cout:4 * Cout]) * inv_n
        # NOTE: this row_sum could be folded into an x-side matvec (W_all @ sum_j x)
        # to save one XLU lane reduction; kept as a plain reduction for robustness —
        # it is off the critical path at these shapes.
        yc = [y[g * Cout:(g + 1) * Cout, :] - mean for g in range(4)]   # centered
        var = (jnp.sum(yc[0] * yc[0], axis=1, keepdims=True)
               + jnp.sum(yc[1] * yc[1], axis=1, keepdims=True)
               + jnp.sum(yc[2] * yc[2], axis=1, keepdims=True)
               + jnp.sum(yc[3] * yc[3], axis=1, keepdims=True)) * inv_n
        inv_std = lax.rsqrt(var + 1e-5)                        # (Cout, 1), EUP

        # ---- normalize + LeakyReLU(0.2); stash per-group into VMEM scratch ----
        for g in range(4):
            ag = yc[g] * inv_std
            act_ref[g] = jnp.where(ag >= 0, ag, 0.2 * ag)

        # ---- NCHW 2x2 interleave: R-row blocks, 4 scatter matmuls per block,
        #      one lane-dense 128-aligned store of width R*4W per block ----------
        def body(blk, carry):
            c0 = pl.multiple_of(blk * RW, RW)
            a0 = act_ref[0, :, pl.ds(c0, RW)]                  # (Cout, R*W)
            a1 = act_ref[1, :, pl.ds(c0, RW)]
            a2 = act_ref[2, :, pl.ds(c0, RW)]
            a3 = act_ref[3, :, pl.ds(c0, RW)]
            slab = jnp.dot(a0, scat_ref[0], preferred_element_type=jnp.float32)
            slab = slab + jnp.dot(a1, scat_ref[1], preferred_element_type=jnp.float32)
            slab = slab + jnp.dot(a2, scat_ref[2], preferred_element_type=jnp.float32)
            slab = slab + jnp.dot(a3, scat_ref[3], preferred_element_type=jnp.float32)
            d0 = pl.multiple_of(blk * 4 * RW, 4 * RW)
            o_ref[0, :, pl.ds(d0, 4 * RW)] = slab.astype(o_ref.dtype)
            return carry

        lax.fori_loop(0, n_blk, body, 0, unroll=True)

    return kernel


def transpose_conv_block(x_nchw, w_iohw):
    """TransposeConvBlock forward.

    x: (B, Cin, H, W) f32; w: (Cin, Cout, 2, 2) (PyTorch ConvTranspose2d layout,
    bias=False)  ->  (B, Cout, 2H, 2W) f32.
    """
    B, Cin, H, W = x_nchw.shape
    Cout = w_iohw.shape[1]
    HW = H * W
    R = _pick_row_block(H, W)
    assert H % R == 0

    # Free row-major reshape: spatial flattened so the kernel is lane-dense on H*W.
    x_flat = x_nchw.reshape(B, Cin, HW).astype(jnp.float32)
    # (Cin, Cout, 2, 2) -> (2, 2, Cout, Cin) -> (4*Cout, Cin); rows ordered (dy, dx, c).
    w_all = jnp.transpose(w_iohw, (2, 3, 1, 0)).reshape(4 * Cout, Cin).astype(jnp.float32)
    scat = _build_scatter(R, W)                                 # (4, R*W, 4*R*W) f32

    kernel = _make_kernel(H, W, Cin, Cout, R)
    out_flat = pl.pallas_call(
        kernel,
        out_shape=jax.ShapeDtypeStruct((B, Cout, 4 * HW), jnp.float32),
        grid_spec=pltpu.PrefetchScalarGridSpec(
            num_scalar_prefetch=0,
            grid=(B,),
            in_specs=[
                pl.BlockSpec((1, Cin, HW), lambda b: (b, 0, 0)),
                pl.BlockSpec((4 * Cout, Cin), lambda b: (0, 0)),
                pl.BlockSpec((4, R * W, 4 * R * W), lambda b: (0, 0, 0)),
            ],
            out_specs=pl.BlockSpec((1, Cout, 4 * HW), lambda b: (b, 0, 0)),
            scratch_shapes=[pltpu.VMEM((4, Cout, HW), jnp.float32)],
        ),
        compiler_params=pltpu.CompilerParams(
            dimension_semantics=("parallel",),
            vmem_limit_bytes=32 * 1024 * 1024,
        ),
    )(x_flat, w_all, scat)

    # Free reshape: the flat last dim is already the row-major (2H, 2W) interleave.
    return out_flat.reshape(B, Cout, 2 * H, 2 * W)


def transpose_conv_block_reference(x, w):
    """Pure-JAX reference matching PyTorch TransposeConvBlock forward semantics
    (f32 conv -> InstanceNorm2d(eps=1e-5, biased var, no affine) -> LeakyReLU(0.2))."""
    B, Cin, H, W = x.shape
    Cout = w.shape[1]
    # ConvTranspose2d(k=2, s=2): out[b, o, 2i+dy, 2j+dx] = sum_c x[b,c,i,j] * w[c,o,dy,dx]
    t = jnp.einsum("bcij,code->boidje", x, w, precision=lax.Precision.HIGHEST)
    y = t.reshape(B, Cout, 2 * H, 2 * W)
    mean = jnp.mean(y, axis=(2, 3), keepdims=True)
    var = jnp.mean((y - mean) ** 2, axis=(2, 3), keepdims=True)
    y = (y - mean) * lax.rsqrt(var + 1e-5)
    return jnp.where(y >= 0, y, 0.2 * y)


if __name__ == "__main__":
    B, Cin, Cout, H, W = 2, 4, 8, 16, 16

    key = jax.random.PRNGKey(0)
    kx, kw = jax.random.split(key)
    x = jax.random.normal(kx, (B, Cin, H, W), dtype=jnp.float32)
    # PyTorch ConvTranspose2d weight layout: (in_ch, out_ch, kH, kW), bias=False.
    w = 0.1 * jax.random.normal(kw, (Cin, Cout, 2, 2), dtype=jnp.float32)

    out = jax.block_until_ready(transpose_conv_block(x, w))
    ref = jax.block_until_ready(transpose_conv_block_reference(x, w))

    assert out.shape == (B, Cout, 2 * H, 2 * W), out.shape
    max_err = float(jnp.max(jnp.abs(out - ref)))
    assert jnp.allclose(out, ref, atol=1e-2, rtol=1e-2), f"max abs err = {max_err}"

    print("KERNEL_OK")
</pallas_src>

<mosaic_0001>
module attributes {stable_mosaic.version = 11 : i64} {
  func.func @kernel(%arg0: i32, %arg1: memref<1x4x256xf32, #tpu.memory_space<vmem>>, %arg2: memref<32x4xf32, #tpu.memory_space<vmem>>, %arg3: memref<4x256x1024xf32, #tpu.memory_space<vmem>>, %arg4: memref<1x8x1024xf32, #tpu.memory_space<vmem>>, %arg5: memref<4x8x256xf32, #tpu.memory_space<vmem>>) attributes {dimension_semantics = [#tpu.dimension_semantics<parallel>], iteration_bounds = array<i64: 2>, scalar_prefetch = 0 : i64, scratch_operands = 1 : i64, tpu.core_type = #tpu.core_type<tc>, window_params = [{transform_indices = @transform_0, window_bounds = array<i64: 1, 4, 256>}, {pipeline_mode = #tpu.pipeline_mode<synchronous>, transform_indices = @transform_1, window_bounds = array<i64: 32, 4>}, {pipeline_mode = #tpu.pipeline_mode<synchronous>, transform_indices = @transform_2, window_bounds = array<i64: 4, 256, 1024>}, {transform_indices = @transform_3, window_bounds = array<i64: 1, 8, 1024>}]} {
    %c0 = arith.constant 0 : index
    %c0_0 = arith.constant 0 : index
    %c0_1 = arith.constant 0 : index
    %0 = vector.load %arg1[%c0, %c0_0, %c0_1] : memref<1x4x256xf32, #tpu.memory_space<vmem>>, vector<1x4x256xf32>
    %1 = vector.shape_cast %0 : vector<1x4x256xf32> to vector<4x256xf32>
    %c0_2 = arith.constant 0 : index
    %c0_3 = arith.constant 0 : index
    %2 = vector.load %arg2[%c0_2, %c0_3] : memref<32x4xf32, #tpu.memory_space<vmem>>, vector<32x1xf32>
    %3 = vector.extract_strided_slice %1 {offsets = [0, 0], sizes = [1, 256], strides = [1, 1]} : vector<4x256xf32> to vector<1x256xf32>
    %4 = vector.broadcast %2 : vector<32x1xf32> to vector<32x256xf32>
    %5 = vector.broadcast %3 : vector<1x256xf32> to vector<32x256xf32>
    %6 = arith.mulf %4, %5 : vector<32x256xf32>
    %c0_4 = arith.constant 0 : index
    %c1 = arith.constant 1 : index
    %7 = vector.load %arg2[%c0_4, %c1] : memref<32x4xf32, #tpu.memory_space<vmem>>, vector<32x1xf32>
    %8 = vector.extract_strided_slice %1 {offsets = [1, 0], sizes = [1, 256], strides = [1, 1]} : vector<4x256xf32> to vector<1x256xf32>
    %9 = vector.broadcast %7 : vector<32x1xf32> to vector<32x256xf32>
    %10 = vector.broadcast %8 : vector<1x256xf32> to vector<32x256xf32>
    %11 = arith.mulf %9, %10 : vector<32x256xf32>
    %12 = arith.addf %6, %11 : vector<32x256xf32>
    %c0_5 = arith.constant 0 : index
    %c2 = arith.constant 2 : index
    %13 = vector.load %arg2[%c0_5, %c2] : memref<32x4xf32, #tpu.memory_space<vmem>>, vector<32x1xf32>
    %14 = vector.extract_strided_slice %1 {offsets = [2, 0], sizes = [1, 256], strides = [1, 1]} : vector<4x256xf32> to vector<1x256xf32>
    %15 = vector.broadcast %13 : vector<32x1xf32> to vector<32x256xf32>
    %16 = vector.broadcast %14 : vector<1x256xf32> to vector<32x256xf32>
    %17 = arith.mulf %15, %16 : vector<32x256xf32>
    %18 = arith.addf %12, %17 : vector<32x256xf32>
    %c0_6 = arith.constant 0 : index
    %c3 = arith.constant 3 : index
    %19 = vector.load %arg2[%c0_6, %c3] : memref<32x4xf32, #tpu.memory_space<vmem>>, vector<32x1xf32>
    %20 = vector.extract_strided_slice %1 {offsets = [3, 0], sizes = [1, 256], strides = [1, 1]} : vector<4x256xf32> to vector<1x256xf32>
    %21 = vector.broadcast %19 : vector<32x1xf32> to vector<32x256xf32>
    %22 = vector.broadcast %20 : vector<1x256xf32> to vector<32x256xf32>
    %23 = arith.mulf %21, %22 : vector<32x256xf32>
    %24 = arith.addf %18, %23 : vector<32x256xf32>
    %cst = arith.constant dense<0.000000e+00> : vector<32xf32>
    %25 = vector.multi_reduction <add>, %24, %cst [1] : vector<32x256xf32> to vector<32xf32>
    %26 = vector.shape_cast %25 : vector<32xf32> to vector<32x1xf32>
    %27 = vector.extract_strided_slice %26 {offsets = [0, 0], sizes = [8, 1], strides = [1, 1]} : vector<32x1xf32> to vector<8x1xf32>
    %28 = vector.extract_strided_slice %26 {offsets = [8, 0], sizes = [8, 1], strides = [1, 1]} : vector<32x1xf32> to vector<8x1xf32>
    %29 = arith.addf %27, %28 : vector<8x1xf32>
    %30 = vector.extract_strided_slice %26 {offsets = [16, 0], sizes = [8, 1], strides = [1, 1]} : vector<32x1xf32> to vector<8x1xf32>
    %31 = arith.addf %29, %30 : vector<8x1xf32>
    %32 = vector.extract_strided_slice %26 {offsets = [24, 0], sizes = [8, 1], strides = [1, 1]} : vector<32x1xf32> to vector<8x1xf32>
    %33 = arith.addf %31, %32 : vector<8x1xf32>
    %cst_7 = arith.constant 9.765625E-4 : f32
    %34 = vector.broadcast %cst_7 : f32 to vector<8x1xf32>
    %35 = arith.mulf %33, %34 : vector<8x1xf32>
    %36 = vector.extract_strided_slice %24 {offsets = [0, 0], sizes = [8, 256], strides = [1, 1]} : vector<32x256xf32> to vector<8x256xf32>
    %37 = vector.broadcast %35 : vector<8x1xf32> to vector<8x256xf32>
    %38 = arith.subf %36, %37 : vector<8x256xf32>
    %39 = vector.extract_strided_slice %24 {offsets = [8, 0], sizes = [8, 256], strides = [1, 1]} : vector<32x256xf32> to vector<8x256xf32>
    %40 = vector.broadcast %35 : vector<8x1xf32> to vector<8x256xf32>
    %41 = arith.subf %39, %40 : vector<8x256xf32>
    %42 = vector.extract_strided_slice %24 {offsets = [16, 0], sizes = [8, 256], strides = [1, 1]} : vector<32x256xf32> to vector<8x256xf32>
    %43 = vector.broadcast %35 : vector<8x1xf32> to vector<8x256xf32>
    %44 = arith.subf %42, %43 : vector<8x256xf32>
    %45 = vector.extract_strided_slice %24 {offsets = [24, 0], sizes = [8, 256], strides = [1, 1]} : vector<32x256xf32> to vector<8x256xf32>
    %46 = vector.broadcast %35 : vector<8x1xf32> to vector<8x256xf32>
    %47 = arith.subf %45, %46 : vector<8x256xf32>
    %48 = arith.mulf %38, %38 : vector<8x256xf32>
    %cst_8 = arith.constant dense<0.000000e+00> : vector<8xf32>
    %49 = vector.multi_reduction <add>, %48, %cst_8 [1] : vector<8x256xf32> to vector<8xf32>
    %50 = vector.shape_cast %49 : vector<8xf32> to vector<8x1xf32>
    %51 = arith.mulf %41, %41 : vector<8x256xf32>
    %cst_9 = arith.constant dense<0.000000e+00> : vector<8xf32>
    %52 = vector.multi_reduction <add>, %51, %cst_9 [1] : vector<8x256xf32> to vector<8xf32>
    %53 = vector.shape_cast %52 : vector<8xf32> to vector<8x1xf32>
    %54 = arith.addf %50, %53 : vector<8x1xf32>
    %55 = arith.mulf %44, %44 : vector<8x256xf32>
    %cst_10 = arith.constant dense<0.000000e+00> : vector<8xf32>
    %56 = vector.multi_reduction <add>, %55, %cst_10 [1] : vector<8x256xf32> to vector<8xf32>
    %57 = vector.shape_cast %56 : vector<8xf32> to vector<8x1xf32>
    %58 = arith.addf %54, %57 : vector<8x1xf32>
    %59 = arith.mulf %47, %47 : vector<8x256xf32>
    %cst_11 = arith.constant dense<0.000000e+00> : vector<8xf32>
    %60 = vector.multi_reduction <add>, %59, %cst_11 [1] : vector<8x256xf32> to vector<8xf32>
    %61 = vector.shape_cast %60 : vector<8xf32> to vector<8x1xf32>
    %62 = arith.addf %58, %61 : vector<8x1xf32>
    %cst_12 = arith.constant 9.765625E-4 : f32
    %63 = vector.broadcast %cst_12 : f32 to vector<8x1xf32>
    %64 = arith.mulf %62, %63 : vector<8x1xf32>
    %cst_13 = arith.constant 9.99999974E-6 : f32
    %65 = vector.broadcast %cst_13 : f32 to vector<8x1xf32>
    %66 = arith.addf %64, %65 : vector<8x1xf32>
    %67 = math.rsqrt %66 : vector<8x1xf32>
    %68 = vector.broadcast %67 : vector<8x1xf32> to vector<8x256xf32>
    %69 = arith.mulf %38, %68 : vector<8x256xf32>
    %cst_14 = arith.constant 0.000000e+00 : f32
    %70 = vector.broadcast %cst_14 : f32 to vector<8x256xf32>
    %71 = arith.cmpf oge, %69, %70 : vector<8x256xf32>
    %cst_15 = arith.constant 2.000000e-01 : f32
    %72 = vector.broadcast %cst_15 : f32 to vector<8x256xf32>
    %73 = arith.mulf %72, %69 : vector<8x256xf32>
    %74 = arith.select %71, %69, %73 : vector<8x256xi1>, vector<8x256xf32>
    %c0_16 = arith.constant 0 : index
    %c0_17 = arith.constant 0 : index
    %c0_18 = arith.constant 0 : index
    %75 = vector.load %arg5[%c0_16, %c0_17, %c0_18] : memref<4x8x256xf32, #tpu.memory_space<vmem>>, vector<1x8x256xf32>
    %76 = vector.shape_cast %75 : vector<1x8x256xf32> to vector<8x256xf32>
    %77 = vector.shape_cast %74 : vector<8x256xf32> to vector<1x8x256xf32>
    tpu.vector_store %arg5[%c0_16, %c0_17, %c0_18], %77 {strides = array<i32>} : memref<4x8x256xf32, #tpu.memory_space<vmem>>, vector<1x8x256xf32>,
    %78 = vector.broadcast %67 : vector<8x1xf32> to vector<8x256xf32>
    %79 = arith.mulf %41, %78 : vector<8x256xf32>
    %cst_19 = arith.constant 0.000000e+00 : f32
    %80 = vector.broadcast %cst_19 : f32 to vector<8x256xf32>
    %81 = arith.cmpf oge, %79, %80 : vector<8x256xf32>
    %cst_20 = arith.constant 2.000000e-01 : f32
    %82 = vector.broadcast %cst_20 : f32 to vector<8x256xf32>
    %83 = arith.mulf %82, %79 : vector<8x256xf32>
    %84 = arith.select %81, %79, %83 : vector<8x256xi1>, vector<8x256xf32>
    %c1_21 = arith.constant 1 : index
    %c0_22 = arith.constant 0 : index
    %c0_23 = arith.constant 0 : index
    %85 = vector.load %arg5[%c1_21, %c0_22, %c0_23] : memref<4x8x256xf32, #tpu.memory_space<vmem>>, vector<1x8x256xf32>
    %86 = vector.shape_cast %85 : vector<1x8x256xf32> to vector<8x256xf32>
    %87 = vector.shape_cast %84 : vector<8x256xf32> to vector<1x8x256xf32>
    tpu.vector_store %arg5[%c1_21, %c0_22, %c0_23], %87 {strides = array<i32>} : memref<4x8x256xf32, #tpu.memory_space<vmem>>, vector<1x8x256xf32>,
    %88 = vector.broadcast %67 : vector<8x1xf32> to vector<8x256xf32>
    %89 = arith.mulf %44, %88 : vector<8x256xf32>
    %cst_24 = arith.constant 0.000000e+00 : f32
    %90 = vector.broadcast %cst_24 : f32 to vector<8x256xf32>
    %91 = arith.cmpf oge, %89, %90 : vector<8x256xf32>
    %cst_25 = arith.constant 2.000000e-01 : f32
    %92 = vector.broadcast %cst_25 : f32 to vector<8x256xf32>
    %93 = arith.mulf %92, %89 : vector<8x256xf32>
    %94 = arith.select %91, %89, %93 : vector<8x256xi1>, vector<8x256xf32>
    %c2_26 = arith.constant 2 : index
    %c0_27 = arith.constant 0 : index
    %c0_28 = arith.constant 0 : index
    %95 = vector.load %arg5[%c2_26, %c0_27, %c0_28] : memref<4x8x256xf32, #tpu.memory_space<vmem>>, vector<1x8x256xf32>
    %96 = vector.shape_cast %95 : vector<1x8x256xf32> to vector<8x256xf32>
    %97 = vector.shape_cast %94 : vector<8x256xf32> to vector<1x8x256xf32>
    tpu.vector_store %arg5[%c2_26, %c0_27, %c0_28], %97 {strides = array<i32>} : memref<4x8x256xf32, #tpu.memory_space<vmem>>, vector<1x8x256xf32>,
    %98 = vector.broadcast %67 : vector<8x1xf32> to vector<8x256xf32>
    %99 = arith.mulf %47, %98 : vector<8x256xf32>
    %cst_29 = arith.constant 0.000000e+00 : f32
    %100 = vector.broadcast %cst_29 : f32 to vector<8x256xf32>
    %101 = arith.cmpf oge, %99, %100 : vector<8x256xf32>
    %cst_30 = arith.constant 2.000000e-01 : f32
    %102 = vector.broadcast %cst_30 : f32 to vector<8x256xf32>
    %103 = arith.mulf %102, %99 : vector<8x256xf32>
    %104 = arith.select %101, %99, %103 : vector<8x256xi1>, vector<8x256xf32>
    %c3_31 = arith.constant 3 : index
    %c0_32 = arith.constant 0 : index
    %c0_33 = arith.constant 0 : index
    %105 = vector.load %arg5[%c3_31, %c0_32, %c0_33] : memref<4x8x256xf32, #tpu.memory_space<vmem>>, vector<1x8x256xf32>
    %106 = vector.shape_cast %105 : vector<1x8x256xf32> to vector<8x256xf32>
    %107 = vector.shape_cast %104 : vector<8x256xf32> to vector<1x8x256xf32>
    tpu.vector_store %arg5[%c3_31, %c0_32, %c0_33], %107 {strides = array<i32>} : memref<4x8x256xf32, #tpu.memory_space<vmem>>, vector<1x8x256xf32>,
    %c0_i32 = arith.constant 0 : i32
    %c256_i32 = arith.constant 256 : i32
    %108 = arith.muli %c0_i32, %c256_i32 : i32
    %109 = tpu.assume_multiple %108, 256 : i32
    %c0_34 = arith.constant 0 : index
    %c0_35 = arith.constant 0 : index
    %110 = arith.index_cast %109 : i32 to index
    %111 = vector.load %arg5[%c0_34, %c0_35, %110] : memref<4x8x256xf32, #tpu.memory_space<vmem>>, vector<1x8x256xf32>
    %112 = vector.shape_cast %111 : vector<1x8x256xf32> to vector<8x256xf32>
    %c1_36 = arith.constant 1 : index
    %c0_37 = arith.constant 0 : index
    %113 = arith.index_cast %109 : i32 to index
    %114 = vector.load %arg5[%c1_36, %c0_37, %113] : memref<4x8x256xf32, #tpu.memory_space<vmem>>, vector<1x8x256xf32>
    %115 = vector.shape_cast %114 : vector<1x8x256xf32> to vector<8x256xf32>
    %c2_38 = arith.constant 2 : index
    %c0_39 = arith.constant 0 : index
    %116 = arith.index_cast %109 : i32 to index
    %117 = vector.load %arg5[%c2_38, %c0_39, %116] : memref<4x8x256xf32, #tpu.memory_space<vmem>>, vector<1x8x256xf32>
    %118 = vector.shape_cast %117 : vector<1x8x256xf32> to vector<8x256xf32>
    %c3_40 = arith.constant 3 : index
    %c0_41 = arith.constant 0 : index
    %119 = arith.index_cast %109 : i32 to index
    %120 = vector.load %arg5[%c3_40, %c0_41, %119] : memref<4x8x256xf32, #tpu.memory_space<vmem>>, vector<1x8x256xf32>
    %121 = vector.shape_cast %120 : vector<1x8x256xf32> to vector<8x256xf32>
    %c0_42 = arith.constant 0 : index
    %c0_43 = arith.constant 0 : index
    %c0_44 = arith.constant 0 : index
    %122 = vector.load %arg3[%c0_42, %c0_43, %c0_44] : memref<4x256x1024xf32, #tpu.memory_space<vmem>>, vector<1x256x1024xf32>
    %123 = vector.shape_cast %122 : vector<1x256x1024xf32> to vector<256x1024xf32>
    %cst_45 = arith.constant dense<0.000000e+00> : vector<8x1024xf32>
    %124 = tpu.matmul %112, %123, %cst_45 {dimension_numbers = #tpu.dot_dimension_numbers<[1], [0], [0], [1], [0, 0, 1, 1], [], []>} : vector<8x256xf32>, vector<256x1024xf32>, vector<8x1024xf32> -> vector<8x1024xf32>
    %c1_46 = arith.constant 1 : index
    %c0_47 = arith.constant 0 : index
    %c0_48 = arith.constant 0 : index
    %125 = vector.load %arg3[%c1_46, %c0_47, %c0_48] : memref<4x256x1024xf32, #tpu.memory_space<vmem>>, vector<1x256x1024xf32>
    %126 = vector.shape_cast %125 : vector<1x256x1024xf32> to vector<256x1024xf32>
    %cst_49 = arith.constant dense<0.000000e+00> : vector<8x1024xf32>
    %127 = tpu.matmul %115, %126, %cst_49 {dimension_numbers = #tpu.dot_dimension_numbers<[1], [0], [0], [1], [0, 0, 1, 1], [], []>} : vector<8x256xf32>, vector<256x1024xf32>, vector<8x1024xf32> -> vector<8x1024xf32>
    %128 = arith.addf %124, %127 : vector<8x1024xf32>
    %c2_50 = arith.constant 2 : index
    %c0_51 = arith.constant 0 : index
    %c0_52 = arith.constant 0 : index
    %129 = vector.load %arg3[%c2_50, %c0_51, %c0_52] : memref<4x256x1024xf32, #tpu.memory_space<vmem>>, vector<1x256x1024xf32>
    %130 = vector.shape_cast %129 : vector<1x256x1024xf32> to vector<256x1024xf32>
    %cst_53 = arith.constant dense<0.000000e+00> : vector<8x1024xf32>
    %131 = tpu.matmul %118, %130, %cst_53 {dimension_numbers = #tpu.dot_dimension_numbers<[1], [0], [0], [1], [0, 0, 1, 1], [], []>} : vector<8x256xf32>, vector<256x1024xf32>, vector<8x1024xf32> -> vector<8x1024xf32>
    %132 = arith.addf %128, %131 : vector<8x1024xf32>
    %c3_54 = arith.constant 3 : index
    %c0_55 = arith.constant 0 : index
    %c0_56 = arith.constant 0 : index
    %133 = vector.load %arg3[%c3_54, %c0_55, %c0_56] : memref<4x256x1024xf32, #tpu.memory_space<vmem>>, vector<1x256x1024xf32>
    %134 = vector.shape_cast %133 : vector<1x256x1024xf32> to vector<256x1024xf32>
    %cst_57 = arith.constant dense<0.000000e+00> : vector<8x1024xf32>
    %135 = tpu.matmul %121, %134, %cst_57 {dimension_numbers = #tpu.dot_dimension_numbers<[1], [0], [0], [1], [0, 0, 1, 1], [], []>} : vector<8x256xf32>, vector<256x1024xf32>, vector<8x1024xf32> -> vector<8x1024xf32>
    %136 = arith.addf %132, %135 : vector<8x1024xf32>
    %c4_i32 = arith.constant 4 : i32
    %137 = arith.muli %c0_i32, %c4_i32 : i32
    %c256_i32_58 = arith.constant 256 : i32
    %138 = arith.muli %137, %c256_i32_58 : i32
    %139 = tpu.assume_multiple %138, 1024 : i32
    %c0_59 = arith.constant 0 : index
    %c0_60 = arith.constant 0 : index
    %140 = arith.index_cast %139 : i32 to index
    %141 = vector.load %arg4[%c0_59, %c0_60, %140] : memref<1x8x1024xf32, #tpu.memory_space<vmem>>, vector<1x8x1024xf32>
    %142 = vector.shape_cast %141 : vector<1x8x1024xf32> to vector<8x1024xf32>
    %143 = vector.shape_cast %136 : vector<8x1024xf32> to vector<1x8x1024xf32>
    tpu.vector_store %arg4[%c0_59, %c0_60, %140], %143 {strides = array<i32>} : memref<1x8x1024xf32, #tpu.memory_space<vmem>>, vector<1x8x1024xf32>,
    %c1_i32 = arith.constant 1 : i32
    return
  }
  func.func @transform_0(%arg0: i32) -> (i32, i32, i32) {
    %c0_i32 = arith.constant 0 : i32
    %c0_i32_0 = arith.constant 0 : i32
    %c0_i32_1 = arith.constant 0 : i32
    return %arg0, %c0_i32, %c0_i32_0 : i32, i32, i32
  }
  func.func @transform_1(%arg0: i32) -> (i32, i32) {
    %c0_i32 = arith.constant 0 : i32
    %c0_i32_0 = arith.constant 0 : i32
    %c0_i32_1 = arith.constant 0 : i32
    return %c0_i32, %c0_i32_0 : i32, i32
  }
  func.func @transform_2(%arg0: i32) -> (i32, i32, i32) {
    %c0_i32 = arith.constant 0 : i32
    %c0_i32_0 = arith.constant 0 : i32
    %c0_i32_1 = arith.constant 0 : i32
    %c0_i32_2 = arith.constant 0 : i32
    return %c0_i32, %c0_i32_0, %c0_i32_1 : i32, i32, i32
  }
  func.func @transform_3(%arg0: i32) -> (i32, i32, i32) {
    %c0_i32 = arith.constant 0 : i32
    %c0_i32_0 = arith.constant 0 : i32
    %c0_i32_1 = arith.constant 0 : i32
    return %arg0, %c0_i32, %c0_i32_0 : i32, i32, i32
  }
}

</mosaic_0001>

<bundles_post_ra>
// kernel: tpu_custom_call.1
= control target key start
LH: loop header
LB: loop body
LE: loop exit
PB: predicated region body
PF: predicated region fallthrough
CT: control target
= control target key end

     0   :  { %8 = vsyncpa [#allocation4], 0  ;;  %s4446_s0 = inlined_call_operand.hbm [shape: f32[2,4,256], index: 0, kind: input, shape index: {}]   ;;  %s4447_s1 = inlined_call_operand.vmem [shape: f32[32,4], index: 1, kind: input, shape index: {}]   ;;  %s4448_s2 = inlined_call_operand.hbm [shape: f32[4,256,1024], index: 2, kind: input, shape index: {}]   ;;  %s4449_s3 = inlined_call_operand.hbm [shape: f32[2,8,1024], index: 3, kind: output, shape index: {}]  }
   0x1   :  { %10 = vsyncpa [#allocation4 + $0x1], 0 }
   0x2   :  { %11 = vsyncpa [#allocation7], 0 }
   0x3   :  { %12 = vsyncpa [#allocation5], 0 }
   0x4   :  { %14 = vsyncpa [#allocation5 + $0x1], 0  ;;  %s4100_s12 = smov 0   ;;  %s4102_s13 = smov 0  }
   0x5   :  { %s4104_s14 = smov 0   ;;  %s4106_s15 = smov 0  }
   0x6 LB: > { %s4121_s16 = sadd.s32 4294967295, %s4069_s15   ;;  %s2799_s17 = sadd.s32 4294967294, %s4069_s15   ;;  %s4069_s15 = sphi %s4106_s15, %s4469_s15   ;;  %s4065_s14 = sphi %s4104_s14, %s4468_s14   ;;  %s4061_s13 = sphi %s4102_s13, %s4467_s13   ;;  %s4057_s12 = sphi %s4100_s12, %s4466_s12  }
   0x7   : > { %p40_p0 = scmp.ne.s32.totalorder %s4061_s13, %s4057_s12  ;;  %p4450_p1 = scmp.eq.s32.totalorder %s4121_s16, 0 }
   0x8   : > { %p112_p3 = scmp.eq.s32.totalorder %s2799_s17, 1  ;;  %p2800_p5 = scmp.ge.s32.totalorder %s4069_s15, 1 }
   0x9   : > { %p4130_p4 = por %p4450_p1, %p40_p0  ;;  %p119_p7 = scmp.lt.s32.totalorder %s4069_s15, 3 }
   0xa   : > { %p4135_p6 = por %p112_p3, %p40_p0  ;;  %s4071_s21 = smov [#allocation6]  }
   0xb   : > { %s4453_s18 = scalar_select %p4130_p4, 1, 0 }
   0xc   : > { %s4454_s19 = scalar_select %p4135_p6, 1, 0 }
   0xd   : > { %p4140_p8 = pnand %p2800_p5, %p119_p7  ;;  %s134_s22 = sshll.u32 %s4071_s21, 4  ;;  %s4144_s22 = int_to_ptr.vmem [resolvable:$true] %s134_s22 }
   0xe   : > { %s4156_s24 = sadd.s32 1, %s4069_s15   ;;  %s27_s25 = sadd.s32 1, %s4065_s14 }
   0xf   : > { %s4455_s20 = scalar_select %p4140_p8, 1, 0 }
  0x10   : > { %p3873_p9 = pneg %p4140_p8  ;;  %s24_s26 = ssub.s32 %s4069_s15, %s4156_s24 }
  0x11   : > { %s3941_s29 = scalar_lea.hbm %s4448_s2, 131072 }
  0x12   : > { %p4151_p11 = pnand %p3873_p9, %p4450_p1  ;;  %p3942_p12 = scmp.ne.s32.totalorder %s4448_s2, %s3941_s29 }
  0x13   : > { %p3948_p5 = scmp.lt.u32.totalorder %s3941_s29, %s4448_s2 }
  0x14   : > { %p3943_p13 = pneg %p4151_p11 }
  0x16   : > { %p3944_p0 = pnand %p3943_p13, %p3942_p12 }
  0x18   : > { %p3945_p3 = pneg %p3944_p0 }
  0x1a   : > { %p3950_p7 = pnand %p3948_p5, %p3945_p3 }
  0x1c   : > { %3953 = shalt.err (!%p3950_p7)
}
  0x1d   : > { %s3954_s7 = scalar_lea.vmem %s4144_s22, 131072  ;;  %p3962_p2 = scmp.lt.s32.totalorder %s4144_s22, %s4144_s22 }
  0x1e   : > { %p3955_p9 = scmp.ne.s32.totalorder %s4144_s22, %s3954_s7  ;;  %p3963_p6 = scmp.lt.s32.totalorder %s3954_s7, %s3954_s7 }
  0x20   : > { %p3957_p10 = pnand %p3955_p9, %p3943_p13  ;;  %p3964_p4 = por %p3963_p6, %p3962_p2 }
  0x22   : > { %p3958_p1 = pneg %p3957_p10 }
  0x24   : > { %p3965_p8 = pnand %p3964_p4, %p3958_p1 }
  0x26   : > { %3968 = shalt.err (!%p3965_p8)
}
  0x27   : > { %s4072_s8 = smov 1024   ;;  %s4073_s9 = smov 64  }
  0x28   : > { %3876 = dma.hbm_to_vmem [thread:$0]  (!%p4151_p11), %s4448_s2, 131072, %s4144_s22, [#allocation7], %s4072_s8, %s4072_s8, %s4073_s9  }
  0x29   : > { %p25_p2 = scmp.eq.s32.totalorder %s24_s26, 0  ;;  %p34_p1 = scmp.ne.s32.totalorder %s4065_s14, %s4061_s13 }
  0x2a   : > { %p35_p4 = scmp.eq.s32.totalorder %s4069_s15, 0  ;;  %p3886_p6 = scmp.lt.s32.totalorder %s4069_s15, 2 }
  0x2b   : > { %s4187_s17 = scalar_select %p25_p2, %s4065_s14, %s27_s25  }
  0x2c   : > { %p36_p8 = por %p35_p4, %p34_p1  ;;  %p4457_p10 = scmp.eq.s32.totalorder %s4121_s16, 1 }
  0x2d   : > { %s148_s27 = sand.u32 1, %s4065_s14   ;;  %s2815_s28 = sshll.u32 %s4069_s15, 7 }
  0x2e   : > { %p4191_p12 = por %p4457_p10, %p34_p1  ;;  %s2803_s29 = sshll.u32 %s148_s27, 3 }
  0x2f   : > { %s4200_s4 = scalar_lea.hbm %s4446_s0, %s2815_s28  ;;  %s152_s22 = scalar_lea.vmem [#allocation3], %s2803_s29 }
  0x30   : > { %s160_s25 = sshll.u32 %s152_s22, 4  ;;  %p4202_p11 = pnand %p3886_p6, %p36_p8  ;;  %s4206_s25 = int_to_ptr.vmem [resolvable:$true] %s160_s25 }
  0x31   : > { %s149_s5 = scalar_lea.sflag [#allocation4], %s148_s27  ;;  %s3969_s6 = scalar_lea.hbm %s4200_s4, 128 }
  0x32   : > { %p3970_p13 = scmp.ne.s32.totalorder %s4200_s4, %s3969_s6  ;;  %p3971_p0 = pneg %p4202_p11 }
  0x33   : > { %s3974_s9 = scalar_lea.hbm %s4446_s0, 256  ;;  %p3975_p7 = scmp.lt.u32.totalorder %s4200_s4, %s4446_s0 }
  0x34   : > { %p3972_p3 = pnand %p3971_p0, %p3970_p13  ;;  %p3976_p9 = scmp.lt.u32.totalorder %s3974_s9, %s3969_s6 }
  0x35   : > { %p3978_p1 = scmp.lt.u32.totalorder %s3969_s6, %s4200_s4 }
  0x36   : > { %p3973_p5 = pneg %p3972_p3  ;;  %p3977_p2 = por %p3976_p9, %p3975_p7 }
  0x38   : > { %p3979_p4 = por %p3978_p1, %p3977_p2 }
  0x3a   : > { %p3980_p6 = pnand %p3979_p4, %p3973_p5 }
  0x3c   : > { %3983 = shalt.err (!%p3980_p6)
}
  0x3d   : > { %s3984_s27 = scalar_lea.vmem %s4206_s25, 128  ;;  %s4074_s28 = smov [#allocation3]  }
  0x3e   : > { %p3985_p8 = scmp.ne.s32.totalorder %s4206_s25, %s3984_s27  ;;  %s3989_s29 = sshll.u32 %s4074_s28, 4  ;;  %s3990_s29 = int_to_ptr.vmem [resolvable:$false] %s3989_s29 }
  0x3f   : > { %s3991_s23 = scalar_lea.vmem %s3990_s29, 256  ;;  %p3992_p3 = scmp.lt.s32.totalorder %s4206_s25, %s3990_s29 }
  0x40   : > { %p3987_p10 = pnand %p3985_p8, %p3971_p0  ;;  %p3993_p7 = scmp.lt.s32.totalorder %s3991_s23, %s3984_s27 }
  0x42   : > { %p3988_p13 = pneg %p3987_p10  ;;  %p3994_p9 = por %p3993_p7, %p3992_p3 }
  0x44   : > { %p3995_p2 = pnand %p3994_p9, %p3988_p13 }
  0x46   : > { %3998 = shalt.err (!%p3995_p2)
}
  0x47   : > { %3880 = dma.hbm_to_vmem [thread:$0]  (!%p4202_p11), %s4200_s4, 128, %s4206_s25, %s149_s5  }
  0x48   : > { %p4460_p5 = scmp.ne.s32.totalorder %s4455_s20, 0 }
  0x49   : > { %s4236_s30 = sand.u32 (!%p4460_p5), 1, %s4061_s13   ;;  %p4461_p0 = scmp.ne.s32.totalorder (!%p4460_p5), %s4453_s18, 0 }
  0x4a   : > { %169 = sbr.rel (%p4460_p5) target bundleno = 1260 (0x4ec), region = 32  ;;  %s2807_s22 = sshll.u32 (!%p4460_p5), %s4236_s30, 3 }
  0x4b   : > { %s172_s6 = scalar_lea.sflag (!%p4460_p5), [#allocation4], %s4236_s30  ;;  %s4240_s7 = scalar_lea.vmem (!%p4460_p5), [#allocation3], %s2807_s22 }
  0x51   : > { %4044 = dma.done.wait (%p4461_p0), %s172_s6, 128  }
  0x52   : > { %4046 = vsyncadd (%p4461_p0), %s172_s6, 4294967168  ;;  %p4462_p11 = scmp.eq.s32.totalorder %s4121_s16, 0 }
  0x54   : > { %4048 = dma.done.wait (%p4462_p11), [#allocation7], 131072   ;;  %p4463_p1 = pmov %p4462_p11 }
  0x55   : > { %v4075_v0 = vmov 1   ;;  %v4076_v1 = vmov 0   ;;  %v203_v2 = vld [vmem:[%s4447_s1] sm:$0xff]  ;;  %v204_v3 = vld [vmem:[%s4447_s1 + $0x8] sm:$0xff]  ;;  %v205_v4 = vld [vmem:[%s4447_s1 + $0x10] sm:$0xff]  ;;  %v4077_v5 = vmov 2   ;;  %v228_v8 = vlaneseq }
  0x56   : > { %4050 = vsyncadd (%p4463_p1), [#allocation7], 4294836224  ;;  %3929 = vset.pattern.permute.xlu1 %v4075_v0  ;;  %3928 = vset.pattern.permute.xlu0 %v4076_v1  ;;  %v206_v6 = vld [vmem:[%s4447_s1 + $0x18] sm:$0xff]  ;;  %v4078_v7 = vmov 3   ;;  %v202_v18 = vld [vmem:[%s4240_s7] sm:$0xff]  ;;  %s2809_s10 = sshll.u32 %s4236_s30, 6 }
  0x57   : > { %255 = vperm.xlu1 %3929, %v203_v2   ;;  %209 = vperm.xlu0 %3928, %v203_v2   ;;  %v229_v11 = vshrl.u32 %v228_v8, 7  ;;  %s201_s11 = scalar_lea.vmem [#allocation8], %s2809_s10  ;;  %s2816_s27 = sshll.u32 %s4121_s16, 10 }
  0x58   : > { %s2716_s28 = sshll.u32 %s201_s11, 4  ;;  %s4402_s22 = scalar_lea.hbm %s4449_s3, %s2816_s27  ;;  %s4404_s28 = int_to_ptr.vmem [resolvable:$true] %s2716_s28 }
  0x59   : > { %v272_v14 = vsub.s32 1, %v229_v11  ;;  %v276_v15 = vsub.s32 5, %v229_v11  ;;  %v230_v16 = vsub.s32 0, %v229_v11  ;;  %v234_v17 = vsub.s32 4, %v229_v11  ;;  %s2702_s16 = scalar_lea.sflag [#allocation5], %s4236_s30  ;;  %s3999_s6 = scalar_lea.vmem %s4404_s28, 1024 }
  0x5a   : > { %v322_v21 = vsub.s32 2, %v229_v11  ;;  %v326_v22 = vsub.s32 6, %v229_v11  ;;  %v372_v29 = vsub.s32 3, %v229_v11  ;;  %v376_v30 = vsub.s32 7, %v229_v11  ;;  %p4000_p4 = scmp.ne.s32.totalorder %s4404_s28, %s3999_s6  ;;  %s4079_s7 = smov [#allocation8]  }
  0x5b   : > { %259 = vperm.xlu1 %3929, %v204_v3   ;;  %214 = vperm.xlu0 %3928, %v204_v3   ;;  %v273_v23 = vrot.slane %v202_v18, %v272_v14  ;;  %v277_v24 = vrot.slane %v202_v18, %v276_v15  ;;  %v231_v25 = vrot.slane %v202_v18, %v230_v16  ;;  %s4003_s20 = sshll.u32 %s4079_s7, 4  ;;  %s4004_s20 = int_to_ptr.vmem [resolvable:$false] %s4003_s20 }
  0x5c   : > { %v235_v26 = vrot.slane %v202_v18, %v234_v17  ;;  %v323_v27 = vrot.slane %v202_v18, %v322_v21  ;;  %v327_v28 = vrot.slane %v202_v18, %v326_v22  ;;  %v373_v39 = vrot.slane %v202_v18, %v372_v29  ;;  %p4001_p6 = pnand %p4000_p4, %p4191_p12  ;;  %s4005_s4 = scalar_lea.vmem %s4004_s20, 2048 }
  0x5d   : > { %v283_v33 = vrot.slane %v273_v23, %v272_v14  ;;  %v287_v34 = vrot.slane %v277_v24, %v272_v14  ;;  %v241_v35 = vrot.slane %v231_v25, %v230_v16  ;;  %v377_v40 = vrot.slane %v202_v18, %v376_v30  ;;  %p4006_p10 = scmp.lt.s32.totalorder %s4404_s28, %s4004_s20  ;;  %p4007_p13 = scmp.lt.s32.totalorder %s4005_s4, %s3999_s6 }
  0x5e   : > { %v245_v36 = vrot.slane %v235_v26, %v230_v16  ;;  %v333_v37 = vrot.slane %v323_v27, %v322_v21  ;;  %v337_v38 = vrot.slane %v327_v28, %v322_v21  ;;  %v383_v49 = vrot.slane %v373_v39, %v372_v29  ;;  %p4002_p8 = pneg %p4001_p6 }
  0x5f   : > { %263 = vperm.xlu1 %3929, %v205_v4   ;;  %219 = vperm.xlu0 %3928, %v205_v4   ;;  %v387_v50 = vrot.slane %v377_v40, %v372_v29  ;;  %p4008_p3 = por %p4007_p13, %p4006_p10 }
  0x61   : > { %p4009_p7 = pnand %p4008_p3, %p4002_p8 }
  0x63   : > { %3931 = vset.pattern.permute.xlu1 %v4077_v5  ;;  %3930 = vset.pattern.permute.xlu0 %v4077_v5 }
  0x64   : > { %309 = vperm.xlu1 %3931, %v204_v3   ;;  %305 = vperm.xlu0 %3930, %v203_v2  }
  0x68   : > { %3932 = vset.pattern.permute.xlu1 %v4076_v1  ;;  %3933 = vset.pattern.permute.xlu0 %v4075_v0 }
  0x69   : > { %224 = vperm.xlu1 %3932, %v206_v6   ;;  %267 = vperm.xlu0 %3933, %v206_v6  }
  0x6d   : > { %3934 = vset.pattern.permute.xlu1 %v4077_v5  ;;  %3936 = vset.pattern.permute.xlu0 %v4078_v7 }
  0x6e   : > { %313 = vperm.xlu1 %3934, %v205_v4   ;;  %359 = vperm.xlu0 %3936, %v204_v3  }
  0x72   : > { %3935 = vset.pattern.permute.xlu1 %v4078_v7  ;;  %367 = vperm.xlu0 %3936, %v206_v6  }
  0x73   : > { %355 = vperm.xlu1 %3935, %v203_v2  }
  0x77   : > { %3937 = vset.pattern.permute.xlu1 %v4077_v5 }
  0x78   : > { %317 = vperm.xlu1 %3937, %v206_v6  }
  0x7c   : > { %3938 = vset.pattern.permute.xlu1 %v4078_v7 }
  0x7d   : > { %363 = vperm.xlu1 %3938, %v205_v4  }
  0xd6   : > { %v256_v9 = vpop.permute.xlu1 %255  ;;  %v210_v10 = vpop.permute.xlu0 %209 }
  0xd7   : > { %v288_v51 = vmul.f32 %v283_v33, %v256_v9  ;;  %v246_v52 = vmul.f32 %v241_v35, %v210_v10  ;;  %v289_v53 = vmul.f32 %v287_v34, %v256_v9  ;;  %v247_v54 = vmul.f32 %v245_v36, %v210_v10 }
  0xd9   : > { %v296_v1 = vadd.f32 %v288_v51, %v246_v52  ;;  %v297_v2 = vadd.f32 %v289_v53, %v247_v54  ;;  %v774_v51 = vld [vmem:[#allocation6 + $0x818] sm:$0xff]  ;;  %v771_v54 = vld [vmem:[#allocation6 + $0x800] sm:$0xff] }
  0xda   : > { %v260_v12 = vpop.permute.xlu1 %259  ;;  %v215_v13 = vpop.permute.xlu0 %214  ;;  %v782_v53 = vld [vmem:[#allocation6 + $0x858] sm:$0xff] }
  0xdb   : > { %v290_v41 = vmul.f32 %v283_v33, %v260_v12  ;;  %v291_v42 = vmul.f32 %v287_v34, %v260_v12  ;;  %v248_v43 = vmul.f32 %v241_v35, %v215_v13  ;;  %v249_v44 = vmul.f32 %v245_v36, %v215_v13 }
  0xdd   : > { %v298_v55 = vadd.f32 %v290_v41, %v248_v43  ;;  %v299_v56 = vadd.f32 %v291_v42, %v249_v44 }
  0xde   : > { %v4263_v19 = vpop.permute.xlu1 %263  ;;  %v4265_v20 = vpop.permute.xlu0 %219 }
  0xdf   : > { %v292_v18 = vmul.f32 %v283_v33, %v4263_v19  ;;  %v293_v21 = vmul.f32 %v287_v34, %v4263_v19  ;;  %v250_v22 = vmul.f32 %v241_v35, %v4265_v20  ;;  %v251_v23 = vmul.f32 %v245_v36, %v4265_v20 }
  0xe1   : > { %v300_v19 = vadd.f32 %v292_v18, %v250_v22  ;;  %v811_v18 = vld [vmem:[#allocation6 + $0x940] sm:$0xff]  ;;  %v813_v22 = vld [vmem:[#allocation6 + $0x950] sm:$0xff] }
  0xe3   : > { %v310_v31 = vpop.permute.xlu1 %309  ;;  %v306_v32 = vpop.permute.xlu0 %305 }
  0xe4   : > { %v340_v47 = vmul.f32 %v333_v37, %v310_v31  ;;  %v341_v48 = vmul.f32 %v337_v38, %v310_v31  ;;  %v338_v57 = vmul.f32 %v333_v37, %v306_v32  ;;  %v339_v58 = vmul.f32 %v337_v38, %v306_v32 }
  0xe6   : > { %v348_v61 = vadd.f32 %v340_v47, %v298_v55  ;;  %v349_v62 = vadd.f32 %v341_v48, %v299_v56  ;;  %v346_v5 = vadd.f32 %v338_v57, %v296_v1  ;;  %v347_v6 = vadd.f32 %v339_v58, %v297_v2  ;;  %v772_v47 = vld [vmem:[#allocation6 + $0x808] sm:$0xff]  ;;  %v773_v56 = vld [vmem:[#allocation6 + $0x810] sm:$0xff]  ;;  %v787_v1 = vld [vmem:[#allocation6 + $0x880] sm:$0xff] }
  0xe7   : > { %v780_v48 = vld [vmem:[#allocation6 + $0x848] sm:$0xff]  ;;  %v781_v57 = vld [vmem:[#allocation6 + $0x850] sm:$0xff]  ;;  %v795_v2 = vld [vmem:[#allocation6 + $0x8c0] sm:$0xff] }
  0xe8   : > { %v225_v45 = vpop.permute.xlu1 %224  ;;  %v268_v46 = vpop.permute.xlu0 %267  ;;  %v2817_v52 = vpack.c.bf16 %v780_v48, %v772_v47  ;;  %v788_v58 = vld [vmem:[#allocation6 + $0x888] sm:$0xff]  ;;  %v845_v48 = vld [vmem:[#allocation6 + $0xa50] sm:$0xff] }
  0xe9   : > { %v252_v7 = vmul.f32 %v241_v35, %v225_v45  ;;  %v253_v8 = vmul.f32 %v245_v36, %v225_v45  ;;  %v294_v11 = vmul.f32 %v283_v33, %v268_v46  ;;  %v295_v12 = vmul.f32 %v287_v34, %v268_v46 }
  0xea   : > { %v301_v34 = vadd.f32 %v293_v21, %v251_v23  ;;  %2818 = vmatprep.subr.bf16.mxu0 %v2817_v52  ;;  %v805_v21 = vld [vmem:[#allocation6 + $0x910] sm:$0xff]  ;;  %v860_v52 = vld [vmem:[#allocation6 + $0xac8] sm:$0xff] }
  0xeb   : > { %v302_v24 = vadd.f32 %v294_v11, %v252_v7  ;;  %v303_v25 = vadd.f32 %v295_v12, %v253_v8  ;;  %v797_v7 = vld [vmem:[#allocation6 + $0x8d0] sm:$0xff]  ;;  %v804_v8 = vld [vmem:[#allocation6 + $0x908] sm:$0xff]  ;;  %v806_v12 = vld [vmem:[#allocation6 + $0x918] sm:$0xff] }
  0xed   : > { %v314_v59 = vpop.permute.xlu1 %313  ;;  %v360_v60 = vpop.permute.xlu0 %359 }
  0xee   : > { %v390_v63 = vmul.f32 %v383_v49, %v360_v60  ;;  %v391_v0 = vmul.f32 %v387_v50, %v360_v60  ;;  %v342_v32 = vmul.f32 %v333_v37, %v314_v59  ;;  %v343_v39 = vmul.f32 %v337_v38, %v314_v59  ;;  %v796_v60 = vld [vmem:[#allocation6 + $0x8c8] sm:$0xff] }
  0xef   : > { %v2883_v59 = vpack.c.bf16 %v781_v57, %v773_v56  ;;  %v851_v56 = vld [vmem:[#allocation6 + $0xa80] sm:$0xff] }
  0xf0   : > { %v4267_v3 = vadd.f32 %v390_v63, %v348_v61  ;;  %v4269_v4 = vadd.f32 %v391_v0, %v349_v62  ;;  %v350_v36 = vadd.f32 %v342_v32, %v300_v19  ;;  %v351_v42 = vadd.f32 %v343_v39, %v301_v34  ;;  %v790_v61 = vld [vmem:[#allocation6 + $0x898] sm:$0xff]  ;;  %v821_v39 = vld [vmem:[#allocation6 + $0x990] sm:$0xff]  ;;  %v844_v19 = vld [vmem:[#allocation6 + $0xa48] sm:$0xff] }
  0xf1   : > { %v368_v15 = vpop.permute.xlu0 %367  ;;  %v798_v62 = vld [vmem:[#allocation6 + $0x8d8] sm:$0xff]  ;;  %v2821_v63 = vpack.c.bf16 %v796_v60, %v788_v58  ;;  %v859_v57 = vld [vmem:[#allocation6 + $0xac0] sm:$0xff]  ;;  %v853_v58 = vld [vmem:[#allocation6 + $0xa90] sm:$0xff] }
  0xf2   : > { %v356_v9 = vpop.permute.xlu1 %355  ;;  %v407_v10 = vadd.f32 %v4269_v4, %v4267_v3  ;;  %v394_v30 = vmul.f32 %v383_v49, %v368_v15  ;;  %v395_v31 = vmul.f32 %v387_v50, %v368_v15  ;;  %v2885_v0 = vpack.c.bf16 %v798_v62, %v790_v61  ;;  %v838_v34 = vld [vmem:[#allocation6 + $0xa18] sm:$0xff]  ;;  %v861_v60 = vld [vmem:[#allocation6 + $0xad0] sm:$0xff]  ;;  %v868_v61 = vld [vmem:[#allocation6 + $0xb08] sm:$0xff] }
  0xf3   : > { %v388_v13 = vmul.f32 %v383_v49, %v356_v9  ;;  %v389_v14 = vmul.f32 %v387_v50, %v356_v9  ;;  %v812_v9 = vld [vmem:[#allocation6 + $0x948] sm:$0xff] }
  0xf4   : > { %408 = vadd.xlane.f32.xlu0 %v407_v10  ;;  %v2825_v11 = vpack.c.bf16 %v812_v9, %v804_v8  ;;  %v876_v62 = vld [vmem:[#allocation6 + $0xb48] sm:$0xff]  ;;  %v869_v8 = vld [vmem:[#allocation6 + $0xb10] sm:$0xff] }
  0xf5   : > { %v4273_v16 = vadd.f32 %v388_v13, %v346_v5  ;;  %v4275_v17 = vadd.f32 %v389_v14, %v347_v6  ;;  %v789_v5 = vld [vmem:[#allocation6 + $0x890] sm:$0xff]  ;;  %v2823_v6 = vpack.c.bf16 %v795_v2, %v787_v1  ;;  %v814_v13 = vld [vmem:[#allocation6 + $0x958] sm:$0xff]  ;;  %v803_v14 = vld [vmem:[#allocation6 + $0x900] sm:$0xff]  ;;  %v2839_v1 = vpack.c.bf16 %v859_v57, %v851_v56 }
  0xf6   : > { %v2887_v10 = vpack.c.bf16 %v797_v7, %v789_v5  ;;  %v2889_v15 = vpack.c.bf16 %v814_v13, %v806_v12  ;;  %v2827_v23 = vpack.c.bf16 %v811_v18, %v803_v14  ;;  %v2903_v2 = vpack.c.bf16 %v861_v60, %v853_v58  ;;  %v875_v7 = vld [vmem:[#allocation6 + $0xb40] sm:$0xff]  ;;  %v892_v12 = vld [vmem:[#allocation6 + $0xbc8] sm:$0xff]  ;;  %v886_v13 = vld [vmem:[#allocation6 + $0xb98] sm:$0xff] }
  0xf7   : > { %v318_v26 = vpop.permute.xlu1 %317  ;;  %v404_v27 = vadd.f32 %v4275_v17, %v4273_v16  ;;  %v2841_v5 = vpack.c.bf16 %v876_v62, %v868_v61  ;;  %v894_v14 = vld [vmem:[#allocation6 + $0xbd8] sm:$0xff] }
  0xf8   : > { %v344_v28 = vmul.f32 %v333_v37, %v318_v26  ;;  %v345_v29 = vmul.f32 %v337_v38, %v318_v26  ;;  %v822_v26 = vld [vmem:[#allocation6 + $0x998] sm:$0xff] }
  0xf9   : > { %405 = vadd.xlane.f32.xlu1 %v404_v27  ;;  %v2891_v27 = vpack.c.bf16 %v813_v22, %v805_v21  ;;  %v883_v22 = vld [vmem:[#allocation6 + $0xb80] sm:$0xff] }
  0xfa   : > { %v352_v33 = vadd.f32 %v344_v28, %v302_v24  ;;  %v353_v40 = vadd.f32 %v345_v29, %v303_v25  ;;  %v820_v24 = vld [vmem:[#allocation6 + $0x988] sm:$0xff]  ;;  %v830_v29 = vld [vmem:[#allocation6 + $0x9d8] sm:$0xff] }
  0xfb   : > { %v828_v25 = vld [vmem:[#allocation6 + $0x9c8] sm:$0xff]  ;;  %v2893_v32 = vpack.c.bf16 %v830_v29, %v822_v26  ;;  %v893_v26 = vld [vmem:[#allocation6 + $0xbd0] sm:$0xff]  ;;  %v902_v29 = vld [vmem:[#allocation6 + $0xc18] sm:$0xff] }
  0xfc   : > { %v364_v35 = vpop.permute.xlu1 %363  ;;  %v4283_v41 = vadd.f32 %v394_v30, %v352_v33  ;;  %v4285_v20 = vadd.f32 %v395_v31, %v353_v40  ;;  %v2829_v28 = vpack.c.bf16 %v828_v25, %v820_v24  ;;  %v819_v30 = vld [vmem:[#allocation6 + $0x980] sm:$0xff]  ;;  %v829_v33 = vld [vmem:[#allocation6 + $0x9d0] sm:$0xff]  ;;  %v836_v40 = vld [vmem:[#allocation6 + $0xa08] sm:$0xff]  ;;  %v2909_v25 = vpack.c.bf16 %v894_v14, %v886_v13 }
  0xfd   : > { %v392_v43 = vmul.f32 %v383_v49, %v364_v35  ;;  %v393_v44 = vmul.f32 %v387_v50, %v364_v35  ;;  %v779_v49 = vld [vmem:[#allocation6 + $0x840] sm:$0xff]  ;;  %v2881_v50 = vpack.c.bf16 %v782_v53, %v774_v51  ;;  %v846_v35 = vld [vmem:[#allocation6 + $0xa58] sm:$0xff]  ;;  %v852_v51 = vld [vmem:[#allocation6 + $0xa88] sm:$0xff] }
  0xfe   : > { %v413_v45 = vadd.f32 %v4285_v20, %v4283_v41  ;;  %v2819_v55 = vpack.c.bf16 %v779_v49, %v771_v54  ;;  %v827_v31 = vld [vmem:[#allocation6 + $0x9c0] sm:$0xff]  ;;  %v2897_v47 = vpack.c.bf16 %v846_v35, %v838_v34  ;;  %v854_v53 = vld [vmem:[#allocation6 + $0xa98] sm:$0xff]  ;;  %v885_v24 = vld [vmem:[#allocation6 + $0xb90] sm:$0xff] }
  0xff   : > { %v4289_v46 = vadd.f32 %v392_v43, %v350_v36  ;;  %v4291_v37 = vadd.f32 %v393_v44, %v351_v42  ;;  %2882 = vmatprep.subr.bf16.mxu1 %v2881_v50  ;;  %v2831_v36 = vpack.c.bf16 %v827_v31, %v819_v30  ;;  %v2895_v42 = vpack.c.bf16 %v829_v33, %v821_v39  ;;  %v835_v44 = vld [vmem:[#allocation6 + $0xa00] sm:$0xff]  ;;  %v862_v54 = vld [vmem:[#allocation6 + $0xad8] sm:$0xff]  ;;  %v901_v34 = vld [vmem:[#allocation6 + $0xc10] sm:$0xff] }
 0x100   : > { %414 = vadd.xlane.f32.xlu1 %v413_v45  ;;  %2820 = vmatpush1.bf16.msra.mxu0 %v2819_v55  ;;  %v2833_v43 = vpack.c.bf16 %v844_v19, %v836_v40  ;;  %v843_v45 = vld [vmem:[#allocation6 + $0xa40] sm:$0xff]  ;;  %v2837_v55 = vpack.c.bf16 %v860_v52, %v852_v51  ;;  %v910_v30 = vld [vmem:[#allocation6 + $0xc58] sm:$0xff]  ;;  %v909_v35 = vld [vmem:[#allocation6 + $0xc50] sm:$0xff] }
 0x101   : > { %v410_v38 = vadd.f32 %v4291_v37, %v4289_v46  ;;  %2884 = vmatpush1.bf16.msra.mxu1 %v2883_v59  ;;  %2822 = vmatprep.subr.bf16.mxu0 %v2821_v63  ;;  %v2835_v49 = vpack.c.bf16 %v843_v45, %v835_v44  ;;  %v2901_v59 = vpack.c.bf16 %v862_v54, %v854_v53  ;;  %v870_v63 = vld [vmem:[#allocation6 + $0xb18] sm:$0xff]  ;;  %v899_v33 = vld [vmem:[#allocation6 + $0xc00] sm:$0xff]  ;;  %v932_v13 = vld [vmem:[#allocation6 + $0xd08] sm:$0xff] }
 0x102   : > { %2886 = vmatprep.subr.bf16.mxu1 %v2885_v0  ;;  %v878_v0 = vld [vmem:[#allocation6 + $0xb58] sm:$0xff]  ;;  %v907_v40 = vld [vmem:[#allocation6 + $0xc40] sm:$0xff]  ;;  %v2913_v19 = vpack.c.bf16 %v910_v30, %v902_v29  ;;  %v940_v14 = vld [vmem:[#allocation6 + $0xd48] sm:$0xff] }
 0x103   : > { %411 = vadd.xlane.f32.xlu0 %v410_v38  ;;  %v837_v38 = vld [vmem:[#allocation6 + $0xa10] sm:$0xff]  ;;  %v2905_v9 = vpack.c.bf16 %v878_v0, %v870_v63  ;;  %v916_v63 = vld [vmem:[#allocation6 + $0xc88] sm:$0xff] }
 0x104   : > { %2824 = vmatpush1.bf16.msra.mxu0 %v2823_v6  ;;  %v2899_v50 = vpack.c.bf16 %v845_v48, %v837_v38  ;;  %v867_v6 = vld [vmem:[#allocation6 + $0xb00] sm:$0xff]  ;;  %v924_v0 = vld [vmem:[#allocation6 + $0xcc8] sm:$0xff] }
 0x105   : > { %2888 = vmatpush1.bf16.msra.mxu1 %v2887_v10  ;;  %2826 = vmatprep.subr.bf16.mxu0 %v2825_v11  ;;  %v877_v10 = vld [vmem:[#allocation6 + $0xb50] sm:$0xff]  ;;  %v884_v11 = vld [vmem:[#allocation6 + $0xb88] sm:$0xff] }
 0x106   : > { %2890 = vmatprep.subr.bf16.mxu1 %v2889_v15  ;;  %v2843_v15 = vpack.c.bf16 %v875_v7, %v867_v6  ;;  %v2907_v18 = vpack.c.bf16 %v877_v10, %v869_v8  ;;  %v2845_v21 = vpack.c.bf16 %v892_v12, %v884_v11  ;;  %v915_v6 = vld [vmem:[#allocation6 + $0xc80] sm:$0xff]  ;;  %v917_v10 = vld [vmem:[#allocation6 + $0xc90] sm:$0xff]  ;;  %v948_v29 = vld [vmem:[#allocation6 + $0xd88] sm:$0xff] }
 0x107   : > { %v923_v7 = vld [vmem:[#allocation6 + $0xcc0] sm:$0xff]  ;;  %v925_v11 = vld [vmem:[#allocation6 + $0xcd0] sm:$0xff]  ;;  %v956_v30 = vld [vmem:[#allocation6 + $0xdc8] sm:$0xff] }
 0x108   : > { %2828 = vmatpush1.bf16.msra.mxu0 %v2827_v23  ;;  %v891_v23 = vld [vmem:[#allocation6 + $0xbc0] sm:$0xff]  ;;  %v2919_v12 = vpack.c.bf16 %v925_v11, %v917_v10 }
 0x109   : > { %2892 = vmatpush1.bf16.msra.mxu1 %v2891_v27  ;;  %2830 = vmatprep.subr.bf16.mxu0 %v2829_v28  ;;  %v900_v27 = vld [vmem:[#allocation6 + $0xc08] sm:$0xff]  ;;  %v2847_v31 = vpack.c.bf16 %v891_v23, %v883_v22  ;;  %v931_v22 = vld [vmem:[#allocation6 + $0xd00] sm:$0xff] }
 0x10a   : > { %2894 = vmatprep.subr.bf16.mxu1 %v2893_v32  ;;  %v908_v28 = vld [vmem:[#allocation6 + $0xc48] sm:$0xff]  ;;  %v2911_v32 = vpack.c.bf16 %v893_v26, %v885_v24  ;;  %v939_v23 = vld [vmem:[#allocation6 + $0xd40] sm:$0xff]  ;;  %v933_v26 = vld [vmem:[#allocation6 + $0xd10] sm:$0xff] }
 0x10b   : > { %v2849_v39 = vpack.c.bf16 %v908_v28, %v900_v27  ;;  %v941_v27 = vld [vmem:[#allocation6 + $0xd50] sm:$0xff]  ;;  %v995_v10 = vld [vmem:[#allocation6 + $0xf00] sm:$0xff] }
 0x10c   : > { %2832 = vmatpush1.bf16.msra.mxu0 %v2831_v36  ;;  %v2851_v36 = vpack.c.bf16 %v907_v40, %v899_v33  ;;  %v2923_v28 = vpack.c.bf16 %v941_v27, %v933_v26  ;;  %v947_v33 = vld [vmem:[#allocation6 + $0xd80] sm:$0xff] }
 0x10d   : > { %2896 = vmatpush1.bf16.msra.mxu1 %v2895_v42  ;;  %2834 = vmatprep.subr.bf16.mxu0 %v2833_v43  ;;  %v2915_v42 = vpack.c.bf16 %v909_v35, %v901_v34  ;;  %v955_v40 = vld [vmem:[#allocation6 + $0xdc0] sm:$0xff]  ;;  %v949_v35 = vld [vmem:[#allocation6 + $0xd90] sm:$0xff] }
 0x10e   : > { %2898 = vmatprep.subr.bf16.mxu1 %v2897_v47  ;;  %v2863_v34 = vpack.c.bf16 %v955_v40, %v947_v33  ;;  %v1011_v26 = vld [vmem:[#allocation6 + $0xf80] sm:$0xff]  ;;  %v784_v33 = vld [vmem:[#allocation6 + $0x868] sm:$0xff]  ;;  %v778_v40 = vld [vmem:[#allocation6 + $0x838] sm:$0xff] }
 0x10f   : > { %v1019_v27 = vld [vmem:[#allocation6 + $0xfc0] sm:$0xff] }
 0x110   : > { %2836 = vmatpush1.bf16.msra.mxu0 %v2835_v49 }
 0x111   : > { %2900 = vmatpush1.bf16.msra.mxu1 %v2899_v50  ;;  %2838 = vmatprep.subr.bf16.mxu0 %v2837_v55 }
 0x112   : > { %2902 = vmatprep.subr.bf16.mxu1 %v2901_v59 }
 0x114   : > { %2840 = vmatpush1.bf16.msra.mxu0 %v2839_v1  ;;  %v918_v1 = vld [vmem:[#allocation6 + $0xc98] sm:$0xff] }
 0x115   : > { %2904 = vmatpush1.bf16.msra.mxu1 %v2903_v2  ;;  %2842 = vmatprep.subr.bf16.mxu0 %v2841_v5  ;;  %v2853_v2 = vpack.c.bf16 %v924_v0, %v916_v63  ;;  %v926_v5 = vld [vmem:[#allocation6 + $0xcd8] sm:$0xff]  ;;  %v981_v63 = vld [vmem:[#allocation6 + $0xe90] sm:$0xff] }
 0x116   : > { %2906 = vmatprep.subr.bf16.mxu1 %v2905_v9  ;;  %v2917_v8 = vpack.c.bf16 %v926_v5, %v918_v1  ;;  %v2855_v9 = vpack.c.bf16 %v923_v7, %v915_v6  ;;  %v989_v1 = vld [vmem:[#allocation6 + $0xed0] sm:$0xff]  ;;  %v1004_v5 = vld [vmem:[#allocation6 + $0xf48] sm:$0xff] }
 0x117   : > { %v2935_v6 = vpack.c.bf16 %v989_v1, %v981_v63  ;;  %v791_v1 = vld [vmem:[#allocation6 + $0x8a0] sm:$0xff] }
 0x118   : > { %2844 = vmatpush1.bf16.msra.mxu0 %v2843_v15  ;;  %v934_v15 = vld [vmem:[#allocation6 + $0xd18] sm:$0xff] }
 0x119   : > { %2908 = vmatpush1.bf16.msra.mxu1 %v2907_v18  ;;  %2846 = vmatprep.subr.bf16.mxu0 %v2845_v21  ;;  %v2857_v18 = vpack.c.bf16 %v940_v14, %v932_v13  ;;  %v942_v21 = vld [vmem:[#allocation6 + $0xd58] sm:$0xff]  ;;  %v997_v13 = vld [vmem:[#allocation6 + $0xf10] sm:$0xff] }
 0x11a   : > { %2910 = vmatprep.subr.bf16.mxu1 %v2909_v25  ;;  %v2921_v24 = vpack.c.bf16 %v942_v21, %v934_v15  ;;  %v2859_v25 = vpack.c.bf16 %v939_v23, %v931_v22  ;;  %v1005_v14 = vld [vmem:[#allocation6 + $0xf50] sm:$0xff]  ;;  %v1020_v21 = vld [vmem:[#allocation6 + $0xfc8] sm:$0xff]  ;;  %v1014_v22 = vld [vmem:[#allocation6 + $0xf98] sm:$0xff] }
 0x11b   : > { %v2939_v23 = vpack.c.bf16 %v1005_v14, %v997_v13 }
 0x11c   : > { %2848 = vmatpush1.bf16.msra.mxu0 %v2847_v31  ;;  %v950_v31 = vld [vmem:[#allocation6 + $0xd98] sm:$0xff] }
 0x11d   : > { %2912 = vmatpush1.bf16.msra.mxu1 %v2911_v32  ;;  %2850 = vmatprep.subr.bf16.mxu0 %v2849_v39  ;;  %v2861_v32 = vpack.c.bf16 %v956_v30, %v948_v29  ;;  %v958_v39 = vld [vmem:[#allocation6 + $0xdd8] sm:$0xff]  ;;  %v1013_v29 = vld [vmem:[#allocation6 + $0xf90] sm:$0xff] }
 0x11e   : > { %2914 = vmatprep.subr.bf16.mxu1 %v2913_v19  ;;  %v2925_v19 = vpack.c.bf16 %v958_v39, %v950_v31  ;;  %v1021_v30 = vld [vmem:[#allocation6 + $0xfd0] sm:$0xff]  ;;  %v2879_v31 = vpack.c.bf16 %v1019_v27, %v1011_v26  ;;  %v776_v39 = vld [vmem:[#allocation6 + $0x828] sm:$0xff]  ;;  %v826_v27 = vld [vmem:[#allocation6 + $0x9b8] sm:$0xff] }
 0x11f   : > { %v832_v26 = vld [vmem:[#allocation6 + $0x9e8] sm:$0xff] }
 0x120   : > { %2852 = vmatpush1.bf16.msra.mxu0 %v2851_v36  ;;  %v957_v36 = vld [vmem:[#allocation6 + $0xdd0] sm:$0xff] }
 0x121   : > { %2916 = vmatpush1.bf16.msra.mxu1 %v2915_v42  ;;  %2854 = vmatprep.subr.bf16.mxu0 %v2853_v2  ;;  %v2927_v42 = vpack.c.bf16 %v957_v36, %v949_v35  ;;  %v996_v2 = vld [vmem:[#allocation6 + $0xf08] sm:$0xff] }
 0x122   : > { %2918 = vmatprep.subr.bf16.mxu1 %v2917_v8  ;;  %v2873_v7 = vpack.c.bf16 %v1004_v5, %v996_v2  ;;  %v998_v8 = vld [vmem:[#allocation6 + $0xf18] sm:$0xff]  ;;  %v799_v2 = vld [vmem:[#allocation6 + $0x8e0] sm:$0xff] }
 0x123   : > { %v2951_v13 = vpack.c.bf16 %v799_v2, %v791_v1  ;;  %v880_v1 = vld [vmem:[#allocation6 + $0xb68] sm:$0xff]  ;;  %v874_v2 = vld [vmem:[#allocation6 + $0xb38] sm:$0xff] }
 0x124   : > { %2856 = vmatpush1.bf16.msra.mxu0 %v2855_v9  ;;  %v1006_v9 = vld [vmem:[#allocation6 + $0xf58] sm:$0xff] }
 0x125   : > { %2920 = vmatpush1.bf16.msra.mxu1 %v2919_v12  ;;  %2858 = vmatprep.subr.bf16.mxu0 %v2857_v18  ;;  %v2937_v11 = vpack.c.bf16 %v1006_v9, %v998_v8  ;;  %v1003_v12 = vld [vmem:[#allocation6 + $0xf40] sm:$0xff]  ;;  %v1012_v18 = vld [vmem:[#allocation6 + $0xf88] sm:$0xff] }
 0x126   : > { %2922 = vmatprep.subr.bf16.mxu1 %v2921_v24  ;;  %v2875_v15 = vpack.c.bf16 %v1003_v12, %v995_v10  ;;  %v2877_v24 = vpack.c.bf16 %v1020_v21, %v1012_v18  ;;  %v816_v10 = vld [vmem:[#allocation6 + $0x968] sm:$0xff]  ;;  %v818_v12 = vld [vmem:[#allocation6 + $0x978] sm:$0xff]  ;;  %v815_v18 = vld [vmem:[#allocation6 + $0x960] sm:$0xff] }
 0x128   : > { %2860 = vmatpush1.bf16.msra.mxu0 %v2859_v25  ;;  %v1022_v25 = vld [vmem:[#allocation6 + $0xfd8] sm:$0xff] }
 0x129   : > { %2924 = vmatpush1.bf16.msra.mxu1 %v2923_v28  ;;  %2862 = vmatprep.subr.bf16.mxu0 %v2861_v32  ;;  %v2941_v28 = vpack.c.bf16 %v1022_v25, %v1014_v22  ;;  %v2943_v32 = vpack.c.bf16 %v1021_v30, %v1013_v29  ;;  %v824_v25 = vld [vmem:[#allocation6 + $0x9a8] sm:$0xff] }
 0x12a   : > { %2926 = vmatprep.subr.bf16.mxu1 %v2925_v19  ;;  %v2945_v19 = vpack.c.bf16 %v784_v33, %v776_v39  ;;  %v2957_v39 = vpack.c.bf16 %v832_v26, %v824_v25 }
 0x12c   : > { %2864 = vmatpush1.bf16.msra.mxu0 %v2863_v34  ;;  %v786_v34 = vld [vmem:[#allocation6 + $0x878] sm:$0xff] }
 0x12d   : > { %2928 = vmatpush1.bf16.msra.mxu1 %v2927_v42  ;;  %v3009_v35 = vpack.c.bf16 %v786_v34, %v778_v40  ;;  %v825_v40 = vld [vmem:[#allocation6 + $0x9b0] sm:$0xff]  ;;  %v840_v34 = vld [vmem:[#allocation6 + $0xa28] sm:$0xff] }
 0x181   : > { %v409_v43 = vpop.xlane.xlu0 %408 }
 0x186   : > { %v406_v44 = vpop.xlane.xlu1 %405 }
 0x187   : > { %v416_v45 = vadd.f32 %v409_v43, %v406_v44  ;;  %v964_v43 = vld [vmem:[#allocation6 + $0xe08] sm:$0xff] }
 0x188   : > { %v972_v44 = vld [vmem:[#allocation6 + $0xe48] sm:$0xff] }
 0x18d   : > { %v415_v48 = vpop.xlane.xlu1 %414 }
 0x190   : > { %v412_v38 = vpop.xlane.xlu0 %411 }
 0x191   : > { %v417_v47 = vadd.f32 %v416_v45, %v412_v38  ;;  %v966_v45 = vld [vmem:[#allocation6 + $0xe18] sm:$0xff]  ;;  %v2865_v38 = vpack.c.bf16 %v972_v44, %v964_v43 }
 0x193   : > { %v418_v51 = vadd.f32 %v417_v47, %v415_v48  ;;  %v974_v47 = vld [vmem:[#allocation6 + $0xe58] sm:$0xff]  ;;  %v963_v48 = vld [vmem:[#allocation6 + $0xe00] sm:$0xff]  ;;  %2866 = vmatprep.subr.bf16.mxu0 %v2865_v38 }
 0x195   : > { %v419_v52 = vmul.f32 0.0009765625, %v418_v51  ;;  %v971_v51 = vld [vmem:[#allocation6 + $0xe40] sm:$0xff] }
 0x197   : > { %v4296_v53 = vsub.f32 %v4267_v3, %v419_v52  ;;  %v4299_v54 = vsub.f32 %v4269_v4, %v419_v52  ;;  %v4302_v49 = vsub.f32 %v4273_v16, %v419_v52  ;;  %v4305_v50 = vsub.f32 %v4275_v17, %v419_v52 }
 0x198   : > { %v4308_v55 = vsub.f32 %v4283_v41, %v419_v52  ;;  %v4311_v56 = vsub.f32 %v4285_v20, %v419_v52  ;;  %v4314_v57 = vsub.f32 %v4289_v46, %v419_v52  ;;  %v4317_v3 = vsub.f32 %v4291_v37, %v419_v52 }
 0x199   : > { %v433_v4 = vmul.f32 %v4296_v53, %v4296_v53  ;;  %v434_v16 = vmul.f32 %v4299_v54, %v4299_v54  ;;  %v428_v17 = vmul.f32 %v4302_v49, %v4302_v49  ;;  %v429_v41 = vmul.f32 %v4305_v50, %v4305_v50 }
 0x19a   : > { %v445_v20 = vmul.f32 %v4308_v55, %v4308_v55  ;;  %v446_v46 = vmul.f32 %v4311_v56, %v4311_v56  ;;  %v439_v59 = vmul.f32 %v4314_v57, %v4314_v57  ;;  %v440_v60 = vmul.f32 %v4317_v3, %v4317_v3 }
 0x19b   : > { %v435_v37 = vadd.f32 %v434_v16, %v433_v4  ;;  %v430_v58 = vadd.f32 %v429_v41, %v428_v17  ;;  %v2929_v52 = vpack.c.bf16 %v974_v47, %v966_v45  ;;  %v2867_v4 = vpack.c.bf16 %v971_v51, %v963_v48  ;;  %v965_v16 = vld [vmem:[#allocation6 + $0xe10] sm:$0xff]  ;;  %v980_v41 = vld [vmem:[#allocation6 + $0xe88] sm:$0xff] }
 0x19c   : > { %v447_v61 = vadd.f32 %v446_v46, %v445_v20  ;;  %v441_v62 = vadd.f32 %v440_v60, %v439_v59  ;;  %v973_v17 = vld [vmem:[#allocation6 + $0xe50] sm:$0xff]  ;;  %v988_v46 = vld [vmem:[#allocation6 + $0xec8] sm:$0xff] }
 0x19d   : > { %436 = vadd.xlane.f32.xlu1 %v435_v37  ;;  %431 = vadd.xlane.f32.xlu0 %v430_v58  ;;  %v2931_v20 = vpack.c.bf16 %v973_v17, %v965_v16  ;;  %v982_v37 = vld [vmem:[#allocation6 + $0xe98] sm:$0xff]  ;;  %v2869_v59 = vpack.c.bf16 %v988_v46, %v980_v41  ;;  %v783_v16 = vld [vmem:[#allocation6 + $0x860] sm:$0xff]  ;;  %v785_v46 = vld [vmem:[#allocation6 + $0x870] sm:$0xff] }
 0x19e   : > { %v990_v58 = vld [vmem:[#allocation6 + $0xed8] sm:$0xff]  ;;  %2930 = vmatprep.subr.bf16.mxu1 %v2929_v52  ;;  %2868 = vmatpush1.bf16.msra.mxu0 %v2867_v4  ;;  %v775_v4 = vld [vmem:[#allocation6 + $0x820] sm:$0xff] }
 0x19f   : > { %v2933_v60 = vpack.c.bf16 %v990_v58, %v982_v37  ;;  %2932 = vmatpush1.bf16.msra.mxu1 %v2931_v20  ;;  %2870 = vmatprep.subr.bf16.mxu0 %v2869_v59  ;;  %v777_v20 = vld [vmem:[#allocation6 + $0x830] sm:$0xff]  ;;  %v792_v37 = vld [vmem:[#allocation6 + $0x8a8] sm:$0xff]  ;;  %v794_v59 = vld [vmem:[#allocation6 + $0x8b8] sm:$0xff]  ;;  %v2947_v63 = vpack.c.bf16 %v783_v16, %v775_v4 }
 0x1a0   : > { %v800_v58 = vld [vmem:[#allocation6 + $0x8e8] sm:$0xff]  ;;  %v849_v4 = vld [vmem:[#allocation6 + $0xa70] sm:$0xff] }
 0x1a1   : > { %448 = vadd.xlane.f32.xlu1 %v447_v61  ;;  %442 = vadd.xlane.f32.xlu0 %v441_v62  ;;  %v979_v61 = vld [vmem:[#allocation6 + $0xe80] sm:$0xff]  ;;  %v2949_v8 = vpack.c.bf16 %v800_v58, %v792_v37  ;;  %v856_v16 = vld [vmem:[#allocation6 + $0xaa8] sm:$0xff] }
 0x1a2   : > { %v987_v62 = vld [vmem:[#allocation6 + $0xec0] sm:$0xff]  ;;  %2934 = vmatprep.subr.bf16.mxu1 %v2933_v60  ;;  %v802_v60 = vld [vmem:[#allocation6 + $0x8f8] sm:$0xff] }
 0x1a3   : > { %v2871_v0 = vpack.c.bf16 %v987_v62, %v979_v61  ;;  %2936 = vmatpush1.bf16.msra.mxu1 %v2935_v6  ;;  %v3013_v9 = vpack.c.bf16 %v802_v60, %v794_v59  ;;  %v855_v58 = vld [vmem:[#allocation6 + $0xaa0] sm:$0xff] }
 0x1a4   : > { %2938 = vmatprep.subr.bf16.mxu1 %v2937_v11  ;;  %v810_v11 = vld [vmem:[#allocation6 + $0x938] sm:$0xff]  ;;  %v863_v59 = vld [vmem:[#allocation6 + $0xae0] sm:$0xff] }
 0x1a5   : > { %2872 = vmatpush1.bf16.msra.mxu0 %v2871_v0  ;;  %v3011_v0 = vpack.c.bf16 %v785_v46, %v777_v20  ;;  %v3017_v22 = vpack.c.bf16 %v818_v12, %v810_v11  ;;  %v866_v20 = vld [vmem:[#allocation6 + $0xaf8] sm:$0xff]  ;;  %v873_v11 = vld [vmem:[#allocation6 + $0xb30] sm:$0xff] }
 0x1a6   : > { %2874 = vmatprep.subr.bf16.mxu0 %v2873_v7  ;;  %v801_v7 = vld [vmem:[#allocation6 + $0x8f0] sm:$0xff] }
 0x1a7   : > { %2940 = vmatpush1.bf16.msra.mxu1 %v2939_v23  ;;  %v809_v23 = vld [vmem:[#allocation6 + $0x930] sm:$0xff] }
 0x1a8   : > { %2942 = vmatprep.subr.bf16.mxu1 %v2941_v28  ;;  %v834_v28 = vld [vmem:[#allocation6 + $0x9f8] sm:$0xff]  ;;  %v881_v12 = vld [vmem:[#allocation6 + $0xb70] sm:$0xff] }
 0x1a9   : > { %2876 = vmatpush1.bf16.msra.mxu0 %v2875_v15  ;;  %v807_v15 = vld [vmem:[#allocation6 + $0x920] sm:$0xff]  ;;  %v3021_v33 = vpack.c.bf16 %v834_v28, %v826_v27  ;;  %v889_v27 = vld [vmem:[#allocation6 + $0xbb0] sm:$0xff] }
 0x1aa   : > { %2878 = vmatprep.subr.bf16.mxu0 %v2877_v24  ;;  %v817_v24 = vld [vmem:[#allocation6 + $0x970] sm:$0xff]  ;;  %v2955_v29 = vpack.c.bf16 %v815_v18, %v807_v15  ;;  %v890_v15 = vld [vmem:[#allocation6 + $0xbb8] sm:$0xff] }
 0x1ab   : > { %2944 = vmatpush1.bf16.msra.mxu1 %v2943_v32  ;;  %v3019_v30 = vpack.c.bf16 %v817_v24, %v809_v23  ;;  %v831_v32 = vld [vmem:[#allocation6 + $0x9e0] sm:$0xff]  ;;  %v898_v18 = vld [vmem:[#allocation6 + $0xbf8] sm:$0xff]  ;;  %v897_v28 = vld [vmem:[#allocation6 + $0xbf0] sm:$0xff] }
 0x1ac   : > { %3010 = vmatprep.subr.bf16.mxu1 %v3009_v35  ;;  %v848_v35 = vld [vmem:[#allocation6 + $0xa68] sm:$0xff]  ;;  %v887_v23 = vld [vmem:[#allocation6 + $0xba0] sm:$0xff]  ;;  %v3037_v26 = vpack.c.bf16 %v898_v18, %v890_v15  ;;  %v953_v15 = vld [vmem:[#allocation6 + $0xdb0] sm:$0xff] }
 0x1ad   : > { %2880 = vmatpush1.bf16.msra.mxu0 %v2879_v31  ;;  %v823_v31 = vld [vmem:[#allocation6 + $0x9a0] sm:$0xff]  ;;  %v961_v18 = vld [vmem:[#allocation6 + $0xdf0] sm:$0xff] }
 0x1ae   : > { %2946 = vmatprep.subr.bf16.mxu0 %v2945_v19  ;;  %v833_v19 = vld [vmem:[#allocation6 + $0x9f0] sm:$0xff]  ;;  %v895_v24 = vld [vmem:[#allocation6 + $0xbe0] sm:$0xff] }
 0x22a   : > { %v437_v36 = vpop.xlane.xlu1 %436  ;;  %v432_v42 = vpop.xlane.xlu0 %431 }
 0x22b   : > { %v438_v43 = vadd.f32 %v437_v36, %v432_v42  ;;  %v842_v36 = vld [vmem:[#allocation6 + $0xa38] sm:$0xff] }
 0x22c   : > { %v850_v42 = vld [vmem:[#allocation6 + $0xa78] sm:$0xff] }
 0x22e   : > { %v443_v44 = vpop.xlane.xlu0 %442  ;;  %v449_v38 = vpop.xlane.xlu1 %448 }
 0x22f   : > { %v444_v45 = vadd.f32 %v443_v44, %v438_v43  ;;  %v2959_v43 = vpack.c.bf16 %v831_v32, %v823_v31  ;;  %v3023_v44 = vpack.c.bf16 %v833_v19, %v825_v40  ;;  %v906_v31 = vld [vmem:[#allocation6 + $0xc38] sm:$0xff]  ;;  %v903_v40 = vld [vmem:[#allocation6 + $0xc20] sm:$0xff] }
 0x230   : > { %v914_v32 = vld [vmem:[#allocation6 + $0xc78] sm:$0xff]  ;;  %v911_v19 = vld [vmem:[#allocation6 + $0xc60] sm:$0xff] }
 0x231   : > { %v450_v47 = vadd.f32 %v449_v38, %v444_v45  ;;  %v839_v45 = vld [vmem:[#allocation6 + $0xa20] sm:$0xff] }
 0x232   : > { %v847_v38 = vld [vmem:[#allocation6 + $0xa60] sm:$0xff] }
 0x233   : > { %v451_v48 = vmul.f32 0.0009765625, %v450_v47  ;;  %v2961_v47 = vpack.c.bf16 %v848_v35, %v840_v34  ;;  %v2963_v46 = vpack.c.bf16 %v847_v38, %v839_v45  ;;  %v3041_v35 = vpack.c.bf16 %v914_v32, %v906_v31  ;;  %v922_v45 = vld [vmem:[#allocation6 + $0xcb8] sm:$0xff]  ;;  %v969_v31 = vld [vmem:[#allocation6 + $0xe30] sm:$0xff] }
 0x234   : > { %v930_v38 = vld [vmem:[#allocation6 + $0xcf8] sm:$0xff]  ;;  %v977_v32 = vld [vmem:[#allocation6 + $0xe70] sm:$0xff] }
 0x235   : > { %v452_v51 = vadd.f32 1e-05, %v451_v48  ;;  %v3025_v48 = vpack.c.bf16 %v850_v42, %v842_v36  ;;  %v905_v36 = vld [vmem:[#allocation6 + $0xc30] sm:$0xff] }
 0x236   : > { %v913_v42 = vld [vmem:[#allocation6 + $0xc70] sm:$0xff] }
 0x237   : > { %3939 = vrsqrt.f32 %v452_v51  ;;  %v841_v51 = vld [vmem:[#allocation6 + $0xa30] sm:$0xff] }
 0x238   : > { %v3027_v37 = vpack.c.bf16 %v849_v4, %v841_v51  ;;  %v919_v51 = vld [vmem:[#allocation6 + $0xca0] sm:$0xff] }
 0x239   : > { %v927_v4 = vld [vmem:[#allocation6 + $0xce0] sm:$0xff] }
 0x241   : > { %v4335_v52 = vpop.eup %3939 }
 0x242   : > { %v465_v17 = vmul.f32 %v4335_v52, %v4299_v54  ;;  %v464_v41 = vmul.f32 %v4335_v52, %v4296_v53  ;;  %v793_v54 = vld [vmem:[#allocation6 + $0x8b0] sm:$0xff]  ;;  %v808_v53 = vld [vmem:[#allocation6 + $0x928] sm:$0xff] }
 0x243   : > { %v3015_v14 = vpack.c.bf16 %v801_v7, %v793_v54  ;;  %v2953_v21 = vpack.c.bf16 %v816_v10, %v808_v53  ;;  %v2967_v54 = vpack.c.bf16 %v863_v59, %v855_v58  ;;  %v871_v53 = vld [vmem:[#allocation6 + $0xb20] sm:$0xff]  ;;  %v938_v58 = vld [vmem:[#allocation6 + $0xd38] sm:$0xff] }
 0x244   : > { %vm467_vm0 = vcmp.ge.f32.partialorder %v465_v17, 0.0  ;;  %v469_v61 = vmul.f32 0.2, %v465_v17  ;;  %vm466_vm1 = vcmp.ge.f32.partialorder %v464_v41, 0.0  ;;  %v468_v62 = vmul.f32 0.2, %v464_v41 }
 0x245   : > { %v946_v59 = vld [vmem:[#allocation6 + $0xd78] sm:$0xff] }
 0x246   : > { %v471_v5 = vsel %vm467_vm0, %v465_v17, %v469_v61  ;;  %v4341_v6 = vsel %vm466_vm1, %v464_v41, %v468_v62  ;;  %v864_v17 = vld [vmem:[#allocation6 + $0xae8] sm:$0xff]  ;;  %v858_v41 = vld [vmem:[#allocation6 + $0xab8] sm:$0xff]  ;;  %v857_v62 = vld [vmem:[#allocation6 + $0xab0] sm:$0xff] }
 0x247   : > { %1091 = vmatprep.mubr.f32.mxu0 %v471_v5  ;;  %1162 = vmatprep.mubr.f32.mxu1 %v471_v5  ;;  %v2965_v60 = vpack.c.bf16 %v864_v17, %v856_v16  ;;  %v3029_v61 = vpack.c.bf16 %v866_v20, %v858_v41  ;;  %v3045_v17 = vpack.c.bf16 %v930_v38, %v922_v45  ;;  %v921_v41 = vld [vmem:[#allocation6 + $0xcb0] sm:$0xff] }
 0x248   : > { %1092 = vmatmul.mubr.f32.vlgmr.msra.gmra.mrb[0].mxu0 %v4341_v6  ;;  %1163 = vmatmul.mubr.f32.vlgmr.msra.gmra.mrb[0].mxu1 %v4341_v6  ;;  %v929_v20 = vld [vmem:[#allocation6 + $0xcf0] sm:$0xff] }
 0x249   : > { %2948 = vmatpush1.bf16.msra.mxu0 %v2947_v63  ;;  %3012 = vmatpush1.bf16.msra.mxu1 %v3011_v0  ;;  %v865_v63 = vld [vmem:[#allocation6 + $0xaf0] sm:$0xff]  ;;  %v872_v0 = vld [vmem:[#allocation6 + $0xb28] sm:$0xff] }
 0x24a   : > { %1233 = vmatprep.mubr.f32.mxu0 %v471_v5  ;;  %1304 = vmatprep.mubr.f32.mxu1 %v471_v5  ;;  %v882_v5 = vld [vmem:[#allocation6 + $0xb78] sm:$0xff]  ;;  %v3031_v7 = vpack.c.bf16 %v865_v63, %v857_v62  ;;  %v935_v62 = vld [vmem:[#allocation6 + $0xd20] sm:$0xff]  ;;  %v985_v45 = vld [vmem:[#allocation6 + $0xeb0] sm:$0xff] }
 0x24b   : > { %2950 = vmatprep.subr.bf16.mxu0 %v2949_v8  ;;  %3014 = vmatprep.subr.bf16.mxu1 %v3013_v9  ;;  %v879_v8 = vld [vmem:[#allocation6 + $0xb60] sm:$0xff]  ;;  %v2969_v9 = vpack.c.bf16 %v880_v1, %v872_v0  ;;  %v3033_v10 = vpack.c.bf16 %v882_v5, %v874_v2  ;;  %v3049_v1 = vpack.c.bf16 %v946_v59, %v938_v58  ;;  %v937_v2 = vld [vmem:[#allocation6 + $0xd30] sm:$0xff] }
 0x24c   : > { %v943_v63 = vld [vmem:[#allocation6 + $0xd60] sm:$0xff]  ;;  %v945_v5 = vld [vmem:[#allocation6 + $0xd70] sm:$0xff] }
 0x24d   : > { %2952 = vmatpush1.bf16.msra.mxu0 %v2951_v13  ;;  %3016 = vmatpush1.bf16.msra.mxu1 %v3015_v14  ;;  %v888_v13 = vld [vmem:[#allocation6 + $0xba8] sm:$0xff]  ;;  %v993_v38 = vld [vmem:[#allocation6 + $0xef0] sm:$0xff] }
 0x24e   : > { %2954 = vmatprep.subr.bf16.mxu0 %v2953_v21  ;;  %3018 = vmatprep.subr.bf16.mxu1 %v3017_v22  ;;  %v896_v14 = vld [vmem:[#allocation6 + $0xbe8] sm:$0xff]  ;;  %v2971_v21 = vpack.c.bf16 %v879_v8, %v871_v53  ;;  %v3035_v22 = vpack.c.bf16 %v881_v12, %v873_v11  ;;  %v954_v53 = vld [vmem:[#allocation6 + $0xdb8] sm:$0xff]  ;;  %v951_v11 = vld [vmem:[#allocation6 + $0xda0] sm:$0xff] }
 0x24f   : > { %v2973_v25 = vpack.c.bf16 %v896_v14, %v888_v13  ;;  %v962_v8 = vld [vmem:[#allocation6 + $0xdf8] sm:$0xff]  ;;  %v959_v12 = vld [vmem:[#allocation6 + $0xde0] sm:$0xff]  ;;  %v1001_v58 = vld [vmem:[#allocation6 + $0xf30] sm:$0xff] }
 0x250   : > { %v3053_v14 = vpack.c.bf16 %v962_v8, %v954_v53  ;;  %v1009_v59 = vld [vmem:[#allocation6 + $0xf70] sm:$0xff] }
 0x251   : > { %2956 = vmatpush1.bf16.msra.mxu0 %v2955_v29  ;;  %3020 = vmatpush1.bf16.msra.mxu1 %v3019_v30  ;;  %v904_v29 = vld [vmem:[#allocation6 + $0xc28] sm:$0xff]  ;;  %v1017_v53 = vld [vmem:[#allocation6 + $0xfb0] sm:$0xff] }
 0x252   : > { %2958 = vmatprep.subr.bf16.mxu0 %v2957_v39  ;;  %3022 = vmatprep.subr.bf16.mxu1 %v3021_v33  ;;  %v912_v30 = vld [vmem:[#allocation6 + $0xc68] sm:$0xff]  ;;  %v2975_v39 = vpack.c.bf16 %v895_v24, %v887_v23  ;;  %v3039_v33 = vpack.c.bf16 %v897_v28, %v889_v27  ;;  %v970_v23 = vld [vmem:[#allocation6 + $0xe38] sm:$0xff]  ;;  %v967_v27 = vld [vmem:[#allocation6 + $0xe20] sm:$0xff] }
 0x253   : > { %v2977_v34 = vpack.c.bf16 %v912_v30, %v904_v29  ;;  %v978_v24 = vld [vmem:[#allocation6 + $0xe78] sm:$0xff]  ;;  %v975_v28 = vld [vmem:[#allocation6 + $0xe60] sm:$0xff]  ;;  %v1025_v8 = vld [vmem:[#allocation6 + $0xff0] sm:$0xff] }
 0x254   : > { %v3057_v30 = vpack.c.bf16 %v978_v24, %v970_v23  ;;  %v522_v23 = vld [vmem:[#allocation6 + $0x40] sm:$0xff]  ;;  %v516_v24 = vld [vmem:[#allocation6 + $0x10] sm:$0xff] }
 0x255   : > { %2960 = vmatpush1.bf16.msra.mxu0 %v2959_v43  ;;  %3024 = vmatpush1.bf16.msra.mxu1 %v3023_v44  ;;  %v920_v43 = vld [vmem:[#allocation6 + $0xca8] sm:$0xff] }
 0x256   : > { %2962 = vmatprep.subr.bf16.mxu0 %v2961_v47  ;;  %3026 = vmatprep.subr.bf16.mxu1 %v3025_v48  ;;  %v928_v44 = vld [vmem:[#allocation6 + $0xce8] sm:$0xff]  ;;  %v2979_v47 = vpack.c.bf16 %v911_v19, %v903_v40  ;;  %v3043_v48 = vpack.c.bf16 %v913_v42, %v905_v36  ;;  %v986_v40 = vld [vmem:[#allocation6 + $0xeb8] sm:$0xff]  ;;  %v983_v36 = vld [vmem:[#allocation6 + $0xea0] sm:$0xff] }
 0x257   : > { %v2981_v16 = vpack.c.bf16 %v928_v44, %v920_v43  ;;  %v994_v19 = vld [vmem:[#allocation6 + $0xef8] sm:$0xff]  ;;  %v991_v42 = vld [vmem:[#allocation6 + $0xee0] sm:$0xff] }
 0x258   : > { %v3061_v44 = vpack.c.bf16 %v994_v19, %v986_v40 }
 0x259   : > { %2964 = vmatpush1.bf16.msra.mxu0 %v2963_v46  ;;  %3028 = vmatpush1.bf16.msra.mxu1 %v3027_v37  ;;  %v936_v46 = vld [vmem:[#allocation6 + $0xd28] sm:$0xff] }
 0x25a   : > { %2966 = vmatprep.subr.bf16.mxu0 %v2965_v60  ;;  %3030 = vmatprep.subr.bf16.mxu1 %v3029_v61  ;;  %v944_v37 = vld [vmem:[#allocation6 + $0xd68] sm:$0xff]  ;;  %v2983_v60 = vpack.c.bf16 %v927_v4, %v919_v51  ;;  %v3047_v61 = vpack.c.bf16 %v929_v20, %v921_v41  ;;  %v1002_v51 = vld [vmem:[#allocation6 + $0xf38] sm:$0xff]  ;;  %v999_v41 = vld [vmem:[#allocation6 + $0xf20] sm:$0xff] }
 0x25b   : > { %v2985_v0 = vpack.c.bf16 %v944_v37, %v936_v46  ;;  %v1010_v4 = vld [vmem:[#allocation6 + $0xf78] sm:$0xff]  ;;  %v1007_v20 = vld [vmem:[#allocation6 + $0xf60] sm:$0xff] }
 0x25c   : > { %v3065_v37 = vpack.c.bf16 %v1010_v4, %v1002_v51  ;;  %v554_v51 = vld [vmem:[#allocation6 + $0x140] sm:$0xff]  ;;  %v548_v4 = vld [vmem:[#allocation6 + $0x110] sm:$0xff] }
 0x25d   : > { %2968 = vmatpush1.bf16.msra.mxu0 %v2967_v54  ;;  %3032 = vmatpush1.bf16.msra.mxu1 %v3031_v7  ;;  %v952_v54 = vld [vmem:[#allocation6 + $0xda8] sm:$0xff] }
 0x25e   : > { %2970 = vmatprep.subr.bf16.mxu0 %v2969_v9  ;;  %3034 = vmatprep.subr.bf16.mxu1 %v3033_v10  ;;  %v960_v7 = vld [vmem:[#allocation6 + $0xde8] sm:$0xff]  ;;  %v2987_v9 = vpack.c.bf16 %v943_v63, %v935_v62  ;;  %v3051_v10 = vpack.c.bf16 %v945_v5, %v937_v2  ;;  %v1018_v62 = vld [vmem:[#allocation6 + $0xfb8] sm:$0xff]  ;;  %v1015_v2 = vld [vmem:[#allocation6 + $0xfa0] sm:$0xff] }
 0x25f   : > { %v2989_v13 = vpack.c.bf16 %v960_v7, %v952_v54  ;;  %v1026_v63 = vld [vmem:[#allocation6 + $0xff8] sm:$0xff]  ;;  %v1023_v5 = vld [vmem:[#allocation6 + $0xfe0] sm:$0xff] }
 0x260   : > { %v3069_v7 = vpack.c.bf16 %v1026_v63, %v1018_v62  ;;  %v564_v62 = vld [vmem:[#allocation6 + $0x190] sm:$0xff] }
 0x261   : > { %2972 = vmatpush1.bf16.msra.mxu0 %v2971_v21  ;;  %3036 = vmatpush1.bf16.msra.mxu1 %v3035_v22  ;;  %v968_v21 = vld [vmem:[#allocation6 + $0xe28] sm:$0xff] }
 0x262   : > { %2974 = vmatprep.subr.bf16.mxu0 %v2973_v25  ;;  %3038 = vmatprep.subr.bf16.mxu1 %v3037_v26  ;;  %v976_v22 = vld [vmem:[#allocation6 + $0xe68] sm:$0xff]  ;;  %v2991_v25 = vpack.c.bf16 %v959_v12, %v951_v11  ;;  %v3055_v26 = vpack.c.bf16 %v961_v18, %v953_v15  ;;  %v517_v11 = vld [vmem:[#allocation6 + $0x18] sm:$0xff]  ;;  %v3071_v15 = vpack.c.bf16 %v1025_v8, %v1017_v53 }
 0x263   : > { %v2993_v29 = vpack.c.bf16 %v976_v22, %v968_v21  ;;  %v525_v12 = vld [vmem:[#allocation6 + $0x58] sm:$0xff]  ;;  %v514_v22 = vld [vmem:[#allocation6] sm:$0xff] }
 0x264   : > { %v3137_v21 = vpack.c.bf16 %v525_v12, %v517_v11  ;;  %v580_v11 = vld [vmem:[#allocation6 + $0x210] sm:$0xff] }
 0x265   : > { %2976 = vmatpush1.bf16.msra.mxu0 %v2975_v39  ;;  %3040 = vmatpush1.bf16.msra.mxu1 %v3039_v33  ;;  %v984_v39 = vld [vmem:[#allocation6 + $0xea8] sm:$0xff] }
 0x266   : > { %2978 = vmatprep.subr.bf16.mxu0 %v2977_v34  ;;  %3042 = vmatprep.subr.bf16.mxu1 %v3041_v35  ;;  %v992_v33 = vld [vmem:[#allocation6 + $0xee8] sm:$0xff]  ;;  %v2995_v34 = vpack.c.bf16 %v975_v28, %v967_v27  ;;  %v3059_v35 = vpack.c.bf16 %v977_v32, %v969_v31  ;;  %v530_v32 = vld [vmem:[#allocation6 + $0x80] sm:$0xff] }
 0x267   : > { %v2997_v43 = vpack.c.bf16 %v992_v33, %v984_v39  ;;  %v539_v28 = vld [vmem:[#allocation6 + $0xc8] sm:$0xff]  ;;  %v538_v39 = vld [vmem:[#allocation6 + $0xc0] sm:$0xff]  ;;  %v532_v33 = vld [vmem:[#allocation6 + $0x90] sm:$0xff] }
 0x269   : > { %2980 = vmatpush1.bf16.msra.mxu0 %v2979_v47  ;;  %3044 = vmatpush1.bf16.msra.mxu1 %v3043_v48  ;;  %v1000_v47 = vld [vmem:[#allocation6 + $0xf28] sm:$0xff] }
 0x26a   : > { %2982 = vmatprep.subr.bf16.mxu0 %v2981_v16  ;;  %3046 = vmatprep.subr.bf16.mxu1 %v3045_v17  ;;  %v1008_v48 = vld [vmem:[#allocation6 + $0xf68] sm:$0xff]  ;;  %v2999_v16 = vpack.c.bf16 %v991_v42, %v983_v36  ;;  %v3063_v17 = vpack.c.bf16 %v993_v38, %v985_v45  ;;  %v3079_v45 = vpack.c.bf16 %v538_v39, %v530_v32  ;;  %v621_v32 = vld [vmem:[#allocation6 + $0x358] sm:$0xff] }
 0x26b   : > { %v3001_v46 = vpack.c.bf16 %v1008_v48, %v1000_v47  ;;  %v555_v36 = vld [vmem:[#allocation6 + $0x148] sm:$0xff]  ;;  %v546_v48 = vld [vmem:[#allocation6 + $0x100] sm:$0xff] }
 0x26d   : > { %2984 = vmatpush1.bf16.msra.mxu0 %v2983_v60  ;;  %3048 = vmatpush1.bf16.msra.mxu1 %v3047_v61  ;;  %v1016_v60 = vld [vmem:[#allocation6 + $0xfa8] sm:$0xff] }
 0x26e   : > { %2986 = vmatprep.subr.bf16.mxu0 %v2985_v0  ;;  %3050 = vmatprep.subr.bf16.mxu1 %v3049_v1  ;;  %v1024_v61 = vld [vmem:[#allocation6 + $0xfe8] sm:$0xff]  ;;  %v3003_v0 = vpack.c.bf16 %v1007_v20, %v999_v41  ;;  %v3067_v1 = vpack.c.bf16 %v1009_v59, %v1001_v58  ;;  %v565_v20 = vld [vmem:[#allocation6 + $0x198] sm:$0xff] }
 0x26f   : > { %v3005_v54 = vpack.c.bf16 %v1024_v61, %v1016_v60  ;;  %v571_v41 = vld [vmem:[#allocation6 + $0x1c8] sm:$0xff]  ;;  %v562_v60 = vld [vmem:[#allocation6 + $0x180] sm:$0xff] }
 0x270   : > { %v570_v61 = vld [vmem:[#allocation6 + $0x1c0] sm:$0xff] }
 0x271   : > { %2988 = vmatpush1.bf16.msra.mxu0 %v2987_v9  ;;  %3052 = vmatpush1.bf16.msra.mxu1 %v3051_v10  ;;  %v515_v9 = vld [vmem:[#allocation6 + $0x8] sm:$0xff] }
 0x272   : > { %2990 = vmatprep.subr.bf16.mxu0 %v2989_v13  ;;  %3054 = vmatprep.subr.bf16.mxu1 %v3053_v14  ;;  %v523_v10 = vld [vmem:[#allocation6 + $0x48] sm:$0xff]  ;;  %v455_v13 = vmul.f32 %v4335_v52, %v4305_v50  ;;  %v3007_v14 = vpack.c.bf16 %v1023_v5, %v1015_v2  ;;  %v3075_v50 = vpack.c.bf16 %v522_v23, %v514_v22  ;;  %v581_v5 = vld [vmem:[#allocation6 + $0x218] sm:$0xff] }
 0x273   : > { %v3073_v18 = vpack.c.bf16 %v523_v10, %v515_v9  ;;  %v587_v2 = vld [vmem:[#allocation6 + $0x248] sm:$0xff]  ;;  %v578_v9 = vld [vmem:[#allocation6 + $0x200] sm:$0xff] }
 0x274   : > { %v459_v27 = vmul.f32 0.2, %v455_v13  ;;  %vm457_vm2 = vcmp.ge.f32.partialorder %v455_v13, 0.0  ;;  %v586_v10 = vld [vmem:[#allocation6 + $0x240] sm:$0xff] }
 0x275   : > { %2992 = vmatpush1.bf16.msra.mxu0 %v2991_v25  ;;  %3056 = vmatpush1.bf16.msra.mxu1 %v3055_v26  ;;  %v524_v25 = vld [vmem:[#allocation6 + $0x50] sm:$0xff]  ;;  %v531_v26 = vld [vmem:[#allocation6 + $0x88] sm:$0xff]  ;;  %v3091_v22 = vpack.c.bf16 %v586_v10, %v578_v9 }
 0x276   : > { %2994 = vmatprep.subr.bf16.mxu0 %v2993_v29  ;;  %3058 = vmatprep.subr.bf16.mxu1 %v3057_v30  ;;  %v533_v29 = vld [vmem:[#allocation6 + $0x98] sm:$0xff]  ;;  %v3139_v31 = vpack.c.bf16 %v524_v25, %v516_v24  ;;  %v3077_v40 = vpack.c.bf16 %v539_v28, %v531_v26  ;;  %v4349_v42 = vsel %vm457_vm2, %v455_v13, %v459_v27  ;;  %v588_v13 = vld [vmem:[#allocation6 + $0x250] sm:$0xff]  ;;  %v594_v25 = vld [vmem:[#allocation6 + $0x280] sm:$0xff] }
 0x277   : > { %v541_v30 = vld [vmem:[#allocation6 + $0xd8] sm:$0xff]  ;;  %v3155_v23 = vpack.c.bf16 %v588_v13, %v580_v11  ;;  %v602_v26 = vld [vmem:[#allocation6 + $0x2c0] sm:$0xff]  ;;  %v596_v27 = vld [vmem:[#allocation6 + $0x290] sm:$0xff] }
 0x278   : > { %v3141_v19 = vpack.c.bf16 %v541_v30, %v533_v29  ;;  %v604_v29 = vld [vmem:[#allocation6 + $0x2d0] sm:$0xff]  ;;  %v611_v30 = vld [vmem:[#allocation6 + $0x308] sm:$0xff]  ;;  %v3095_v39 = vpack.c.bf16 %v602_v26, %v594_v25  ;;  %v666_v13 = vld [vmem:[#allocation6 + $0x4c0] sm:$0xff] }
 0x279   : > { %2996 = vmatpush1.bf16.msra.mxu0 %v2995_v34  ;;  %3060 = vmatpush1.bf16.msra.mxu1 %v3059_v35  ;;  %v540_v34 = vld [vmem:[#allocation6 + $0xd0] sm:$0xff]  ;;  %v547_v35 = vld [vmem:[#allocation6 + $0x108] sm:$0xff] }
 0x27a   : > { %2998 = vmatprep.subr.bf16.mxu0 %v2997_v43  ;;  %3062 = vmatprep.subr.bf16.mxu1 %v3061_v44  ;;  %v549_v43 = vld [vmem:[#allocation6 + $0x118] sm:$0xff]  ;;  %v3143_v38 = vpack.c.bf16 %v540_v34, %v532_v33  ;;  %v3081_v47 = vpack.c.bf16 %v555_v36, %v547_v35  ;;  %v3159_v33 = vpack.c.bf16 %v604_v29, %v596_v27  ;;  %v618_v34 = vld [vmem:[#allocation6 + $0x340] sm:$0xff]  ;;  %v612_v35 = vld [vmem:[#allocation6 + $0x310] sm:$0xff] }
 0x27b   : > { %v557_v44 = vld [vmem:[#allocation6 + $0x158] sm:$0xff]  ;;  %v682_v29 = vld [vmem:[#allocation6 + $0x540] sm:$0xff] }
 0x27d   : > { %3000 = vmatpush1.bf16.msra.mxu0 %v2999_v16  ;;  %3064 = vmatpush1.bf16.msra.mxu1 %v3063_v17  ;;  %v3145_v16 = vpack.c.bf16 %v557_v44, %v549_v43  ;;  %v563_v17 = vld [vmem:[#allocation6 + $0x188] sm:$0xff]  ;;  %v620_v43 = vld [vmem:[#allocation6 + $0x350] sm:$0xff] }
 0x27e   : > { %3002 = vmatprep.subr.bf16.mxu0 %v3001_v46  ;;  %3066 = vmatprep.subr.bf16.mxu1 %v3065_v37  ;;  %v573_v46 = vld [vmem:[#allocation6 + $0x1d8] sm:$0xff]  ;;  %v3083_v37 = vpack.c.bf16 %v554_v51, %v546_v48  ;;  %v3085_v59 = vpack.c.bf16 %v571_v41, %v563_v17  ;;  %v627_v44 = vld [vmem:[#allocation6 + $0x388] sm:$0xff]  ;;  %v3163_v51 = vpack.c.bf16 %v620_v43, %v612_v35  ;;  %v628_v17 = vld [vmem:[#allocation6 + $0x390] sm:$0xff] }
 0x27f   : > { %v3149_v63 = vpack.c.bf16 %v573_v46, %v565_v20  ;;  %v636_v20 = vld [vmem:[#allocation6 + $0x3d0] sm:$0xff]  ;;  %v643_v46 = vld [vmem:[#allocation6 + $0x408] sm:$0xff]  ;;  %v698_v43 = vld [vmem:[#allocation6 + $0x5c0] sm:$0xff] }
 0x281   : > { %3004 = vmatpush1.bf16.msra.mxu0 %v3003_v0  ;;  %3068 = vmatpush1.bf16.msra.mxu1 %v3067_v1  ;;  %v572_v0 = vld [vmem:[#allocation6 + $0x1d0] sm:$0xff]  ;;  %v579_v1 = vld [vmem:[#allocation6 + $0x208] sm:$0xff] }
 0x282   : > { %3006 = vmatprep.subr.bf16.mxu0 %v3005_v54  ;;  %3070 = vmatprep.subr.bf16.mxu1 %v3069_v7  ;;  %v589_v54 = vld [vmem:[#allocation6 + $0x258] sm:$0xff]  ;;  %v3087_v7 = vpack.c.bf16 %v570_v61, %v562_v60  ;;  %v3151_v53 = vpack.c.bf16 %v572_v0, %v564_v62  ;;  %v3089_v8 = vpack.c.bf16 %v587_v2, %v579_v1  ;;  %v650_v0 = vld [vmem:[#allocation6 + $0x440] sm:$0xff]  ;;  %v644_v1 = vld [vmem:[#allocation6 + $0x410] sm:$0xff] }
 0x283   : > { %v3153_v12 = vpack.c.bf16 %v589_v54, %v581_v5  ;;  %v3167_v61 = vpack.c.bf16 %v636_v20, %v628_v17  ;;  %v652_v5 = vld [vmem:[#allocation6 + $0x450] sm:$0xff]  ;;  %v659_v54 = vld [vmem:[#allocation6 + $0x488] sm:$0xff]  ;;  %v714_v20 = vld [vmem:[#allocation6 + $0x640] sm:$0xff] }
 0x284   : > { %v3171_v10 = vpack.c.bf16 %v652_v5, %v644_v1  ;;  %v730_v5 = vld [vmem:[#allocation6 + $0x6c0] sm:$0xff] }
 0x285   : > { %3008 = vmatpush1.bf16.msra.mxu0 %v3007_v14  ;;  %3072 = vmatpush1.bf16.msra.mxu1 %v3071_v15  ;;  %v595_v14 = vld [vmem:[#allocation6 + $0x288] sm:$0xff] }
 0x286   : > { %3074 = vmatprep.subr.bf16.mxu0 %v3073_v18  ;;  %3138 = vmatprep.subr.bf16.mxu1 %v3137_v21  ;;  %v603_v15 = vld [vmem:[#allocation6 + $0x2c8] sm:$0xff]  ;;  %v597_v18 = vld [vmem:[#allocation6 + $0x298] sm:$0xff] }
 0x287   : > { %v605_v21 = vld [vmem:[#allocation6 + $0x2d8] sm:$0xff]  ;;  %v3093_v24 = vpack.c.bf16 %v603_v15, %v595_v14  ;;  %v660_v14 = vld [vmem:[#allocation6 + $0x490] sm:$0xff] }
 0x288   : > { %1234 = vmatmul.mubr.f32.vlgmr.msra.gmra.mrb[2].mxu0 %v4341_v6  ;;  %1305 = vmatmul.mubr.f32.vlgmr.msra.gmra.mrb[2].mxu1 %v4341_v6  ;;  %v556_v6 = vld [vmem:[#allocation6 + $0x150] sm:$0xff]  ;;  %v3157_v28 = vpack.c.bf16 %v605_v21, %v597_v18  ;;  %v675_v21 = vld [vmem:[#allocation6 + $0x508] sm:$0xff] }
 0x289   : > { %3076 = vmatpush1.bf16.msra.mxu0 %v3075_v50  ;;  %1375 = vmatprep.mubr.f32.mxu0 %v4349_v42  ;;  %v3147_v58 = vpack.c.bf16 %v556_v6, %v548_v4  ;;  %v619_v50 = vld [vmem:[#allocation6 + $0x348] sm:$0xff]  ;;  %v634_v6 = vld [vmem:[#allocation6 + $0x3c0] sm:$0xff]  ;;  %v668_v18 = vld [vmem:[#allocation6 + $0x4d0] sm:$0xff] }
 0x28a   : > { %3140 = vmatpush1.bf16.msra.mxu1 %v3139_v31  ;;  %1446 = vmatprep.mubr.f32.mxu1 %v4349_v42  ;;  %v613_v31 = vld [vmem:[#allocation6 + $0x318] sm:$0xff]  ;;  %v3175_v26 = vpack.c.bf16 %v668_v18, %v660_v14  ;;  %v746_v18 = vld [vmem:[#allocation6 + $0x740] sm:$0xff] }
 0x28b   : > { %3078 = vmatprep.subr.bf16.mxu0 %v3077_v40  ;;  %3142 = vmatprep.subr.bf16.mxu1 %v3141_v19  ;;  %v3097_v40 = vpack.c.bf16 %v619_v50, %v611_v30  ;;  %v610_v19 = vld [vmem:[#allocation6 + $0x300] sm:$0xff]  ;;  %v3161_v36 = vpack.c.bf16 %v621_v32, %v613_v31  ;;  %v676_v30 = vld [vmem:[#allocation6 + $0x510] sm:$0xff]  ;;  %v691_v32 = vld [vmem:[#allocation6 + $0x588] sm:$0xff] }
 0x28c   : > { %v3099_v48 = vpack.c.bf16 %v618_v34, %v610_v19  ;;  %v684_v31 = vld [vmem:[#allocation6 + $0x550] sm:$0xff] }
 0x28d   : > { %3080 = vmatpush1.bf16.msra.mxu0 %v3079_v45  ;;  %v635_v45 = vld [vmem:[#allocation6 + $0x3c8] sm:$0xff]  ;;  %v3179_v34 = vpack.c.bf16 %v684_v31, %v676_v30  ;;  %v762_v31 = vld [vmem:[#allocation6 + $0x7c0] sm:$0xff] }
 0x28e   : > { %3144 = vmatpush1.bf16.msra.mxu1 %v3143_v38  ;;  %3082 = vmatprep.subr.bf16.mxu0 %v3081_v47  ;;  %v629_v38 = vld [vmem:[#allocation6 + $0x398] sm:$0xff]  ;;  %v3101_v4 = vpack.c.bf16 %v635_v45, %v627_v44  ;;  %v692_v44 = vld [vmem:[#allocation6 + $0x590] sm:$0xff] }
 0x28f   : > { %3146 = vmatprep.subr.bf16.mxu1 %v3145_v16  ;;  %v637_v47 = vld [vmem:[#allocation6 + $0x3d8] sm:$0xff]  ;;  %v626_v16 = vld [vmem:[#allocation6 + $0x380] sm:$0xff] }
 0x290   : > { %v3165_v41 = vpack.c.bf16 %v637_v47, %v629_v38  ;;  %v3103_v60 = vpack.c.bf16 %v634_v6, %v626_v16  ;;  %v700_v38 = vld [vmem:[#allocation6 + $0x5d0] sm:$0xff]  ;;  %v707_v47 = vld [vmem:[#allocation6 + $0x608] sm:$0xff] }
 0x291   : > { %3084 = vmatpush1.bf16.msra.mxu0 %v3083_v37  ;;  %v651_v37 = vld [vmem:[#allocation6 + $0x448] sm:$0xff]  ;;  %v3183_v6 = vpack.c.bf16 %v700_v38, %v692_v44  ;;  %v518_v38 = vld [vmem:[#allocation6 + $0x20] sm:$0xff] }
 0x292   : > { %3148 = vmatpush1.bf16.msra.mxu1 %v3147_v58  ;;  %3086 = vmatprep.subr.bf16.mxu0 %v3085_v59  ;;  %v645_v58 = vld [vmem:[#allocation6 + $0x418] sm:$0xff]  ;;  %v3105_v62 = vpack.c.bf16 %v651_v37, %v643_v46  ;;  %v708_v46 = vld [vmem:[#allocation6 + $0x610] sm:$0xff] }
 0x293   : > { %3150 = vmatprep.subr.bf16.mxu1 %v3149_v63  ;;  %v653_v59 = vld [vmem:[#allocation6 + $0x458] sm:$0xff]  ;;  %v642_v63 = vld [vmem:[#allocation6 + $0x400] sm:$0xff] }
 0x294   : > { %v3169_v2 = vpack.c.bf16 %v653_v59, %v645_v58  ;;  %v3107_v9 = vpack.c.bf16 %v650_v0, %v642_v63  ;;  %v716_v58 = vld [vmem:[#allocation6 + $0x650] sm:$0xff]  ;;  %v723_v59 = vld [vmem:[#allocation6 + $0x688] sm:$0xff] }
 0x295   : > { %3088 = vmatpush1.bf16.msra.mxu0 %v3087_v7  ;;  %v667_v7 = vld [vmem:[#allocation6 + $0x4c8] sm:$0xff]  ;;  %v3187_v0 = vpack.c.bf16 %v716_v58, %v708_v46  ;;  %v542_v58 = vld [vmem:[#allocation6 + $0xe0] sm:$0xff] }
 0x296   : > { %3152 = vmatpush1.bf16.msra.mxu1 %v3151_v53  ;;  %3090 = vmatprep.subr.bf16.mxu0 %v3089_v8  ;;  %v661_v53 = vld [vmem:[#allocation6 + $0x498] sm:$0xff]  ;;  %v3109_v11 = vpack.c.bf16 %v667_v7, %v659_v54  ;;  %v724_v54 = vld [vmem:[#allocation6 + $0x690] sm:$0xff] }
 0x297   : > { %3154 = vmatprep.subr.bf16.mxu1 %v3153_v12  ;;  %v669_v8 = vld [vmem:[#allocation6 + $0x4d8] sm:$0xff]  ;;  %v658_v12 = vld [vmem:[#allocation6 + $0x480] sm:$0xff] }
 0x298   : > { %v3173_v15 = vpack.c.bf16 %v669_v8, %v661_v53  ;;  %v3111_v25 = vpack.c.bf16 %v666_v13, %v658_v12  ;;  %v732_v53 = vld [vmem:[#allocation6 + $0x6d0] sm:$0xff]  ;;  %v739_v8 = vld [vmem:[#allocation6 + $0x708] sm:$0xff] }
 0x299   : > { %3092 = vmatpush1.bf16.msra.mxu0 %v3091_v22  ;;  %v683_v22 = vld [vmem:[#allocation6 + $0x548] sm:$0xff]  ;;  %v3191_v13 = vpack.c.bf16 %v732_v53, %v724_v54 }
 0x29a   : > { %3156 = vmatpush1.bf16.msra.mxu1 %v3155_v23  ;;  %3094 = vmatprep.subr.bf16.mxu0 %v3093_v24  ;;  %v677_v23 = vld [vmem:[#allocation6 + $0x518] sm:$0xff]  ;;  %v3113_v27 = vpack.c.bf16 %v683_v22, %v675_v21  ;;  %v740_v21 = vld [vmem:[#allocation6 + $0x710] sm:$0xff] }
 0x29b   : > { %3158 = vmatprep.subr.bf16.mxu1 %v3157_v28  ;;  %v685_v24 = vld [vmem:[#allocation6 + $0x558] sm:$0xff]  ;;  %v674_v28 = vld [vmem:[#allocation6 + $0x500] sm:$0xff] }
 0x29c   : > { %v3177_v50 = vpack.c.bf16 %v685_v24, %v677_v23  ;;  %v3115_v19 = vpack.c.bf16 %v682_v29, %v674_v28  ;;  %v748_v23 = vld [vmem:[#allocation6 + $0x750] sm:$0xff]  ;;  %v755_v24 = vld [vmem:[#allocation6 + $0x788] sm:$0xff] }
 0x29d   : > { %3096 = vmatpush1.bf16.msra.mxu0 %v3095_v39  ;;  %v699_v39 = vld [vmem:[#allocation6 + $0x5c8] sm:$0xff]  ;;  %v3195_v29 = vpack.c.bf16 %v748_v23, %v740_v21 }
 0x29e   : > { %3160 = vmatpush1.bf16.msra.mxu1 %v3159_v33  ;;  %3098 = vmatprep.subr.bf16.mxu0 %v3097_v40  ;;  %v693_v33 = vld [vmem:[#allocation6 + $0x598] sm:$0xff]  ;;  %v3117_v35 = vpack.c.bf16 %v699_v39, %v691_v32  ;;  %v756_v32 = vld [vmem:[#allocation6 + $0x790] sm:$0xff] }
 0x29f   : > { %3162 = vmatprep.subr.bf16.mxu1 %v3161_v36  ;;  %v701_v40 = vld [vmem:[#allocation6 + $0x5d8] sm:$0xff]  ;;  %v690_v36 = vld [vmem:[#allocation6 + $0x580] sm:$0xff] }
 0x2a0   : > { %v3181_v45 = vpack.c.bf16 %v701_v40, %v693_v33  ;;  %v3119_v16 = vpack.c.bf16 %v698_v43, %v690_v36  ;;  %v764_v33 = vld [vmem:[#allocation6 + $0x7d0] sm:$0xff]  ;;  %v454_v40 = vmul.f32 %v4335_v52, %v4302_v49  ;;  %v529_v36 = vld [vmem:[#allocation6 + $0x78] sm:$0xff]  ;;  %v543_v49 = vld [vmem:[#allocation6 + $0xe8] sm:$0xff] }
 0x2a1   : > { %3100 = vmatpush1.bf16.msra.mxu0 %v3099_v48  ;;  %v715_v48 = vld [vmem:[#allocation6 + $0x648] sm:$0xff]  ;;  %v3199_v44 = vpack.c.bf16 %v764_v33, %v756_v32  ;;  %v582_v33 = vld [vmem:[#allocation6 + $0x220] sm:$0xff] }
 0x2a2   : > { %3164 = vmatpush1.bf16.msra.mxu1 %v3163_v51  ;;  %3102 = vmatprep.subr.bf16.mxu0 %v3101_v4  ;;  %v709_v51 = vld [vmem:[#allocation6 + $0x618] sm:$0xff]  ;;  %v3121_v17 = vpack.c.bf16 %v715_v48, %v707_v47  ;;  %v526_v47 = vld [vmem:[#allocation6 + $0x60] sm:$0xff]  ;;  %v458_v48 = vmul.f32 0.2, %v454_v40  ;;  %vm456_vm3 = vcmp.ge.f32.partialorder %v454_v40, 0.0 }
 0x2a3   : > { %3166 = vmatprep.subr.bf16.mxu1 %v3165_v41  ;;  %v717_v4 = vld [vmem:[#allocation6 + $0x658] sm:$0xff]  ;;  %v706_v41 = vld [vmem:[#allocation6 + $0x600] sm:$0xff] }
 0x2a4   : > { %v3185_v37 = vpack.c.bf16 %v717_v4, %v709_v51  ;;  %v3123_v63 = vpack.c.bf16 %v714_v20, %v706_v41  ;;  %v520_v4 = vld [vmem:[#allocation6 + $0x30] sm:$0xff]  ;;  %v537_v41 = vld [vmem:[#allocation6 + $0xb8] sm:$0xff] }
 0x2a5   : > { %3104 = vmatpush1.bf16.msra.mxu0 %v3103_v60  ;;  %v731_v60 = vld [vmem:[#allocation6 + $0x6c8] sm:$0xff]  ;;  %v545_v20 = vld [vmem:[#allocation6 + $0xf8] sm:$0xff] }
 0x2a6   : > { %3168 = vmatpush1.bf16.msra.mxu1 %v3167_v61  ;;  %3106 = vmatprep.subr.bf16.mxu0 %v3105_v62  ;;  %v725_v61 = vld [vmem:[#allocation6 + $0x698] sm:$0xff]  ;;  %v3125_v1 = vpack.c.bf16 %v731_v60, %v723_v59  ;;  %v536_v59 = vld [vmem:[#allocation6 + $0xb0] sm:$0xff]  ;;  %v4355_v60 = vsel %vm456_vm3, %v454_v40, %v458_v48  ;;  %v590_v40 = vld [vmem:[#allocation6 + $0x260] sm:$0xff] }
 0x2a7   : > { %3170 = vmatprep.subr.bf16.mxu1 %v3169_v2  ;;  %v733_v62 = vld [vmem:[#allocation6 + $0x6d8] sm:$0xff]  ;;  %v722_v2 = vld [vmem:[#allocation6 + $0x680] sm:$0xff] }
 0x2a8   : > { %v3189_v7 = vpack.c.bf16 %v733_v62, %v725_v61  ;;  %v3127_v12 = vpack.c.bf16 %v730_v5, %v722_v2  ;;  %v544_v62 = vld [vmem:[#allocation6 + $0xf0] sm:$0xff]  ;;  %v553_v2 = vld [vmem:[#allocation6 + $0x138] sm:$0xff] }
 0x2a9   : > { %3108 = vmatpush1.bf16.msra.mxu0 %v3107_v9  ;;  %v747_v9 = vld [vmem:[#allocation6 + $0x748] sm:$0xff]  ;;  %v561_v5 = vld [vmem:[#allocation6 + $0x178] sm:$0xff] }
 0x2aa   : > { %3172 = vmatpush1.bf16.msra.mxu1 %v3171_v10  ;;  %3110 = vmatprep.subr.bf16.mxu0 %v3109_v11  ;;  %v741_v10 = vld [vmem:[#allocation6 + $0x718] sm:$0xff]  ;;  %v3129_v14 = vpack.c.bf16 %v747_v9, %v739_v8  ;;  %v550_v8 = vld [vmem:[#allocation6 + $0x120] sm:$0xff] }
 0x2ab   : > { %3174 = vmatprep.subr.bf16.mxu1 %v3173_v15  ;;  %v749_v11 = vld [vmem:[#allocation6 + $0x758] sm:$0xff]  ;;  %v738_v15 = vld [vmem:[#allocation6 + $0x700] sm:$0xff] }
 0x2ac   : > { %v3193_v22 = vpack.c.bf16 %v749_v11, %v741_v10  ;;  %v3131_v28 = vpack.c.bf16 %v746_v18, %v738_v15  ;;  %v558_v9 = vld [vmem:[#allocation6 + $0x160] sm:$0xff]  ;;  %v552_v10 = vld [vmem:[#allocation6 + $0x130] sm:$0xff]  ;;  %v3273_v11 = vpack.c.bf16 %v561_v5, %v553_v2  ;;  %v569_v15 = vld [vmem:[#allocation6 + $0x1b8] sm:$0xff] }
 0x2ad   : > { %3112 = vmatpush1.bf16.msra.mxu0 %v3111_v25  ;;  %v763_v25 = vld [vmem:[#allocation6 + $0x7c8] sm:$0xff]  ;;  %v577_v18 = vld [vmem:[#allocation6 + $0x1f8] sm:$0xff]  ;;  %v3211_v21 = vpack.c.bf16 %v558_v9, %v550_v8 }
 0x2ae   : > { %3176 = vmatpush1.bf16.msra.mxu1 %v3175_v26  ;;  %3114 = vmatprep.subr.bf16.mxu0 %v3113_v27  ;;  %v757_v26 = vld [vmem:[#allocation6 + $0x798] sm:$0xff]  ;;  %v3133_v30 = vpack.c.bf16 %v763_v25, %v755_v24  ;;  %v566_v24 = vld [vmem:[#allocation6 + $0x1a0] sm:$0xff]  ;;  %v631_v2 = vld [vmem:[#allocation6 + $0x3a8] sm:$0xff] }
 0x2af   : > { %3178 = vmatprep.subr.bf16.mxu1 %v3177_v50  ;;  %v765_v27 = vld [vmem:[#allocation6 + $0x7d8] sm:$0xff]  ;;  %v754_v50 = vld [vmem:[#allocation6 + $0x780] sm:$0xff]  ;;  %v639_v5 = vld [vmem:[#allocation6 + $0x3e8] sm:$0xff] }
 0x2b0   : > { %v3197_v39 = vpack.c.bf16 %v765_v27, %v757_v26  ;;  %v3135_v43 = vpack.c.bf16 %v762_v31, %v754_v50  ;;  %v574_v25 = vld [vmem:[#allocation6 + $0x1e0] sm:$0xff]  ;;  %v568_v26 = vld [vmem:[#allocation6 + $0x1b0] sm:$0xff]  ;;  %v3277_v27 = vpack.c.bf16 %v577_v18, %v569_v15  ;;  %v593_v50 = vld [vmem:[#allocation6 + $0x278] sm:$0xff]  ;;  %v3229_v9 = vpack.c.bf16 %v639_v5, %v631_v2 }
 0x2b1   : > { %3116 = vmatpush1.bf16.msra.mxu0 %v3115_v19  ;;  %v519_v19 = vld [vmem:[#allocation6 + $0x28] sm:$0xff]  ;;  %v3215_v31 = vpack.c.bf16 %v574_v25, %v566_v24  ;;  %v704_v5 = vld [vmem:[#allocation6 + $0x5f0] sm:$0xff] }
 0x2b2   : > { %3180 = vmatpush1.bf16.msra.mxu1 %v3179_v34  ;;  %3118 = vmatprep.subr.bf16.mxu0 %v3117_v35  ;;  %v527_v34 = vld [vmem:[#allocation6 + $0x68] sm:$0xff]  ;;  %v521_v35 = vld [vmem:[#allocation6 + $0x38] sm:$0xff] }
 0x2b3   : > { %3182 = vmatprep.subr.bf16.mxu1 %v3181_v45  ;;  %v3201_v45 = vpack.c.bf16 %v527_v34, %v519_v19  ;;  %v3265_v51 = vpack.c.bf16 %v529_v36, %v521_v35  ;;  %v584_v19 = vld [vmem:[#allocation6 + $0x230] sm:$0xff]  ;;  %v599_v36 = vld [vmem:[#allocation6 + $0x2a8] sm:$0xff] }
 0x2b4   : > { %v592_v35 = vld [vmem:[#allocation6 + $0x270] sm:$0xff]  ;;  %v647_v15 = vld [vmem:[#allocation6 + $0x428] sm:$0xff] }
 0x2b5   : > { %3120 = vmatpush1.bf16.msra.mxu0 %v3119_v16  ;;  %v528_v16 = vld [vmem:[#allocation6 + $0x70] sm:$0xff]  ;;  %v655_v18 = vld [vmem:[#allocation6 + $0x468] sm:$0xff] }
 0x2b6   : > { %3184 = vmatpush1.bf16.msra.mxu1 %v3183_v6  ;;  %3122 = vmatprep.subr.bf16.mxu0 %v3121_v17  ;;  %v535_v6 = vld [vmem:[#allocation6 + $0xa8] sm:$0xff]  ;;  %v3203_v17 = vpack.c.bf16 %v526_v47, %v518_v38  ;;  %v3267_v46 = vpack.c.bf16 %v528_v16, %v520_v4  ;;  %v3219_v38 = vpack.c.bf16 %v590_v40, %v582_v33  ;;  %v606_v4 = vld [vmem:[#allocation6 + $0x2e0] sm:$0xff]  ;;  %v600_v16 = vld [vmem:[#allocation6 + $0x2b0] sm:$0xff] }
 0x2b7   : > { %3186 = vmatprep.subr.bf16.mxu1 %v3185_v37  ;;  %v534_v37 = vld [vmem:[#allocation6 + $0xa0] sm:$0xff]  ;;  %v3205_v61 = vpack.c.bf16 %v543_v49, %v535_v6  ;;  %v3283_v47 = vpack.c.bf16 %v592_v35, %v584_v19  ;;  %v608_v49 = vld [vmem:[#allocation6 + $0x2f0] sm:$0xff]  ;;  %v3233_v25 = vpack.c.bf16 %v655_v18, %v647_v15 }
 0x2b8   : > { %v3207_v54 = vpack.c.bf16 %v542_v58, %v534_v37  ;;  %v3287_v58 = vpack.c.bf16 %v608_v49, %v600_v16  ;;  %v662_v19 = vld [vmem:[#allocation6 + $0x4a0] sm:$0xff]  ;;  %v664_v35 = vld [vmem:[#allocation6 + $0x4b0] sm:$0xff] }
 0x2b9   : > { %3124 = vmatpush1.bf16.msra.mxu0 %v3123_v63  ;;  %v551_v63 = vld [vmem:[#allocation6 + $0x128] sm:$0xff]  ;;  %v678_v16 = vld [vmem:[#allocation6 + $0x520] sm:$0xff]  ;;  %v680_v49 = vld [vmem:[#allocation6 + $0x530] sm:$0xff] }
 0x2ba   : > { %3188 = vmatpush1.bf16.msra.mxu1 %v3187_v0  ;;  %3126 = vmatprep.subr.bf16.mxu0 %v3125_v1  ;;  %v559_v0 = vld [vmem:[#allocation6 + $0x168] sm:$0xff]  ;;  %v3269_v1 = vpack.c.bf16 %v545_v20, %v537_v41  ;;  %v617_v20 = vld [vmem:[#allocation6 + $0x338] sm:$0xff]  ;;  %v720_v18 = vld [vmem:[#allocation6 + $0x670] sm:$0xff] }
 0x2bb   : > { %3190 = vmatprep.subr.bf16.mxu1 %v3189_v7  ;;  %v3271_v7 = vpack.c.bf16 %v544_v62, %v536_v59  ;;  %v3209_v53 = vpack.c.bf16 %v559_v0, %v551_v63  ;;  %v623_v41 = vld [vmem:[#allocation6 + $0x368] sm:$0xff]  ;;  %v622_v62 = vld [vmem:[#allocation6 + $0x360] sm:$0xff]  ;;  %v616_v63 = vld [vmem:[#allocation6 + $0x330] sm:$0xff] }
 0x2bd   : > { %3128 = vmatpush1.bf16.msra.mxu0 %v3127_v12  ;;  %v560_v12 = vld [vmem:[#allocation6 + $0x170] sm:$0xff] }
 0x2be   : > { %3192 = vmatpush1.bf16.msra.mxu1 %v3191_v13  ;;  %3130 = vmatprep.subr.bf16.mxu0 %v3129_v14  ;;  %v567_v13 = vld [vmem:[#allocation6 + $0x1a8] sm:$0xff] }
 0x2bf   : > { %3194 = vmatprep.subr.bf16.mxu1 %v3193_v22  ;;  %v575_v14 = vld [vmem:[#allocation6 + $0x1e8] sm:$0xff]  ;;  %v3275_v22 = vpack.c.bf16 %v560_v12, %v552_v10  ;;  %v630_v10 = vld [vmem:[#allocation6 + $0x3a0] sm:$0xff]  ;;  %v632_v12 = vld [vmem:[#allocation6 + $0x3b0] sm:$0xff] }
 0x2c0   : > { %v3213_v23 = vpack.c.bf16 %v575_v14, %v567_v13  ;;  %v640_v14 = vld [vmem:[#allocation6 + $0x3f0] sm:$0xff] }
 0x2c1   : > { %3132 = vmatpush1.bf16.msra.mxu0 %v3131_v28  ;;  %v583_v28 = vld [vmem:[#allocation6 + $0x228] sm:$0xff]  ;;  %v3295_v24 = vpack.c.bf16 %v640_v14, %v632_v12  ;;  %v710_v12 = vld [vmem:[#allocation6 + $0x620] sm:$0xff]  ;;  %v712_v14 = vld [vmem:[#allocation6 + $0x630] sm:$0xff] }
 0x2c2   : > { %3196 = vmatpush1.bf16.msra.mxu1 %v3195_v29  ;;  %3134 = vmatprep.subr.bf16.mxu0 %v3133_v30  ;;  %v591_v29 = vld [vmem:[#allocation6 + $0x268] sm:$0xff]  ;;  %v585_v30 = vld [vmem:[#allocation6 + $0x238] sm:$0xff] }
 0x2c3   : > { %3198 = vmatprep.subr.bf16.mxu1 %v3197_v39  ;;  %v3217_v39 = vpack.c.bf16 %v591_v29, %v583_v28  ;;  %v3281_v34 = vpack.c.bf16 %v593_v50, %v585_v30  ;;  %v656_v29 = vld [vmem:[#allocation6 + $0x470] sm:$0xff]  ;;  %v663_v30 = vld [vmem:[#allocation6 + $0x4a8] sm:$0xff] }
 0x2c4   : > { %v671_v50 = vld [vmem:[#allocation6 + $0x4e8] sm:$0xff] }
 0x2c5   : > { %3136 = vmatpush1.bf16.msra.mxu0 %v3135_v43  ;;  %v607_v43 = vld [vmem:[#allocation6 + $0x2e8] sm:$0xff]  ;;  %v3237_v40 = vpack.c.bf16 %v671_v50, %v663_v30  ;;  %v736_v50 = vld [vmem:[#allocation6 + $0x6f0] sm:$0xff] }
 0x2c6   : > { %3200 = vmatpush1.bf16.msra.mxu1 %v3199_v44  ;;  %3202 = vmatprep.subr.bf16.mxu0 %v3201_v45  ;;  %v601_v44 = vld [vmem:[#allocation6 + $0x2b8] sm:$0xff]  ;;  %v3221_v48 = vpack.c.bf16 %v607_v43, %v599_v36  ;;  %v672_v43 = vld [vmem:[#allocation6 + $0x4f0] sm:$0xff] }
 0x2c7   : > { %3266 = vmatprep.subr.bf16.mxu1 %v3265_v51  ;;  %v609_v45 = vld [vmem:[#allocation6 + $0x2f8] sm:$0xff]  ;;  %v598_v51 = vld [vmem:[#allocation6 + $0x2a0] sm:$0xff] }
 0x2c8   : > { %1376 = vmatmul.mubr.f32.vlgmr.msra.gmra.mrb[0].mxu0 %v4355_v60  ;;  %v3285_v6 = vpack.c.bf16 %v609_v45, %v601_v44  ;;  %v3223_v37 = vpack.c.bf16 %v606_v4, %v598_v51  ;;  %v679_v44 = vld [vmem:[#allocation6 + $0x528] sm:$0xff]  ;;  %v3303_v51 = vpack.c.bf16 %v672_v43, %v664_v35  ;;  %v742_v35 = vld [vmem:[#allocation6 + $0x720] sm:$0xff]  ;;  %v744_v43 = vld [vmem:[#allocation6 + $0x730] sm:$0xff] }
 0x2c9   : > { %1447 = vmatmul.mubr.f32.vlgmr.msra.gmra.mrb[0].mxu1 %v4355_v60  ;;  %3204 = vmatpush1.bf16.msra.mxu0 %v3203_v17  ;;  %v615_v17 = vld [vmem:[#allocation6 + $0x328] sm:$0xff] }
 0x2ca   : > { %1517 = vmatprep.mubr.f32.mxu0 %v4349_v42  ;;  %3268 = vmatpush1.bf16.msra.mxu1 %v3267_v46  ;;  %v625_v46 = vld [vmem:[#allocation6 + $0x378] sm:$0xff]  ;;  %v3225_v59 = vpack.c.bf16 %v623_v41, %v615_v17  ;;  %v687_v45 = vld [vmem:[#allocation6 + $0x568] sm:$0xff]  ;;  %v688_v41 = vld [vmem:[#allocation6 + $0x570] sm:$0xff] }
 0x2cb   : > { %1588 = vmatprep.mubr.f32.mxu1 %v4349_v42  ;;  %3206 = vmatprep.subr.bf16.mxu0 %v3205_v61  ;;  %v576_v42 = vld [vmem:[#allocation6 + $0x1f0] sm:$0xff]  ;;  %v614_v61 = vld [vmem:[#allocation6 + $0x320] sm:$0xff]  ;;  %v3289_v0 = vpack.c.bf16 %v625_v46, %v617_v20  ;;  %v3241_v4 = vpack.c.bf16 %v687_v45, %v679_v44  ;;  %v695_v20 = vld [vmem:[#allocation6 + $0x5a8] sm:$0xff] }
 0x2cc   : > { %3270 = vmatprep.subr.bf16.mxu1 %v3269_v1  ;;  %v3279_v32 = vpack.c.bf16 %v576_v42, %v568_v26  ;;  %v624_v1 = vld [vmem:[#allocation6 + $0x370] sm:$0xff]  ;;  %v646_v26 = vld [vmem:[#allocation6 + $0x420] sm:$0xff]  ;;  %v703_v46 = vld [vmem:[#allocation6 + $0x5e8] sm:$0xff] }
 0x2cd   : > { %3208 = vmatpush1.bf16.msra.mxu0 %v3207_v54  ;;  %v633_v54 = vld [vmem:[#allocation6 + $0x3b8] sm:$0xff]  ;;  %v3291_v8 = vpack.c.bf16 %v624_v1, %v616_v63  ;;  %v648_v42 = vld [vmem:[#allocation6 + $0x430] sm:$0xff]  ;;  %v694_v63 = vld [vmem:[#allocation6 + $0x5a0] sm:$0xff] }
 0x2ce   : > { %3272 = vmatpush1.bf16.msra.mxu1 %v3271_v7  ;;  %3210 = vmatprep.subr.bf16.mxu0 %v3209_v53  ;;  %v641_v7 = vld [vmem:[#allocation6 + $0x3f8] sm:$0xff]  ;;  %v3227_v53 = vpack.c.bf16 %v622_v62, %v614_v61  ;;  %v3299_v33 = vpack.c.bf16 %v656_v29, %v648_v42  ;;  %v3307_v61 = vpack.c.bf16 %v688_v41, %v680_v49  ;;  %v696_v1 = vld [vmem:[#allocation6 + $0x5b0] sm:$0xff]  ;;  %v726_v42 = vld [vmem:[#allocation6 + $0x6a0] sm:$0xff] }
 0x2cf   : > { %3274 = vmatprep.subr.bf16.mxu1 %v3273_v11  ;;  %v638_v11 = vld [vmem:[#allocation6 + $0x3e0] sm:$0xff]  ;;  %v3293_v13 = vpack.c.bf16 %v641_v7, %v633_v54  ;;  %v3245_v62 = vpack.c.bf16 %v703_v46, %v695_v20  ;;  %v711_v54 = vld [vmem:[#allocation6 + $0x628] sm:$0xff]  ;;  %v728_v29 = vld [vmem:[#allocation6 + $0x6b0] sm:$0xff] }
 0x2d0   : > { %v719_v7 = vld [vmem:[#allocation6 + $0x668] sm:$0xff]  ;;  %v752_v45 = vld [vmem:[#allocation6 + $0x770] sm:$0xff]  ;;  %v758_v49 = vld [vmem:[#allocation6 + $0x7a0] sm:$0xff] }
 0x2d1   : > { %3212 = vmatpush1.bf16.msra.mxu0 %v3211_v21  ;;  %v649_v21 = vld [vmem:[#allocation6 + $0x438] sm:$0xff]  ;;  %v760_v41 = vld [vmem:[#allocation6 + $0x7b0] sm:$0xff] }
 0x2d2   : > { %3276 = vmatpush1.bf16.msra.mxu1 %v3275_v22  ;;  %3214 = vmatprep.subr.bf16.mxu0 %v3213_v23  ;;  %v657_v22 = vld [vmem:[#allocation6 + $0x478] sm:$0xff]  ;;  %v3231_v23 = vpack.c.bf16 %v638_v11, %v630_v10  ;;  %v3311_v10 = vpack.c.bf16 %v704_v5, %v696_v1  ;;  %v3249_v11 = vpack.c.bf16 %v719_v7, %v711_v54  ;;  %v768_v46 = vld [vmem:[#allocation6 + $0x7f0] sm:$0xff]  ;;  %v1604_v5 = vld [vmem:[#allocation6 + $0x1040] sm:$0xff] }
 0x2d3   : > { %3278 = vmatprep.subr.bf16.mxu1 %v3277_v27  ;;  %v654_v27 = vld [vmem:[#allocation6 + $0x460] sm:$0xff]  ;;  %v3297_v28 = vpack.c.bf16 %v657_v22, %v649_v21  ;;  %v727_v21 = vld [vmem:[#allocation6 + $0x6a8] sm:$0xff]  ;;  %v1598_v7 = vld [vmem:[#allocation6 + $0x1010] sm:$0xff] }
 0x2d4   : > { %v735_v22 = vld [vmem:[#allocation6 + $0x6e8] sm:$0xff] }
 0x2d5   : > { %3216 = vmatpush1.bf16.msra.mxu0 %v3215_v31  ;;  %v665_v31 = vld [vmem:[#allocation6 + $0x4b8] sm:$0xff] }
 0x2d6   : > { %3280 = vmatpush1.bf16.msra.mxu1 %v3279_v32  ;;  %3218 = vmatprep.subr.bf16.mxu0 %v3217_v39  ;;  %v673_v32 = vld [vmem:[#allocation6 + $0x4f8] sm:$0xff]  ;;  %v3235_v39 = vpack.c.bf16 %v654_v27, %v646_v26  ;;  %v3315_v26 = vpack.c.bf16 %v720_v18, %v712_v14  ;;  %v3253_v27 = vpack.c.bf16 %v735_v22, %v727_v21  ;;  %v1612_v14 = vld [vmem:[#allocation6 + $0x1080] sm:$0xff]  ;;  %v1614_v18 = vld [vmem:[#allocation6 + $0x1090] sm:$0xff] }
 0x2d7   : > { %3282 = vmatprep.subr.bf16.mxu1 %v3281_v34  ;;  %v670_v34 = vld [vmem:[#allocation6 + $0x4e0] sm:$0xff]  ;;  %v3301_v36 = vpack.c.bf16 %v673_v32, %v665_v31  ;;  %v743_v31 = vld [vmem:[#allocation6 + $0x728] sm:$0xff]  ;;  %v1622_v22 = vld [vmem:[#allocation6 + $0x10d0] sm:$0xff] }
 0x2d8   : > { %v751_v32 = vld [vmem:[#allocation6 + $0x768] sm:$0xff] }
 0x2d9   : > { %3220 = vmatpush1.bf16.msra.mxu0 %v3219_v38  ;;  %v681_v38 = vld [vmem:[#allocation6 + $0x538] sm:$0xff] }
 0x2da   : > { %3284 = vmatpush1.bf16.msra.mxu1 %v3283_v47  ;;  %3222 = vmatprep.subr.bf16.mxu0 %v3221_v48  ;;  %v689_v47 = vld [vmem:[#allocation6 + $0x578] sm:$0xff]  ;;  %v3239_v48 = vpack.c.bf16 %v670_v34, %v662_v19  ;;  %v3319_v19 = vpack.c.bf16 %v736_v50, %v728_v29  ;;  %v3257_v34 = vpack.c.bf16 %v751_v32, %v743_v31  ;;  %v1628_v50 = vld [vmem:[#allocation6 + $0x1100] sm:$0xff]  ;;  %v1630_v32 = vld [vmem:[#allocation6 + $0x1110] sm:$0xff] }
 0x2db   : > { %3286 = vmatprep.subr.bf16.mxu1 %v3285_v6  ;;  %v686_v6 = vld [vmem:[#allocation6 + $0x560] sm:$0xff]  ;;  %v3305_v17 = vpack.c.bf16 %v689_v47, %v681_v38  ;;  %v759_v38 = vld [vmem:[#allocation6 + $0x7a8] sm:$0xff]  ;;  %v3399_v29 = vpack.c.bf16 %v1622_v22, %v1614_v18  ;;  %v1694_v22 = vld [vmem:[#allocation6 + $0x1310] sm:$0xff] }
 0x2dc   : > { %v767_v47 = vld [vmem:[#allocation6 + $0x7e8] sm:$0xff]  ;;  %v1636_v31 = vld [vmem:[#allocation6 + $0x1140] sm:$0xff] }
 0x2dd   : > { %3224 = vmatpush1.bf16.msra.mxu0 %v3223_v37  ;;  %v697_v37 = vld [vmem:[#allocation6 + $0x5b8] sm:$0xff]  ;;  %v1692_v18 = vld [vmem:[#allocation6 + $0x1300] sm:$0xff] }
 0x2de   : > { %3288 = vmatpush1.bf16.msra.mxu1 %v3287_v58  ;;  %3226 = vmatprep.subr.bf16.mxu0 %v3225_v59  ;;  %v705_v58 = vld [vmem:[#allocation6 + $0x5f8] sm:$0xff]  ;;  %v3243_v59 = vpack.c.bf16 %v686_v6, %v678_v16  ;;  %v3323_v16 = vpack.c.bf16 %v752_v45, %v744_v43  ;;  %v3261_v6 = vpack.c.bf16 %v767_v47, %v759_v38  ;;  %v1652_v45 = vld [vmem:[#allocation6 + $0x11c0] sm:$0xff]  ;;  %v1646_v38 = vld [vmem:[#allocation6 + $0x1190] sm:$0xff] }
 0x2df   : > { %3290 = vmatprep.subr.bf16.mxu1 %v3289_v0  ;;  %v702_v0 = vld [vmem:[#allocation6 + $0x5e0] sm:$0xff]  ;;  %v3309_v2 = vpack.c.bf16 %v705_v58, %v697_v37  ;;  %v1597_v37 = vld [vmem:[#allocation6 + $0x1008] sm:$0xff] }
 0x2e0   : > { %v1605_v58 = vld [vmem:[#allocation6 + $0x1048] sm:$0xff] }
 0x2e1   : > { %3228 = vmatpush1.bf16.msra.mxu0 %v3227_v53  ;;  %v713_v53 = vld [vmem:[#allocation6 + $0x638] sm:$0xff]  ;;  %v3329_v1 = vpack.c.bf16 %v1605_v58, %v1597_v37  ;;  %v1662_v37 = vld [vmem:[#allocation6 + $0x1210] sm:$0xff] }
 0x2e2   : > { %3292 = vmatpush1.bf16.msra.mxu1 %v3291_v8  ;;  %3230 = vmatprep.subr.bf16.mxu0 %v3229_v9  ;;  %v721_v8 = vld [vmem:[#allocation6 + $0x678] sm:$0xff]  ;;  %v3247_v9 = vpack.c.bf16 %v702_v0, %v694_v63  ;;  %v476_v63 = vmul.f32 %v4335_v52, %v4317_v3  ;;  %v3327_v0 = vpack.c.bf16 %v768_v46, %v760_v41  ;;  %v1668_v46 = vld [vmem:[#allocation6 + $0x1240] sm:$0xff] }
 0x2e3   : > { %3294 = vmatprep.subr.bf16.mxu1 %v3293_v13  ;;  %v718_v13 = vld [vmem:[#allocation6 + $0x660] sm:$0xff]  ;;  %v3313_v15 = vpack.c.bf16 %v721_v8, %v713_v53  ;;  %v1606_v53 = vld [vmem:[#allocation6 + $0x1050] sm:$0xff]  ;;  %v1613_v8 = vld [vmem:[#allocation6 + $0x1088] sm:$0xff] }
 0x2e4   : > { %vm478_vm4 = vcmp.ge.f32.partialorder %v476_v63, 0.0  ;;  %v3395_v3 = vpack.c.bf16 %v1606_v53, %v1598_v7  ;;  %v1684_v7 = vld [vmem:[#allocation6 + $0x12c0] sm:$0xff]  ;;  %v1678_v53 = vld [vmem:[#allocation6 + $0x1290] sm:$0xff] }
 0x2e5   : > { %3232 = vmatpush1.bf16.msra.mxu0 %v3231_v23  ;;  %v729_v23 = vld [vmem:[#allocation6 + $0x6b8] sm:$0xff] }
 0x2e6   : > { %3296 = vmatpush1.bf16.msra.mxu1 %v3295_v24  ;;  %3234 = vmatprep.subr.bf16.mxu0 %v3233_v25  ;;  %v737_v24 = vld [vmem:[#allocation6 + $0x6f8] sm:$0xff]  ;;  %v3251_v25 = vpack.c.bf16 %v718_v13, %v710_v12 }
 0x2e7   : > { %3298 = vmatprep.subr.bf16.mxu1 %v3297_v28  ;;  %v734_v28 = vld [vmem:[#allocation6 + $0x6e0] sm:$0xff]  ;;  %v3317_v30 = vpack.c.bf16 %v737_v24, %v729_v23  ;;  %v1615_v12 = vld [vmem:[#allocation6 + $0x1098] sm:$0xff]  ;;  %v1629_v23 = vld [vmem:[#allocation6 + $0x1108] sm:$0xff] }
 0x2e8   : > { %v1623_v13 = vld [vmem:[#allocation6 + $0x10d8] sm:$0xff]  ;;  %v1637_v24 = vld [vmem:[#allocation6 + $0x1148] sm:$0xff] }
 0x2e9   : > { %3236 = vmatpush1.bf16.msra.mxu0 %v3235_v39  ;;  %v745_v39 = vld [vmem:[#allocation6 + $0x738] sm:$0xff] }
 0x2ea   : > { %3300 = vmatpush1.bf16.msra.mxu1 %v3299_v33  ;;  %3238 = vmatprep.subr.bf16.mxu0 %v3237_v40  ;;  %v753_v33 = vld [vmem:[#allocation6 + $0x778] sm:$0xff]  ;;  %v3255_v40 = vpack.c.bf16 %v734_v28, %v726_v42 }
 0x2eb   : > { %3302 = vmatprep.subr.bf16.mxu1 %v3301_v36  ;;  %v750_v36 = vld [vmem:[#allocation6 + $0x760] sm:$0xff]  ;;  %v3321_v44 = vpack.c.bf16 %v753_v33, %v745_v39  ;;  %v1638_v33 = vld [vmem:[#allocation6 + $0x1150] sm:$0xff] }
 0x2ed   : > { %3240 = vmatpush1.bf16.msra.mxu0 %v3239_v48  ;;  %v761_v48 = vld [vmem:[#allocation6 + $0x7b8] sm:$0xff] }
 0x2ee   : > { %3304 = vmatpush1.bf16.msra.mxu1 %v3303_v51  ;;  %3242 = vmatprep.subr.bf16.mxu0 %v3241_v4  ;;  %v769_v51 = vld [vmem:[#allocation6 + $0x7f8] sm:$0xff]  ;;  %v3259_v4 = vpack.c.bf16 %v750_v36, %v742_v35  ;;  %v3339_v35 = vpack.c.bf16 %v1636_v31, %v1628_v50  ;;  %v3403_v36 = vpack.c.bf16 %v1638_v33, %v1630_v32  ;;  %v1708_v31 = vld [vmem:[#allocation6 + $0x1380] sm:$0xff] }
 0x2ef   : > { %3306 = vmatprep.subr.bf16.mxu1 %v3305_v17  ;;  %v766_v17 = vld [vmem:[#allocation6 + $0x7e0] sm:$0xff]  ;;  %v3325_v20 = vpack.c.bf16 %v769_v51, %v761_v48  ;;  %v1654_v48 = vld [vmem:[#allocation6 + $0x11d0] sm:$0xff]  ;;  %v1661_v51 = vld [vmem:[#allocation6 + $0x1208] sm:$0xff] }
 0x2f0   : > { %v1716_v32 = vld [vmem:[#allocation6 + $0x13c0] sm:$0xff] }
 0x2f1   : > { %3244 = vmatpush1.bf16.msra.mxu0 %v3243_v59  ;;  %v1599_v59 = vld [vmem:[#allocation6 + $0x1018] sm:$0xff] }
 0x2f2   : > { %3308 = vmatpush1.bf16.msra.mxu1 %v3307_v61  ;;  %3246 = vmatprep.subr.bf16.mxu0 %v3245_v62  ;;  %v1607_v61 = vld [vmem:[#allocation6 + $0x1058] sm:$0xff]  ;;  %v3263_v62 = vpack.c.bf16 %v766_v17, %v758_v49  ;;  %v3407_v17 = vpack.c.bf16 %v1654_v48, %v1646_v38  ;;  %v1732_v38 = vld [vmem:[#allocation6 + $0x1440] sm:$0xff] }
 0x2f3   : > { %3310 = vmatprep.subr.bf16.mxu1 %v3309_v2  ;;  %v1596_v2 = vld [vmem:[#allocation6 + $0x1000] sm:$0xff]  ;;  %v3393_v54 = vpack.c.bf16 %v1607_v61, %v1599_v59  ;;  %v1670_v59 = vld [vmem:[#allocation6 + $0x1250] sm:$0xff]  ;;  %v1677_v61 = vld [vmem:[#allocation6 + $0x1288] sm:$0xff] }
 0x2f5   : > { %3248 = vmatpush1.bf16.msra.mxu0 %v3247_v9  ;;  %v1621_v9 = vld [vmem:[#allocation6 + $0x10c8] sm:$0xff] }
 0x2f6   : > { %3312 = vmatpush1.bf16.msra.mxu1 %v3311_v10  ;;  %3250 = vmatprep.subr.bf16.mxu0 %v3249_v11  ;;  %v3331_v10 = vpack.c.bf16 %v1604_v5, %v1596_v2  ;;  %v480_v11 = vmul.f32 0.2, %v476_v63  ;;  %v3333_v21 = vpack.c.bf16 %v1621_v9, %v1613_v8  ;;  %v3411_v2 = vpack.c.bf16 %v1670_v59, %v1662_v37  ;;  %v1686_v9 = vld [vmem:[#allocation6 + $0x12d0] sm:$0xff]  ;;  %v1748_v37 = vld [vmem:[#allocation6 + $0x14c0] sm:$0xff] }
 0x2f7   : > { %3314 = vmatprep.subr.bf16.mxu1 %v3313_v15  ;;  %v1620_v15 = vld [vmem:[#allocation6 + $0x10c0] sm:$0xff] }
 0x2f8   : > { %v4366_v42 = vsel %vm478_vm4, %v476_v63, %v480_v11  ;;  %v3335_v28 = vpack.c.bf16 %v1620_v15, %v1612_v14  ;;  %v1679_v63 = vld [vmem:[#allocation6 + $0x1298] sm:$0xff]  ;;  %v1701_v11 = vld [vmem:[#allocation6 + $0x1348] sm:$0xff]  ;;  %v3415_v14 = vpack.c.bf16 %v1686_v9, %v1678_v53  ;;  %v1764_v53 = vld [vmem:[#allocation6 + $0x1540] sm:$0xff] }
 0x2f9   : > { %3252 = vmatpush1.bf16.msra.mxu0 %v3251_v25  ;;  %v3397_v25 = vpack.c.bf16 %v1623_v13, %v1615_v12  ;;  %v1695_v12 = vld [vmem:[#allocation6 + $0x1318] sm:$0xff] }
 0x2fa   : > { %3316 = vmatpush1.bf16.msra.mxu1 %v3315_v26  ;;  %3254 = vmatprep.subr.bf16.mxu0 %v3253_v27  ;;  %v1631_v26 = vld [vmem:[#allocation6 + $0x1118] sm:$0xff] }
 0x2fb   : > { %3318 = vmatprep.subr.bf16.mxu1 %v3317_v30  ;;  %v1639_v27 = vld [vmem:[#allocation6 + $0x1158] sm:$0xff]  ;;  %v3337_v30 = vpack.c.bf16 %v1637_v24, %v1629_v23  ;;  %v1702_v24 = vld [vmem:[#allocation6 + $0x1350] sm:$0xff] }
 0x2fc   : > { %v3401_v39 = vpack.c.bf16 %v1639_v27, %v1631_v26  ;;  %v1703_v13 = vld [vmem:[#allocation6 + $0x1358] sm:$0xff]  ;;  %v1717_v26 = vld [vmem:[#allocation6 + $0x13c8] sm:$0xff] }
 0x2fd   : > { %3256 = vmatpush1.bf16.msra.mxu0 %v3255_v40  ;;  %v1645_v40 = vld [vmem:[#allocation6 + $0x1188] sm:$0xff]  ;;  %v3417_v23 = vpack.c.bf16 %v1703_v13, %v1695_v12  ;;  %v1711_v27 = vld [vmem:[#allocation6 + $0x1398] sm:$0xff] }
 0x2fe   : > { %3320 = vmatpush1.bf16.msra.mxu1 %v3319_v19  ;;  %3258 = vmatprep.subr.bf16.mxu0 %v3257_v34  ;;  %v1647_v19 = vld [vmem:[#allocation6 + $0x1198] sm:$0xff]  ;;  %v1781_v12 = vld [vmem:[#allocation6 + $0x15c8] sm:$0xff] }
 0x2ff   : > { %3322 = vmatprep.subr.bf16.mxu1 %v3321_v44  ;;  %v1655_v34 = vld [vmem:[#allocation6 + $0x11d8] sm:$0xff]  ;;  %v1644_v44 = vld [vmem:[#allocation6 + $0x1180] sm:$0xff] }
 0x300   : > { %v3405_v47 = vpack.c.bf16 %v1655_v34, %v1647_v19  ;;  %v3343_v49 = vpack.c.bf16 %v1652_v45, %v1644_v44  ;;  %v1733_v19 = vld [vmem:[#allocation6 + $0x1448] sm:$0xff]  ;;  %v1727_v34 = vld [vmem:[#allocation6 + $0x1418] sm:$0xff]  ;;  %v1724_v45 = vld [vmem:[#allocation6 + $0x1400] sm:$0xff] }
 0x301   : > { %3260 = vmatpush1.bf16.msra.mxu0 %v3259_v4  ;;  %v1669_v4 = vld [vmem:[#allocation6 + $0x1248] sm:$0xff]  ;;  %v1775_v13 = vld [vmem:[#allocation6 + $0x1598] sm:$0xff] }
 0x302   : > { %3324 = vmatpush1.bf16.msra.mxu1 %v3323_v16  ;;  %3262 = vmatprep.subr.bf16.mxu0 %v3261_v6  ;;  %v1663_v16 = vld [vmem:[#allocation6 + $0x1218] sm:$0xff]  ;;  %v3345_v41 = vpack.c.bf16 %v1669_v4, %v1661_v51  ;;  %v1734_v51 = vld [vmem:[#allocation6 + $0x1450] sm:$0xff]  ;;  %v1741_v4 = vld [vmem:[#allocation6 + $0x1488] sm:$0xff] }
 0x303   : > { %3326 = vmatprep.subr.bf16.mxu1 %v3325_v20  ;;  %v1671_v6 = vld [vmem:[#allocation6 + $0x1258] sm:$0xff]  ;;  %v1660_v20 = vld [vmem:[#allocation6 + $0x1200] sm:$0xff] }
 0x304   : > { %v3409_v58 = vpack.c.bf16 %v1671_v6, %v1663_v16  ;;  %v1749_v16 = vld [vmem:[#allocation6 + $0x14c8] sm:$0xff]  ;;  %v1743_v6 = vld [vmem:[#allocation6 + $0x1498] sm:$0xff] }
 0x305   : > { %3264 = vmatpush1.bf16.msra.mxu0 %v3263_v62  ;;  %v1685_v62 = vld [vmem:[#allocation6 + $0x12c8] sm:$0xff] }
 0x306   : > { %3328 = vmatpush1.bf16.msra.mxu1 %v3327_v0  ;;  %3330 = vmatprep.subr.bf16.mxu0 %v3329_v1  ;;  %v1687_v0 = vld [vmem:[#allocation6 + $0x12d8] sm:$0xff]  ;;  %v3347_v1 = vpack.c.bf16 %v1668_v46, %v1660_v20  ;;  %v3349_v5 = vpack.c.bf16 %v1685_v62, %v1677_v61  ;;  %v3365_v20 = vpack.c.bf16 %v1749_v16, %v1741_v4  ;;  %v1740_v46 = vld [vmem:[#allocation6 + $0x1480] sm:$0xff]  ;;  %v1750_v61 = vld [vmem:[#allocation6 + $0x14d0] sm:$0xff] }
 0x307   : > { %3394 = vmatprep.subr.bf16.mxu1 %v3393_v54  ;;  %v1676_v54 = vld [vmem:[#allocation6 + $0x1280] sm:$0xff]  ;;  %v3413_v8 = vpack.c.bf16 %v1687_v0, %v1679_v63  ;;  %v1757_v62 = vld [vmem:[#allocation6 + $0x1508] sm:$0xff]  ;;  %v1759_v0 = vld [vmem:[#allocation6 + $0x1518] sm:$0xff] }
 0x308   : > { %1518 = vmatmul.mubr.f32.vlgmr.msra.gmra.mrb[2].mxu0 %v4355_v60  ;;  %v1765_v63 = vld [vmem:[#allocation6 + $0x1548] sm:$0xff]  ;;  %v1814_v4 = vld [vmem:[#allocation6 + $0x16d0] sm:$0xff] }
 0x309   : > { %1589 = vmatmul.mubr.f32.vlgmr.msra.gmra.mrb[2].mxu1 %v4355_v60  ;;  %3332 = vmatpush1.bf16.msra.mxu0 %v3331_v10  ;;  %v1653_v60 = vld [vmem:[#allocation6 + $0x11c8] sm:$0xff] }
 0x30a   : > { %1916 = vmatprep.mubr.f32.mxu0 %v4366_v42  ;;  %3396 = vmatpush1.bf16.msra.mxu1 %v3395_v3  ;;  %v3341_v43 = vpack.c.bf16 %v1653_v60, %v1645_v40  ;;  %v1693_v10 = vld [vmem:[#allocation6 + $0x1308] sm:$0xff]  ;;  %v3351_v3 = vpack.c.bf16 %v1684_v7, %v1676_v54  ;;  %v1718_v40 = vld [vmem:[#allocation6 + $0x13d0] sm:$0xff]  ;;  %v3369_v54 = vpack.c.bf16 %v1765_v63, %v1757_v62  ;;  %v1756_v7 = vld [vmem:[#allocation6 + $0x1500] sm:$0xff] }
 0x30b   : > { %1987 = vmatprep.mubr.f32.mxu1 %v4366_v42  ;;  %3334 = vmatprep.subr.bf16.mxu0 %v3333_v21  ;;  %v3353_v15 = vpack.c.bf16 %v1701_v11, %v1693_v10  ;;  %v1700_v21 = vld [vmem:[#allocation6 + $0x1340] sm:$0xff]  ;;  %v1725_v60 = vld [vmem:[#allocation6 + $0x1408] sm:$0xff]  ;;  %v1766_v10 = vld [vmem:[#allocation6 + $0x1550] sm:$0xff] }
 0x30c   : > { %3398 = vmatprep.subr.bf16.mxu1 %v3397_v25  ;;  %v1709_v25 = vld [vmem:[#allocation6 + $0x1388] sm:$0xff]  ;;  %v3361_v44 = vpack.c.bf16 %v1733_v19, %v1725_v60  ;;  %v1798_v60 = vld [vmem:[#allocation6 + $0x1650] sm:$0xff] }
 0x30d   : > { %3336 = vmatpush1.bf16.msra.mxu0 %v3335_v28  ;;  %v1719_v28 = vld [vmem:[#allocation6 + $0x13d8] sm:$0xff]  ;;  %v3357_v50 = vpack.c.bf16 %v1717_v26, %v1709_v25  ;;  %v1773_v11 = vld [vmem:[#allocation6 + $0x1588] sm:$0xff]  ;;  %v1782_v25 = vld [vmem:[#allocation6 + $0x15d0] sm:$0xff] }
 0x30e   : > { %3400 = vmatpush1.bf16.msra.mxu1 %v3399_v29  ;;  %3338 = vmatprep.subr.bf16.mxu0 %v3337_v30  ;;  %v3355_v29 = vpack.c.bf16 %v1700_v21, %v1692_v18  ;;  %v3419_v30 = vpack.c.bf16 %v1702_v24, %v1694_v22  ;;  %v3421_v33 = vpack.c.bf16 %v1719_v28, %v1711_v27  ;;  %v1772_v21 = vld [vmem:[#allocation6 + $0x1580] sm:$0xff]  ;;  %v1789_v26 = vld [vmem:[#allocation6 + $0x1608] sm:$0xff]  ;;  %v1791_v28 = vld [vmem:[#allocation6 + $0x1618] sm:$0xff] }
 0x30f   : > { %3402 = vmatprep.subr.bf16.mxu1 %v3401_v39  ;;  %v1710_v39 = vld [vmem:[#allocation6 + $0x1390] sm:$0xff]  ;;  %v3373_v18 = vpack.c.bf16 %v1781_v12, %v1773_v11  ;;  %v1780_v22 = vld [vmem:[#allocation6 + $0x15c0] sm:$0xff]  ;;  %v1797_v27 = vld [vmem:[#allocation6 + $0x1648] sm:$0xff]  ;;  %v475_v12 = vmul.f32 %v4335_v52, %v4314_v57 }
 0x310   : > { %v1805_v19 = vld [vmem:[#allocation6 + $0x1688] sm:$0xff]  ;;  %v1830_v62 = vld [vmem:[#allocation6 + $0x1750] sm:$0xff] }
 0x311   : > { %3340 = vmatpush1.bf16.msra.mxu0 %v3339_v35  ;;  %v1735_v35 = vld [vmem:[#allocation6 + $0x1458] sm:$0xff]  ;;  %v1821_v16 = vld [vmem:[#allocation6 + $0x1708] sm:$0xff]  ;;  %v1846_v11 = vld [vmem:[#allocation6 + $0x17d0] sm:$0xff]  ;;  %vm477_vm5 = vcmp.ge.f32.partialorder %v475_v12, 0.0 }
 0x312   : > { %3404 = vmatpush1.bf16.msra.mxu1 %v3403_v36  ;;  %3342 = vmatprep.subr.bf16.mxu0 %v3341_v43  ;;  %v3359_v36 = vpack.c.bf16 %v1716_v32, %v1708_v31  ;;  %v3423_v43 = vpack.c.bf16 %v1718_v40, %v1710_v39  ;;  %v3425_v48 = vpack.c.bf16 %v1735_v35, %v1727_v34  ;;  %v1788_v32 = vld [vmem:[#allocation6 + $0x1600] sm:$0xff]  ;;  %v1813_v34 = vld [vmem:[#allocation6 + $0x16c8] sm:$0xff]  ;;  %v1807_v35 = vld [vmem:[#allocation6 + $0x1698] sm:$0xff] }
 0x313   : > { %3406 = vmatprep.subr.bf16.mxu1 %v3405_v47  ;;  %v1726_v47 = vld [vmem:[#allocation6 + $0x1410] sm:$0xff]  ;;  %v3377_v31 = vpack.c.bf16 %v1797_v27, %v1789_v26  ;;  %v1796_v39 = vld [vmem:[#allocation6 + $0x1640] sm:$0xff]  ;;  %v1837_v63 = vld [vmem:[#allocation6 + $0x1788] sm:$0xff] }
 0x314   : > { %v1602_v27 = vld [vmem:[#allocation6 + $0x1030] sm:$0xff]  ;;  %v1625_v57 = vld [vmem:[#allocation6 + $0x10e8] sm:$0xff] }
 0x315   : > { %3344 = vmatpush1.bf16.msra.mxu0 %v3343_v49  ;;  %v1751_v49 = vld [vmem:[#allocation6 + $0x14d8] sm:$0xff] }
 0x316   : > { %3408 = vmatpush1.bf16.msra.mxu1 %v3407_v17  ;;  %3346 = vmatprep.subr.bf16.mxu0 %v3345_v41  ;;  %v3363_v17 = vpack.c.bf16 %v1732_v38, %v1724_v45  ;;  %v3427_v41 = vpack.c.bf16 %v1734_v51, %v1726_v47  ;;  %v3429_v59 = vpack.c.bf16 %v1751_v49, %v1743_v6  ;;  %v1804_v38 = vld [vmem:[#allocation6 + $0x1680] sm:$0xff]  ;;  %v1829_v6 = vld [vmem:[#allocation6 + $0x1748] sm:$0xff]  ;;  %v1823_v49 = vld [vmem:[#allocation6 + $0x1718] sm:$0xff] }
 0x317   : > { %3410 = vmatprep.subr.bf16.mxu1 %v3409_v58  ;;  %v1742_v58 = vld [vmem:[#allocation6 + $0x1490] sm:$0xff]  ;;  %v3381_v45 = vpack.c.bf16 %v1813_v34, %v1805_v19  ;;  %v1812_v47 = vld [vmem:[#allocation6 + $0x16c0] sm:$0xff] }
 0x318   : > { %v1626_v34 = vld [vmem:[#allocation6 + $0x10f0] sm:$0xff] }
 0x319   : > { %3348 = vmatpush1.bf16.msra.mxu0 %v3347_v1  ;;  %v1767_v1 = vld [vmem:[#allocation6 + $0x1558] sm:$0xff] }
 0x31a   : > { %3412 = vmatpush1.bf16.msra.mxu1 %v3411_v2  ;;  %3350 = vmatprep.subr.bf16.mxu0 %v3349_v5  ;;  %v3367_v2 = vpack.c.bf16 %v1748_v37, %v1740_v46  ;;  %v3431_v5 = vpack.c.bf16 %v1750_v61, %v1742_v58  ;;  %v3433_v9 = vpack.c.bf16 %v1767_v1, %v1759_v0  ;;  %v1820_v37 = vld [vmem:[#allocation6 + $0x1700] sm:$0xff]  ;;  %v1845_v0 = vld [vmem:[#allocation6 + $0x17c8] sm:$0xff]  ;;  %v1839_v1 = vld [vmem:[#allocation6 + $0x1798] sm:$0xff] }
 0x31b   : > { %3414 = vmatprep.subr.bf16.mxu1 %v3413_v8  ;;  %v1758_v8 = vld [vmem:[#allocation6 + $0x1510] sm:$0xff]  ;;  %v3385_v46 = vpack.c.bf16 %v1829_v6, %v1821_v16  ;;  %v1828_v58 = vld [vmem:[#allocation6 + $0x1740] sm:$0xff] }
 0x31c   : > { %v1634_v16 = vld [vmem:[#allocation6 + $0x1130] sm:$0xff] }
 0x31d   : > { %3352 = vmatpush1.bf16.msra.mxu0 %v3351_v3  ;;  %v1783_v3 = vld [vmem:[#allocation6 + $0x15d8] sm:$0xff] }
 0x31e   : > { %3416 = vmatpush1.bf16.msra.mxu1 %v3415_v14  ;;  %3354 = vmatprep.subr.bf16.mxu0 %v3353_v15  ;;  %v3371_v14 = vpack.c.bf16 %v1764_v53, %v1756_v7  ;;  %v3435_v15 = vpack.c.bf16 %v1766_v10, %v1758_v8  ;;  %v3437_v24 = vpack.c.bf16 %v1783_v3, %v1775_v13  ;;  %v1836_v53 = vld [vmem:[#allocation6 + $0x1780] sm:$0xff]  ;;  %v1601_v13 = vld [vmem:[#allocation6 + $0x1028] sm:$0xff] }
 0x31f   : > { %3418 = vmatprep.subr.bf16.mxu1 %v3417_v23  ;;  %v1774_v23 = vld [vmem:[#allocation6 + $0x1590] sm:$0xff]  ;;  %v3389_v7 = vpack.c.bf16 %v1845_v0, %v1837_v63  ;;  %v1844_v8 = vld [vmem:[#allocation6 + $0x17c0] sm:$0xff]  ;;  %v1609_v3 = vld [vmem:[#allocation6 + $0x1068] sm:$0xff] }
 0x320   : > { %v1650_v63 = vld [vmem:[#allocation6 + $0x11b0] sm:$0xff] }
 0x321   : > { %3356 = vmatpush1.bf16.msra.mxu0 %v3355_v29  ;;  %v1799_v29 = vld [vmem:[#allocation6 + $0x1658] sm:$0xff] }
 0x322   : > { %3420 = vmatpush1.bf16.msra.mxu1 %v3419_v30  ;;  %3358 = vmatprep.subr.bf16.mxu0 %v3357_v50  ;;  %v3375_v30 = vpack.c.bf16 %v1780_v22, %v1772_v21  ;;  %v3439_v50 = vpack.c.bf16 %v1782_v25, %v1774_v23  ;;  %v3441_v40 = vpack.c.bf16 %v1799_v29, %v1791_v28  ;;  %v1600_v23 = vld [vmem:[#allocation6 + $0x1020] sm:$0xff]  ;;  %v479_v25 = vmul.f32 0.2, %v475_v12  ;;  %v1610_v28 = vld [vmem:[#allocation6 + $0x1070] sm:$0xff]  ;;  %v1617_v29 = vld [vmem:[#allocation6 + $0x10a8] sm:$0xff] }
 0x323   : > { %3422 = vmatprep.subr.bf16.mxu1 %v3421_v33  ;;  %v1790_v33 = vld [vmem:[#allocation6 + $0x1610] sm:$0xff]  ;;  %v3457_v22 = vpack.c.bf16 %v1609_v3, %v1601_v13  ;;  %v3461_v19 = vpack.c.bf16 %v1625_v57, %v1617_v29  ;;  %v1681_v3 = vld [vmem:[#allocation6 + $0x12a8] sm:$0xff] }
 0x324   : > { %v1674_v13 = vld [vmem:[#allocation6 + $0x1270] sm:$0xff]  ;;  %v1697_v29 = vld [vmem:[#allocation6 + $0x1328] sm:$0xff] }
 0x325   : > { %3360 = vmatpush1.bf16.msra.mxu0 %v3359_v36  ;;  %v1815_v36 = vld [vmem:[#allocation6 + $0x16d8] sm:$0xff]  ;;  %v1705_v57 = vld [vmem:[#allocation6 + $0x1368] sm:$0xff] }
 0x326   : > { %3424 = vmatpush1.bf16.msra.mxu1 %v3423_v43  ;;  %3362 = vmatprep.subr.bf16.mxu0 %v3361_v44  ;;  %v3379_v43 = vpack.c.bf16 %v1796_v39, %v1788_v32  ;;  %v3443_v44 = vpack.c.bf16 %v1798_v60, %v1790_v33  ;;  %v3445_v51 = vpack.c.bf16 %v1815_v36, %v1807_v35  ;;  %v1616_v39 = vld [vmem:[#allocation6 + $0x10a0] sm:$0xff]  ;;  %v1633_v35 = vld [vmem:[#allocation6 + $0x1128] sm:$0xff] }
 0x327   : > { %3426 = vmatprep.subr.bf16.mxu1 %v3425_v48  ;;  %v1806_v48 = vld [vmem:[#allocation6 + $0x1690] sm:$0xff]  ;;  %v3523_v32 = vpack.c.bf16 %v1610_v28, %v1602_v27  ;;  %v1624_v33 = vld [vmem:[#allocation6 + $0x10e0] sm:$0xff]  ;;  %v4372_v60 = vsel %vm477_vm5, %v475_v12, %v479_v25  ;;  %v1641_v36 = vld [vmem:[#allocation6 + $0x1168] sm:$0xff] }
 0x328   : > { %v1688_v25 = vld [vmem:[#allocation6 + $0x12e0] sm:$0xff]  ;;  %v1690_v28 = vld [vmem:[#allocation6 + $0x12f0] sm:$0xff] }
 0x329   : > { %3364 = vmatpush1.bf16.msra.mxu0 %v3363_v17  ;;  %v1831_v17 = vld [vmem:[#allocation6 + $0x1758] sm:$0xff] }
 0x32a   : > { %3428 = vmatpush1.bf16.msra.mxu1 %v3427_v41  ;;  %3366 = vmatprep.subr.bf16.mxu0 %v3365_v20  ;;  %v3383_v41 = vpack.c.bf16 %v1812_v47, %v1804_v38  ;;  %v3447_v20 = vpack.c.bf16 %v1814_v4, %v1806_v48  ;;  %v3449_v61 = vpack.c.bf16 %v1831_v17, %v1823_v49  ;;  %v1640_v4 = vld [vmem:[#allocation6 + $0x1160] sm:$0xff]  ;;  %v1642_v49 = vld [vmem:[#allocation6 + $0x1170] sm:$0xff]  ;;  %v1649_v17 = vld [vmem:[#allocation6 + $0x11a8] sm:$0xff] }
 0x32b   : > { %3430 = vmatprep.subr.bf16.mxu1 %v3429_v59  ;;  %v1822_v59 = vld [vmem:[#allocation6 + $0x1710] sm:$0xff]  ;;  %v3463_v38 = vpack.c.bf16 %v1624_v33, %v1616_v39  ;;  %v3465_v48 = vpack.c.bf16 %v1641_v36, %v1633_v35  ;;  %v3481_v39 = vpack.c.bf16 %v1705_v57, %v1697_v29  ;;  %v1696_v33 = vld [vmem:[#allocation6 + $0x1320] sm:$0xff]  ;;  %v1713_v36 = vld [vmem:[#allocation6 + $0x13a8] sm:$0xff] }
 0x32c   : > { %v1706_v35 = vld [vmem:[#allocation6 + $0x1370] sm:$0xff]  ;;  %v1777_v29 = vld [vmem:[#allocation6 + $0x15a8] sm:$0xff] }
 0x32d   : > { %3368 = vmatpush1.bf16.msra.mxu0 %v3367_v2  ;;  %v1847_v2 = vld [vmem:[#allocation6 + $0x17d8] sm:$0xff]  ;;  %v1785_v57 = vld [vmem:[#allocation6 + $0x15e8] sm:$0xff] }
 0x32e   : > { %3432 = vmatpush1.bf16.msra.mxu1 %v3431_v5  ;;  %3370 = vmatprep.subr.bf16.mxu0 %v3369_v54  ;;  %v3387_v5 = vpack.c.bf16 %v1828_v58, %v1820_v37  ;;  %v3451_v54 = vpack.c.bf16 %v1830_v62, %v1822_v59  ;;  %v3453_v10 = vpack.c.bf16 %v1847_v2, %v1839_v1  ;;  %v1656_v62 = vld [vmem:[#allocation6 + $0x11e0] sm:$0xff]  ;;  %v1665_v1 = vld [vmem:[#allocation6 + $0x1228] sm:$0xff] }
 0x32f   : > { %3434 = vmatprep.subr.bf16.mxu1 %v3433_v9  ;;  %v1838_v9 = vld [vmem:[#allocation6 + $0x1790] sm:$0xff]  ;;  %v3531_v58 = vpack.c.bf16 %v1642_v49, %v1634_v16  ;;  %v1673_v2 = vld [vmem:[#allocation6 + $0x1268] sm:$0xff] }
 0x330   : > { %v3455_v21 = vpack.c.bf16 %v1846_v11, %v1838_v9  ;;  %v1664_v9 = vld [vmem:[#allocation6 + $0x1220] sm:$0xff]  ;;  %v1666_v11 = vld [vmem:[#allocation6 + $0x1230] sm:$0xff] }
 0x331   : > { %3372 = vmatpush1.bf16.msra.mxu0 %v3371_v14  ;;  %v1603_v14 = vld [vmem:[#allocation6 + $0x1038] sm:$0xff]  ;;  %v1714_v16 = vld [vmem:[#allocation6 + $0x13b0] sm:$0xff] }
 0x332   : > { %3436 = vmatpush1.bf16.msra.mxu1 %v3435_v15  ;;  %3374 = vmatprep.subr.bf16.mxu0 %v3373_v18  ;;  %v1611_v15 = vld [vmem:[#allocation6 + $0x1078] sm:$0xff]  ;;  %v3391_v18 = vpack.c.bf16 %v1844_v8, %v1836_v53  ;;  %v3473_v8 = vpack.c.bf16 %v1673_v2, %v1665_v1  ;;  %v1722_v49 = vld [vmem:[#allocation6 + $0x13f0] sm:$0xff]  ;;  %v1745_v1 = vld [vmem:[#allocation6 + $0x14a8] sm:$0xff] }
 0x333   : > { %3438 = vmatprep.subr.bf16.mxu1 %v3437_v24  ;;  %v1608_v24 = vld [vmem:[#allocation6 + $0x1060] sm:$0xff]  ;;  %v3521_v26 = vpack.c.bf16 %v1611_v15, %v1603_v14  ;;  %v1689_v14 = vld [vmem:[#allocation6 + $0x12e8] sm:$0xff]  ;;  %v1683_v15 = vld [vmem:[#allocation6 + $0x12b8] sm:$0xff] }
 0x334   : > { %v1753_v2 = vld [vmem:[#allocation6 + $0x14e8] sm:$0xff] }
 0x335   : > { %3376 = vmatpush1.bf16.msra.mxu0 %v3375_v30  ;;  %v3459_v30 = vpack.c.bf16 %v1608_v24, %v1600_v23  ;;  %v3477_v23 = vpack.c.bf16 %v1689_v14, %v1681_v3  ;;  %v1680_v24 = vld [vmem:[#allocation6 + $0x12a0] sm:$0xff]  ;;  %v1761_v3 = vld [vmem:[#allocation6 + $0x1528] sm:$0xff] }
 0x336   : > { %3440 = vmatpush1.bf16.msra.mxu1 %v3439_v50  ;;  %3378 = vmatprep.subr.bf16.mxu0 %v3377_v31  ;;  %v1619_v50 = vld [vmem:[#allocation6 + $0x10b8] sm:$0xff]  ;;  %v1769_v14 = vld [vmem:[#allocation6 + $0x1568] sm:$0xff] }
 0x337   : > { %3442 = vmatprep.subr.bf16.mxu1 %v3441_v40  ;;  %v1627_v31 = vld [vmem:[#allocation6 + $0x10f8] sm:$0xff]  ;;  %v1618_v40 = vld [vmem:[#allocation6 + $0x10b0] sm:$0xff] }
 0x338   : > { %v3527_v47 = vpack.c.bf16 %v1626_v34, %v1618_v40  ;;  %v1704_v40 = vld [vmem:[#allocation6 + $0x1360] sm:$0xff] }
 0x339   : > { %3380 = vmatpush1.bf16.msra.mxu0 %v3379_v43  ;;  %v3525_v43 = vpack.c.bf16 %v1627_v31, %v1619_v50  ;;  %v1707_v50 = vld [vmem:[#allocation6 + $0x1378] sm:$0xff]  ;;  %v3479_v31 = vpack.c.bf16 %v1688_v25, %v1680_v24  ;;  %v1760_v24 = vld [vmem:[#allocation6 + $0x1520] sm:$0xff] }
 0x33a   : > { %3444 = vmatpush1.bf16.msra.mxu1 %v3443_v44  ;;  %3382 = vmatprep.subr.bf16.mxu0 %v3381_v45  ;;  %v1635_v44 = vld [vmem:[#allocation6 + $0x1138] sm:$0xff]  ;;  %v1768_v25 = vld [vmem:[#allocation6 + $0x1560] sm:$0xff] }
 0x33b   : > { %3446 = vmatprep.subr.bf16.mxu1 %v3445_v51  ;;  %v1643_v45 = vld [vmem:[#allocation6 + $0x1178] sm:$0xff]  ;;  %v1632_v51 = vld [vmem:[#allocation6 + $0x1120] sm:$0xff] }
 0x33c   : > { %v3529_v6 = vpack.c.bf16 %v1643_v45, %v1635_v44  ;;  %v3467_v37 = vpack.c.bf16 %v1640_v4, %v1632_v51  ;;  %v1715_v44 = vld [vmem:[#allocation6 + $0x13b8] sm:$0xff]  ;;  %v1712_v51 = vld [vmem:[#allocation6 + $0x13a0] sm:$0xff] }
 0x33d   : > { %3384 = vmatpush1.bf16.msra.mxu0 %v3383_v41  ;;  %v1657_v41 = vld [vmem:[#allocation6 + $0x11e8] sm:$0xff]  ;;  %v1723_v45 = vld [vmem:[#allocation6 + $0x13f8] sm:$0xff]  ;;  %v1720_v4 = vld [vmem:[#allocation6 + $0x13e0] sm:$0xff] }
 0x33e   : > { %3448 = vmatpush1.bf16.msra.mxu1 %v3447_v20  ;;  %3386 = vmatprep.subr.bf16.mxu0 %v3385_v46  ;;  %v1651_v20 = vld [vmem:[#allocation6 + $0x11b8] sm:$0xff]  ;;  %v3469_v59 = vpack.c.bf16 %v1657_v41, %v1649_v17  ;;  %v1729_v17 = vld [vmem:[#allocation6 + $0x1428] sm:$0xff] }
 0x33f   : > { %3450 = vmatprep.subr.bf16.mxu1 %v3449_v61  ;;  %v1659_v46 = vld [vmem:[#allocation6 + $0x11f8] sm:$0xff]  ;;  %v1648_v61 = vld [vmem:[#allocation6 + $0x11a0] sm:$0xff]  ;;  %v1737_v41 = vld [vmem:[#allocation6 + $0x1468] sm:$0xff] }
 0x340   : > { %v3533_v0 = vpack.c.bf16 %v1659_v46, %v1651_v20  ;;  %v1731_v20 = vld [vmem:[#allocation6 + $0x1438] sm:$0xff] }
 0x341   : > { %3388 = vmatpush1.bf16.msra.mxu0 %v3387_v5  ;;  %v1667_v5 = vld [vmem:[#allocation6 + $0x1238] sm:$0xff] }
 0x342   : > { %3452 = vmatpush1.bf16.msra.mxu1 %v3451_v54  ;;  %3390 = vmatprep.subr.bf16.mxu0 %v3389_v7  ;;  %v1675_v54 = vld [vmem:[#allocation6 + $0x1278] sm:$0xff]  ;;  %v3471_v7 = vpack.c.bf16 %v1656_v62, %v1648_v61  ;;  %v1728_v61 = vld [vmem:[#allocation6 + $0x1420] sm:$0xff] }
 0x343   : > { %3454 = vmatprep.subr.bf16.mxu1 %v3453_v10  ;;  %v1672_v10 = vld [vmem:[#allocation6 + $0x1260] sm:$0xff]  ;;  %v3537_v12 = vpack.c.bf16 %v1675_v54, %v1667_v5  ;;  %v1739_v46 = vld [vmem:[#allocation6 + $0x1478] sm:$0xff] }
 0x344   : > { %v1736_v62 = vld [vmem:[#allocation6 + $0x1460] sm:$0xff]  ;;  %v1747_v5 = vld [vmem:[#allocation6 + $0x14b8] sm:$0xff] }
 0x345   : > { %3392 = vmatpush1.bf16.msra.mxu0 %v3391_v18  ;;  %v1691_v18 = vld [vmem:[#allocation6 + $0x12f8] sm:$0xff] }
 0x346   : > { %3456 = vmatpush1.bf16.msra.mxu1 %v3455_v21  ;;  %3458 = vmatprep.subr.bf16.mxu0 %v3457_v22  ;;  %v3475_v21 = vpack.c.bf16 %v1672_v10, %v1664_v9  ;;  %v3539_v22 = vpack.c.bf16 %v1674_v13, %v1666_v11  ;;  %v3541_v27 = vpack.c.bf16 %v1691_v18, %v1683_v15  ;;  %v1755_v54 = vld [vmem:[#allocation6 + $0x14f8] sm:$0xff]  ;;  %v1744_v9 = vld [vmem:[#allocation6 + $0x14a0] sm:$0xff]  ;;  %v1746_v11 = vld [vmem:[#allocation6 + $0x14b0] sm:$0xff] }
 0x347   : > { %3522 = vmatprep.subr.bf16.mxu1 %v3521_v26  ;;  %v1682_v26 = vld [vmem:[#allocation6 + $0x12b0] sm:$0xff]  ;;  %v1752_v10 = vld [vmem:[#allocation6 + $0x14e0] sm:$0xff]  ;;  %v1763_v15 = vld [vmem:[#allocation6 + $0x1538] sm:$0xff] }
 0x348   : > { %1917 = vmatmul.mubr.f32.vlgmr.msra.gmra.mrb[0].mxu0 %v4372_v60  ;;  %v1754_v13 = vld [vmem:[#allocation6 + $0x14f0] sm:$0xff]  ;;  %v1771_v18 = vld [vmem:[#allocation6 + $0x1578] sm:$0xff] }
 0x349   : > { %1988 = vmatmul.mubr.f32.vlgmr.msra.gmra.mrb[0].mxu1 %v4372_v60  ;;  %3460 = vmatpush1.bf16.msra.mxu0 %v3459_v30  ;;  %v1699_v30 = vld [vmem:[#allocation6 + $0x1338] sm:$0xff] }
 0x34a   : > { %2058 = vmatprep.mubr.f32.mxu0 %v4366_v42  ;;  %3524 = vmatpush1.bf16.msra.mxu1 %v3523_v32  ;;  %v3543_v32 = vpack.c.bf16 %v1690_v28, %v1682_v26  ;;  %v3545_v34 = vpack.c.bf16 %v1707_v50, %v1699_v30  ;;  %v1762_v26 = vld [vmem:[#allocation6 + $0x1530] sm:$0xff]  ;;  %v1779_v30 = vld [vmem:[#allocation6 + $0x15b8] sm:$0xff] }
 0x34b   : > { %2129 = vmatprep.mubr.f32.mxu1 %v4366_v42  ;;  %3462 = vmatprep.subr.bf16.mxu0 %v3461_v19  ;;  %v1658_v42 = vld [vmem:[#allocation6 + $0x11f0] sm:$0xff]  ;;  %v1787_v50 = vld [vmem:[#allocation6 + $0x15f8] sm:$0xff] }
 0x34c   : > { %3526 = vmatprep.subr.bf16.mxu1 %v3525_v43  ;;  %v3535_v53 = vpack.c.bf16 %v1658_v42, %v1650_v63  ;;  %v1698_v19 = vld [vmem:[#allocation6 + $0x1330] sm:$0xff]  ;;  %v1721_v43 = vld [vmem:[#allocation6 + $0x13e8] sm:$0xff] }
 0x34d   : > { %3464 = vmatpush1.bf16.msra.mxu0 %v3463_v38  ;;  %v3483_v38 = vpack.c.bf16 %v1704_v40, %v1696_v33  ;;  %v1730_v63 = vld [vmem:[#allocation6 + $0x1430] sm:$0xff]  ;;  %v1776_v33 = vld [vmem:[#allocation6 + $0x15a0] sm:$0xff] }
 0x34e   : > { %3528 = vmatpush1.bf16.msra.mxu1 %v3527_v47  ;;  %3466 = vmatprep.subr.bf16.mxu0 %v3465_v48  ;;  %v3547_v47 = vpack.c.bf16 %v1706_v35, %v1698_v19  ;;  %v3485_v48 = vpack.c.bf16 %v1721_v43, %v1713_v36  ;;  %v1738_v42 = vld [vmem:[#allocation6 + $0x1470] sm:$0xff]  ;;  %v1784_v40 = vld [vmem:[#allocation6 + $0x15e0] sm:$0xff]  ;;  %v1793_v36 = vld [vmem:[#allocation6 + $0x1628] sm:$0xff] }
 0x34f   : > { %3530 = vmatprep.subr.bf16.mxu1 %v3529_v6  ;;  %v3549_v6 = vpack.c.bf16 %v1723_v45, %v1715_v44  ;;  %v1770_v28 = vld [vmem:[#allocation6 + $0x1570] sm:$0xff]  ;;  %v1801_v43 = vld [vmem:[#allocation6 + $0x1668] sm:$0xff]  ;;  %v1795_v44 = vld [vmem:[#allocation6 + $0x1638] sm:$0xff] }
 0x350   : > { %v1778_v19 = vld [vmem:[#allocation6 + $0x15b0] sm:$0xff]  ;;  %v1803_v45 = vld [vmem:[#allocation6 + $0x1678] sm:$0xff] }
 0x351   : > { %3468 = vmatpush1.bf16.msra.mxu0 %v3467_v37  ;;  %v3487_v37 = vpack.c.bf16 %v1720_v4, %v1712_v51  ;;  %v1786_v35 = vld [vmem:[#allocation6 + $0x15f0] sm:$0xff]  ;;  %v1792_v51 = vld [vmem:[#allocation6 + $0x1620] sm:$0xff] }
 0x352   : > { %3532 = vmatpush1.bf16.msra.mxu1 %v3531_v58  ;;  %3470 = vmatprep.subr.bf16.mxu0 %v3469_v59  ;;  %v3551_v58 = vpack.c.bf16 %v1722_v49, %v1714_v16  ;;  %v3489_v59 = vpack.c.bf16 %v1737_v41, %v1729_v17  ;;  %v1800_v4 = vld [vmem:[#allocation6 + $0x1660] sm:$0xff]  ;;  %v1794_v16 = vld [vmem:[#allocation6 + $0x1630] sm:$0xff]  ;;  %v1809_v17 = vld [vmem:[#allocation6 + $0x16a8] sm:$0xff] }
 0x353   : > { %3534 = vmatprep.subr.bf16.mxu1 %v3533_v0  ;;  %v3553_v0 = vpack.c.bf16 %v1739_v46, %v1731_v20  ;;  %v1802_v49 = vld [vmem:[#allocation6 + $0x1670] sm:$0xff]  ;;  %v1817_v41 = vld [vmem:[#allocation6 + $0x16e8] sm:$0xff]  ;;  %v1811_v20 = vld [vmem:[#allocation6 + $0x16b8] sm:$0xff] }
 0x354   : > { %v1819_v46 = vld [vmem:[#allocation6 + $0x16f8] sm:$0xff] }
 0x355   : > { %3472 = vmatpush1.bf16.msra.mxu0 %v3471_v7  ;;  %v3491_v7 = vpack.c.bf16 %v1736_v62, %v1728_v61  ;;  %v1808_v61 = vld [vmem:[#allocation6 + $0x16a0] sm:$0xff] }
 0x356   : > { %3536 = vmatpush1.bf16.msra.mxu1 %v3535_v53  ;;  %3474 = vmatprep.subr.bf16.mxu0 %v3473_v8  ;;  %v3555_v53 = vpack.c.bf16 %v1738_v42, %v1730_v63  ;;  %v3493_v8 = vpack.c.bf16 %v1753_v2, %v1745_v1  ;;  %v1816_v62 = vld [vmem:[#allocation6 + $0x16e0] sm:$0xff]  ;;  %v1810_v63 = vld [vmem:[#allocation6 + $0x16b0] sm:$0xff]  ;;  %v1825_v1 = vld [vmem:[#allocation6 + $0x1728] sm:$0xff] }
 0x357   : > { %3538 = vmatprep.subr.bf16.mxu1 %v3537_v12  ;;  %v3557_v12 = vpack.c.bf16 %v1755_v54, %v1747_v5  ;;  %v1818_v42 = vld [vmem:[#allocation6 + $0x16f0] sm:$0xff]  ;;  %v1833_v2 = vld [vmem:[#allocation6 + $0x1768] sm:$0xff]  ;;  %v1827_v5 = vld [vmem:[#allocation6 + $0x1738] sm:$0xff] }
 0x358   : > { %v1835_v54 = vld [vmem:[#allocation6 + $0x1778] sm:$0xff] }
 0x359   : > { %3476 = vmatpush1.bf16.msra.mxu0 %v3475_v21  ;;  %v3495_v21 = vpack.c.bf16 %v1752_v10, %v1744_v9  ;;  %v1824_v9 = vld [vmem:[#allocation6 + $0x1720] sm:$0xff] }
 0x35a   : > { %3540 = vmatpush1.bf16.msra.mxu1 %v3539_v22  ;;  %3478 = vmatprep.subr.bf16.mxu0 %v3477_v23  ;;  %v3559_v22 = vpack.c.bf16 %v1754_v13, %v1746_v11  ;;  %v3497_v23 = vpack.c.bf16 %v1769_v14, %v1761_v3  ;;  %v1832_v10 = vld [vmem:[#allocation6 + $0x1760] sm:$0xff]  ;;  %v1826_v11 = vld [vmem:[#allocation6 + $0x1730] sm:$0xff]  ;;  %v1841_v3 = vld [vmem:[#allocation6 + $0x17a8] sm:$0xff] }
 0x35b   : > { %3542 = vmatprep.subr.bf16.mxu1 %v3541_v27  ;;  %v3561_v27 = vpack.c.bf16 %v1771_v18, %v1763_v15  ;;  %v1834_v13 = vld [vmem:[#allocation6 + $0x1770] sm:$0xff]  ;;  %v1849_v14 = vld [vmem:[#allocation6 + $0x17e8] sm:$0xff]  ;;  %v1843_v15 = vld [vmem:[#allocation6 + $0x17b8] sm:$0xff] }
 0x35c   : > { %v1851_v18 = vld [vmem:[#allocation6 + $0x17f8] sm:$0xff] }
 0x35d   : > { %3480 = vmatpush1.bf16.msra.mxu0 %v3479_v31  ;;  %v3499_v31 = vpack.c.bf16 %v1768_v25, %v1760_v24  ;;  %v1840_v24 = vld [vmem:[#allocation6 + $0x17a0] sm:$0xff] }
 0x35e   : > { %3544 = vmatpush1.bf16.msra.mxu1 %v3543_v32  ;;  %3482 = vmatprep.subr.bf16.mxu0 %v3481_v39  ;;  %v3563_v32 = vpack.c.bf16 %v1770_v28, %v1762_v26  ;;  %v3501_v39 = vpack.c.bf16 %v1785_v57, %v1777_v29  ;;  %v1848_v25 = vld [vmem:[#allocation6 + $0x17e0] sm:$0xff]  ;;  %v1842_v26 = vld [vmem:[#allocation6 + $0x17b0] sm:$0xff]  ;;  %v2146_v29 = vld [vmem:[#allocation6 + $0x1808] sm:$0xff] }
 0x35f   : > { %3546 = vmatprep.subr.bf16.mxu1 %v3545_v34  ;;  %v3565_v34 = vpack.c.bf16 %v1787_v50, %v1779_v30  ;;  %v1850_v28 = vld [vmem:[#allocation6 + $0x17f0] sm:$0xff]  ;;  %v2154_v57 = vld [vmem:[#allocation6 + $0x1848] sm:$0xff]  ;;  %v2148_v30 = vld [vmem:[#allocation6 + $0x1818] sm:$0xff] }
 0x360   : > { %v2156_v50 = vld [vmem:[#allocation6 + $0x1858] sm:$0xff] }
 0x361   : > { %3484 = vmatpush1.bf16.msra.mxu0 %v3483_v38  ;;  %v3503_v38 = vpack.c.bf16 %v1784_v40, %v1776_v33  ;;  %v3585_v33 = vpack.c.bf16 %v2154_v57, %v2146_v29  ;;  %v2145_v40 = vld [vmem:[#allocation6 + $0x1800] sm:$0xff]  ;;  %v2219_v29 = vld [vmem:[#allocation6 + $0x1a50] sm:$0xff]  ;;  %v2226_v57 = vld [vmem:[#allocation6 + $0x1a88] sm:$0xff] }
 0x362   : > { %3548 = vmatpush1.bf16.msra.mxu1 %v3547_v47  ;;  %3486 = vmatprep.subr.bf16.mxu0 %v3485_v48  ;;  %v3567_v47 = vpack.c.bf16 %v1786_v35, %v1778_v19  ;;  %v3505_v48 = vpack.c.bf16 %v1801_v43, %v1793_v36  ;;  %v2153_v19 = vld [vmem:[#allocation6 + $0x1840] sm:$0xff]  ;;  %v2147_v35 = vld [vmem:[#allocation6 + $0x1810] sm:$0xff]  ;;  %v2162_v43 = vld [vmem:[#allocation6 + $0x1888] sm:$0xff] }
 0x363   : > { %3550 = vmatprep.subr.bf16.mxu1 %v3549_v6  ;;  %v3569_v6 = vpack.c.bf16 %v1803_v45, %v1795_v44  ;;  %v2155_v36 = vld [vmem:[#allocation6 + $0x1850] sm:$0xff]  ;;  %v2170_v44 = vld [vmem:[#allocation6 + $0x18c8] sm:$0xff]  ;;  %v3587_v45 = vpack.c.bf16 %v2153_v19, %v2145_v40  ;;  %v2225_v40 = vld [vmem:[#allocation6 + $0x1a80] sm:$0xff] }
 0x364   : > { %v2233_v19 = vld [vmem:[#allocation6 + $0x1ac0] sm:$0xff] }
 0x365   : > { %3488 = vmatpush1.bf16.msra.mxu0 %v3487_v37  ;;  %v3507_v37 = vpack.c.bf16 %v1800_v4, %v1792_v51  ;;  %v2161_v51 = vld [vmem:[#allocation6 + $0x1880] sm:$0xff] }
 0x366   : > { %3552 = vmatpush1.bf16.msra.mxu1 %v3551_v58  ;;  %3490 = vmatprep.subr.bf16.mxu0 %v3489_v59  ;;  %v3571_v58 = vpack.c.bf16 %v1802_v49, %v1794_v16  ;;  %v3509_v59 = vpack.c.bf16 %v1817_v41, %v1809_v17  ;;  %v2169_v4 = vld [vmem:[#allocation6 + $0x18c0] sm:$0xff]  ;;  %v2163_v16 = vld [vmem:[#allocation6 + $0x1890] sm:$0xff]  ;;  %v2178_v17 = vld [vmem:[#allocation6 + $0x1908] sm:$0xff] }
 0x367   : > { %3554 = vmatprep.subr.bf16.mxu1 %v3553_v0  ;;  %v3573_v0 = vpack.c.bf16 %v1819_v46, %v1811_v20  ;;  %v2171_v49 = vld [vmem:[#allocation6 + $0x18d0] sm:$0xff]  ;;  %v2186_v41 = vld [vmem:[#allocation6 + $0x1948] sm:$0xff]  ;;  %v2180_v46 = vld [vmem:[#allocation6 + $0x1918] sm:$0xff] }
 0x369   : > { %3492 = vmatpush1.bf16.msra.mxu0 %v3491_v7  ;;  %v3511_v7 = vpack.c.bf16 %v1816_v62, %v1808_v61  ;;  %v3655_v61 = vpack.c.bf16 %v2171_v49, %v2163_v16  ;;  %v3593_v62 = vpack.c.bf16 %v2186_v41, %v2178_v17  ;;  %v2243_v16 = vld [vmem:[#allocation6 + $0x1b10] sm:$0xff]  ;;  %v2258_v17 = vld [vmem:[#allocation6 + $0x1b88] sm:$0xff] }
 0x36a   : > { %3556 = vmatpush1.bf16.msra.mxu1 %v3555_v53  ;;  %3494 = vmatprep.subr.bf16.mxu0 %v3493_v8  ;;  %v3575_v53 = vpack.c.bf16 %v1818_v42, %v1810_v63  ;;  %v3513_v8 = vpack.c.bf16 %v1833_v2, %v1825_v1  ;;  %v2177_v63 = vld [vmem:[#allocation6 + $0x1900] sm:$0xff]  ;;  %v2179_v42 = vld [vmem:[#allocation6 + $0x1910] sm:$0xff]  ;;  %v2266_v41 = vld [vmem:[#allocation6 + $0x1bc8] sm:$0xff] }
 0x36b   : > { %3558 = vmatprep.subr.bf16.mxu1 %v3557_v12  ;;  %v3577_v12 = vpack.c.bf16 %v1835_v54, %v1827_v5  ;;  %v2187_v2 = vld [vmem:[#allocation6 + $0x1950] sm:$0xff]  ;;  %v2194_v5 = vld [vmem:[#allocation6 + $0x1988] sm:$0xff]  ;;  %v2196_v54 = vld [vmem:[#allocation6 + $0x1998] sm:$0xff] }
 0x36c   : > { %v2251_v49 = vld [vmem:[#allocation6 + $0x1b50] sm:$0xff] }
 0x36d   : > { %3496 = vmatpush1.bf16.msra.mxu0 %v3495_v21  ;;  %v3515_v21 = vpack.c.bf16 %v1832_v10, %v1824_v9  ;;  %v2193_v10 = vld [vmem:[#allocation6 + $0x1980] sm:$0xff] }
 0x36e   : > { %3560 = vmatpush1.bf16.msra.mxu1 %v3559_v22  ;;  %3498 = vmatprep.subr.bf16.mxu0 %v3497_v23  ;;  %v3579_v22 = vpack.c.bf16 %v1834_v13, %v1826_v11  ;;  %v3517_v23 = vpack.c.bf16 %v1849_v14, %v1841_v3  ;;  %v2201_v11 = vld [vmem:[#allocation6 + $0x19c0] sm:$0xff]  ;;  %v2203_v3 = vld [vmem:[#allocation6 + $0x19d0] sm:$0xff]  ;;  %v2210_v14 = vld [vmem:[#allocation6 + $0x1a08] sm:$0xff] }
 0x36f   : > { %3562 = vmatprep.subr.bf16.mxu1 %v3561_v27  ;;  %v3581_v27 = vpack.c.bf16 %v1851_v18, %v1843_v15  ;;  %v2218_v15 = vld [vmem:[#allocation6 + $0x1a48] sm:$0xff]  ;;  %v2212_v18 = vld [vmem:[#allocation6 + $0x1a18] sm:$0xff] }
 0x371   : > { %3500 = vmatpush1.bf16.msra.mxu0 %v3499_v31  ;;  %v3519_v31 = vpack.c.bf16 %v1848_v25, %v1840_v24  ;;  %v3601_v24 = vpack.c.bf16 %v2218_v15, %v2210_v14  ;;  %v2209_v25 = vld [vmem:[#allocation6 + $0x1a00] sm:$0xff]  ;;  %v2298_v14 = vld [vmem:[#allocation6 + $0x1cc8] sm:$0xff]  ;;  %v2292_v15 = vld [vmem:[#allocation6 + $0x1c98] sm:$0xff] }
 0x372   : > { %3564 = vmatpush1.bf16.msra.mxu1 %v3563_v32  ;;  %3502 = vmatprep.subr.bf16.mxu0 %v3501_v39  ;;  %v487_v32 = vmul.f32 %v4335_v52, %v4311_v56  ;;  %v3583_v39 = vpack.c.bf16 %v1850_v28, %v1842_v26  ;;  %v3651_v56 = vpack.c.bf16 %v2155_v36, %v2147_v35  ;;  %v2217_v26 = vld [vmem:[#allocation6 + $0x1a40] sm:$0xff]  ;;  %v2235_v36 = vld [vmem:[#allocation6 + $0x1ad0] sm:$0xff] }
 0x373   : > { %3566 = vmatprep.subr.bf16.mxu1 %v3565_v34  ;;  %v3649_v34 = vpack.c.bf16 %v2156_v50, %v2148_v30  ;;  %v2234_v30 = vld [vmem:[#allocation6 + $0x1ac8] sm:$0xff]  ;;  %v2228_v50 = vld [vmem:[#allocation6 + $0x1a98] sm:$0xff] }
 0x374   : > { %vm489_vm6 = vcmp.ge.f32.partialorder %v487_v32, 0.0 }
 0x375   : > { %3504 = vmatpush1.bf16.msra.mxu0 %v3503_v38  ;;  %v491_v38 = vmul.f32 0.2, %v487_v32 }
 0x376   : > { %3568 = vmatpush1.bf16.msra.mxu1 %v3567_v47  ;;  %3506 = vmatprep.subr.bf16.mxu0 %v3505_v48  ;;  %v2164_v47 = vld [vmem:[#allocation6 + $0x1898] sm:$0xff] }
 0x377   : > { %3570 = vmatprep.subr.bf16.mxu1 %v3569_v6  ;;  %v2172_v48 = vld [vmem:[#allocation6 + $0x18d8] sm:$0xff]  ;;  %v3589_v6 = vpack.c.bf16 %v2170_v44, %v2162_v43  ;;  %v2242_v43 = vld [vmem:[#allocation6 + $0x1b08] sm:$0xff] }
 0x378   : > { %v3653_v20 = vpack.c.bf16 %v2172_v48, %v2164_v47  ;;  %v2250_v44 = vld [vmem:[#allocation6 + $0x1b48] sm:$0xff]  ;;  %v3607_v47 = vpack.c.bf16 %v2233_v19, %v2225_v40  ;;  %v2313_v40 = vld [vmem:[#allocation6 + $0x1d40] sm:$0xff]  ;;  %v2307_v19 = vld [vmem:[#allocation6 + $0x1d10] sm:$0xff] }
 0x379   : > { %3508 = vmatpush1.bf16.msra.mxu0 %v3507_v37  ;;  %v2188_v37 = vld [vmem:[#allocation6 + $0x1958] sm:$0xff] }
 0x37a   : > { %3572 = vmatpush1.bf16.msra.mxu1 %v3571_v58  ;;  %3510 = vmatprep.subr.bf16.mxu0 %v3509_v59  ;;  %v4383_v58 = vsel %vm489_vm6, %v487_v32, %v491_v38  ;;  %v3591_v59 = vpack.c.bf16 %v2169_v4, %v2161_v51  ;;  %v3657_v1 = vpack.c.bf16 %v2188_v37, %v2180_v46  ;;  %v2252_v38 = vld [vmem:[#allocation6 + $0x1b58] sm:$0xff]  ;;  %v2241_v51 = vld [vmem:[#allocation6 + $0x1b00] sm:$0xff] }
 0x37b   : > { %3574 = vmatprep.subr.bf16.mxu1 %v3573_v0  ;;  %v2185_v0 = vld [vmem:[#allocation6 + $0x1940] sm:$0xff]  ;;  %v3603_v32 = vpack.c.bf16 %v2217_v26, %v2209_v25  ;;  %v2268_v46 = vld [vmem:[#allocation6 + $0x1bd8] sm:$0xff]  ;;  %v2291_v26 = vld [vmem:[#allocation6 + $0x1c90] sm:$0xff] }
 0x37c   : > { %v2249_v4 = vld [vmem:[#allocation6 + $0x1b40] sm:$0xff] }
 0x37d   : > { %3512 = vmatpush1.bf16.msra.mxu0 %v3511_v7  ;;  %v2204_v7 = vld [vmem:[#allocation6 + $0x19d8] sm:$0xff]  ;;  %v3611_v37 = vpack.c.bf16 %v2249_v4, %v2241_v51  ;;  %v2297_v25 = vld [vmem:[#allocation6 + $0x1cc0] sm:$0xff]  ;;  %v2323_v4 = vld [vmem:[#allocation6 + $0x1d90] sm:$0xff] }
 0x37e   : > { %3576 = vmatpush1.bf16.msra.mxu1 %v3575_v53  ;;  %3514 = vmatprep.subr.bf16.mxu0 %v3513_v8  ;;  %v3595_v53 = vpack.c.bf16 %v2185_v0, %v2177_v63  ;;  %v3659_v8 = vpack.c.bf16 %v2187_v2, %v2179_v42  ;;  %v3661_v13 = vpack.c.bf16 %v2204_v7, %v2196_v54  ;;  %v2265_v63 = vld [vmem:[#allocation6 + $0x1bc0] sm:$0xff]  ;;  %v2259_v0 = vld [vmem:[#allocation6 + $0x1b90] sm:$0xff]  ;;  %v2274_v2 = vld [vmem:[#allocation6 + $0x1c08] sm:$0xff] }
 0x37f   : > { %3578 = vmatprep.subr.bf16.mxu1 %v3577_v12  ;;  %v2195_v12 = vld [vmem:[#allocation6 + $0x1990] sm:$0xff]  ;;  %v2284_v54 = vld [vmem:[#allocation6 + $0x1c58] sm:$0xff]  ;;  %v2329_v51 = vld [vmem:[#allocation6 + $0x1dc0] sm:$0xff] }
 0x381   : > { %3516 = vmatpush1.bf16.msra.mxu0 %v3515_v21  ;;  %v2220_v21 = vld [vmem:[#allocation6 + $0x1a58] sm:$0xff] }
 0x382   : > { %3580 = vmatpush1.bf16.msra.mxu1 %v3579_v22  ;;  %3518 = vmatprep.subr.bf16.mxu0 %v3517_v23  ;;  %v3599_v22 = vpack.c.bf16 %v2201_v11, %v2193_v10  ;;  %v3663_v23 = vpack.c.bf16 %v2203_v3, %v2195_v12  ;;  %v3665_v28 = vpack.c.bf16 %v2220_v21, %v2212_v18  ;;  %v2281_v10 = vld [vmem:[#allocation6 + $0x1c40] sm:$0xff]  ;;  %v2275_v11 = vld [vmem:[#allocation6 + $0x1c10] sm:$0xff]  ;;  %v2290_v3 = vld [vmem:[#allocation6 + $0x1c88] sm:$0xff] }
 0x383   : > { %3582 = vmatprep.subr.bf16.mxu1 %v3581_v27  ;;  %v2211_v27 = vld [vmem:[#allocation6 + $0x1a10] sm:$0xff]  ;;  %v2300_v18 = vld [vmem:[#allocation6 + $0x1cd8] sm:$0xff] }
 0x385   : > { %3520 = vmatpush1.bf16.msra.mxu0 %v3519_v31  ;;  %v2236_v31 = vld [vmem:[#allocation6 + $0x1ad8] sm:$0xff] }
 0x386   : > { %3584 = vmatpush1.bf16.msra.mxu1 %v3583_v39  ;;  %3586 = vmatprep.subr.bf16.mxu0 %v3585_v33  ;;  %v3667_v39 = vpack.c.bf16 %v2219_v29, %v2211_v27  ;;  %v3605_v33 = vpack.c.bf16 %v2234_v30, %v2226_v57  ;;  %v3669_v35 = vpack.c.bf16 %v2236_v31, %v2228_v50  ;;  %v2306_v29 = vld [vmem:[#allocation6 + $0x1d08] sm:$0xff]  ;;  %v2308_v30 = vld [vmem:[#allocation6 + $0x1d18] sm:$0xff] }
 0x387   : > { %3650 = vmatprep.subr.bf16.mxu1 %v3649_v34  ;;  %v2227_v34 = vld [vmem:[#allocation6 + $0x1a90] sm:$0xff]  ;;  %v3685_v27 = vpack.c.bf16 %v2300_v18, %v2292_v15  ;;  %v2314_v57 = vld [vmem:[#allocation6 + $0x1d48] sm:$0xff]  ;;  %v2316_v50 = vld [vmem:[#allocation6 + $0x1d58] sm:$0xff] }
 0x388   : > { %2059 = vmatmul.mubr.f32.vlgmr.msra.gmra.mrb[2].mxu0 %v4372_v60  ;;  %v3671_v48 = vpack.c.bf16 %v2235_v36, %v2227_v34  ;;  %v3689_v34 = vpack.c.bf16 %v2316_v50, %v2308_v30  ;;  %v2322_v36 = vld [vmem:[#allocation6 + $0x1d88] sm:$0xff]  ;;  %v2380_v15 = vld [vmem:[#allocation6 + $0x1f58] sm:$0xff] }
 0x389   : > { %2130 = vmatmul.mubr.f32.vlgmr.msra.gmra.mrb[2].mxu1 %v4372_v60  ;;  %3588 = vmatpush1.bf16.msra.mxu0 %v3587_v45  ;;  %v2202_v60 = vld [vmem:[#allocation6 + $0x19c8] sm:$0xff]  ;;  %v2244_v45 = vld [vmem:[#allocation6 + $0x1b18] sm:$0xff] }
 0x38a   : > { %2465 = vmatprep.mubr.f32.mxu0 %v4383_v58  ;;  %3652 = vmatpush1.bf16.msra.mxu1 %v3651_v56  ;;  %v3597_v9 = vpack.c.bf16 %v2202_v60, %v2194_v5  ;;  %v3609_v56 = vpack.c.bf16 %v2250_v44, %v2242_v43  ;;  %v2282_v5 = vld [vmem:[#allocation6 + $0x1c48] sm:$0xff]  ;;  %v2276_v60 = vld [vmem:[#allocation6 + $0x1c18] sm:$0xff] }
 0x38b   : > { %2536 = vmatprep.mubr.f32.mxu1 %v4383_v58  ;;  %3590 = vmatprep.subr.bf16.mxu0 %v3589_v6  ;;  %v3673_v6 = vpack.c.bf16 %v2252_v38, %v2244_v45  ;;  %v3681_v12 = vpack.c.bf16 %v2284_v54, %v2276_v60  ;;  %v2330_v43 = vld [vmem:[#allocation6 + $0x1dc8] sm:$0xff]  ;;  %v2324_v44 = vld [vmem:[#allocation6 + $0x1d98] sm:$0xff] }
 0x38c   : > { %3654 = vmatprep.subr.bf16.mxu1 %v3653_v20  ;;  %v2260_v20 = vld [vmem:[#allocation6 + $0x1b98] sm:$0xff] }
 0x38d   : > { %3592 = vmatpush1.bf16.msra.mxu0 %v3591_v59  ;;  %v3675_v59 = vpack.c.bf16 %v2251_v49, %v2243_v16  ;;  %v3677_v42 = vpack.c.bf16 %v2268_v46, %v2260_v20  ;;  %v2332_v45 = vld [vmem:[#allocation6 + $0x1dd8] sm:$0xff]  ;;  %v2338_v49 = vld [vmem:[#allocation6 + $0x1e08] sm:$0xff] }
 0x38e   : > { %3656 = vmatpush1.bf16.msra.mxu1 %v3655_v61  ;;  %3594 = vmatprep.subr.bf16.mxu0 %v3593_v62  ;;  %v3613_v61 = vpack.c.bf16 %v2266_v41, %v2258_v17  ;;  %v2257_v62 = vld [vmem:[#allocation6 + $0x1b80] sm:$0xff]  ;;  %v3693_v16 = vpack.c.bf16 %v2332_v45, %v2324_v44  ;;  %v2346_v17 = vld [vmem:[#allocation6 + $0x1e48] sm:$0xff]  ;;  %v2340_v41 = vld [vmem:[#allocation6 + $0x1e18] sm:$0xff] }
 0x38f   : > { %3658 = vmatprep.subr.bf16.mxu1 %v3657_v1  ;;  %v2267_v1 = vld [vmem:[#allocation6 + $0x1bd0] sm:$0xff]  ;;  %v3615_v7 = vpack.c.bf16 %v2265_v63, %v2257_v62  ;;  %v2348_v20 = vld [vmem:[#allocation6 + $0x1e58] sm:$0xff]  ;;  %v2345_v62 = vld [vmem:[#allocation6 + $0x1e40] sm:$0xff] }
 0x390   : > { %v2339_v63 = vld [vmem:[#allocation6 + $0x1e10] sm:$0xff]  ;;  %v2364_v60 = vld [vmem:[#allocation6 + $0x1ed8] sm:$0xff] }
 0x391   : > { %3596 = vmatpush1.bf16.msra.mxu0 %v3595_v53  ;;  %v3679_v53 = vpack.c.bf16 %v2267_v1, %v2259_v0  ;;  %v3697_v0 = vpack.c.bf16 %v2348_v20, %v2340_v41  ;;  %v2354_v1 = vld [vmem:[#allocation6 + $0x1e88] sm:$0xff]  ;;  %v2396_v30 = vld [vmem:[#allocation6 + $0x1fd8] sm:$0xff] }
 0x392   : > { %3660 = vmatpush1.bf16.msra.mxu1 %v3659_v8  ;;  %3598 = vmatprep.subr.bf16.mxu0 %v3597_v9  ;;  %v3617_v8 = vpack.c.bf16 %v2282_v5, %v2274_v2  ;;  %v2273_v9 = vld [vmem:[#allocation6 + $0x1c00] sm:$0xff]  ;;  %v2362_v2 = vld [vmem:[#allocation6 + $0x1ec8] sm:$0xff]  ;;  %v2356_v5 = vld [vmem:[#allocation6 + $0x1e98] sm:$0xff] }
 0x393   : > { %3662 = vmatprep.subr.bf16.mxu1 %v3661_v13  ;;  %v2283_v13 = vld [vmem:[#allocation6 + $0x1c50] sm:$0xff]  ;;  %v3619_v21 = vpack.c.bf16 %v2281_v10, %v2273_v9  ;;  %v2361_v9 = vld [vmem:[#allocation6 + $0x1ec0] sm:$0xff]  ;;  %v2152_v44 = vld [vmem:[#allocation6 + $0x1838] sm:$0xff] }
 0x394   : > { %v2355_v10 = vld [vmem:[#allocation6 + $0x1e90] sm:$0xff]  ;;  %v2160_v45 = vld [vmem:[#allocation6 + $0x1878] sm:$0xff] }
 0x395   : > { %3600 = vmatpush1.bf16.msra.mxu0 %v3599_v22  ;;  %v3683_v22 = vpack.c.bf16 %v2283_v13, %v2275_v11  ;;  %v3701_v11 = vpack.c.bf16 %v2364_v60, %v2356_v5  ;;  %v2370_v13 = vld [vmem:[#allocation6 + $0x1f08] sm:$0xff]  ;;  %v2168_v41 = vld [vmem:[#allocation6 + $0x18b8] sm:$0xff] }
 0x396   : > { %3664 = vmatpush1.bf16.msra.mxu1 %v3663_v23  ;;  %3602 = vmatprep.subr.bf16.mxu0 %v3601_v24  ;;  %v3621_v23 = vpack.c.bf16 %v2298_v14, %v2290_v3  ;;  %v2289_v24 = vld [vmem:[#allocation6 + $0x1c80] sm:$0xff]  ;;  %v2378_v3 = vld [vmem:[#allocation6 + $0x1f48] sm:$0xff]  ;;  %v2372_v14 = vld [vmem:[#allocation6 + $0x1f18] sm:$0xff] }
 0x397   : > { %3666 = vmatprep.subr.bf16.mxu1 %v3665_v28  ;;  %v2299_v28 = vld [vmem:[#allocation6 + $0x1cd0] sm:$0xff]  ;;  %v3623_v31 = vpack.c.bf16 %v2297_v25, %v2289_v24  ;;  %v2377_v24 = vld [vmem:[#allocation6 + $0x1f40] sm:$0xff]  ;;  %v2176_v20 = vld [vmem:[#allocation6 + $0x18f8] sm:$0xff] }
 0x398   : > { %v2371_v25 = vld [vmem:[#allocation6 + $0x1f10] sm:$0xff]  ;;  %v2184_v5 = vld [vmem:[#allocation6 + $0x1938] sm:$0xff] }
 0x399   : > { %3604 = vmatpush1.bf16.msra.mxu0 %v3603_v32  ;;  %v3687_v32 = vpack.c.bf16 %v2299_v28, %v2291_v26  ;;  %v3705_v26 = vpack.c.bf16 %v2380_v15, %v2372_v14  ;;  %v2386_v28 = vld [vmem:[#allocation6 + $0x1f88] sm:$0xff]  ;;  %v2192_v60 = vld [vmem:[#allocation6 + $0x1978] sm:$0xff] }
 0x39a   : > { %3668 = vmatpush1.bf16.msra.mxu1 %v3667_v39  ;;  %3606 = vmatprep.subr.bf16.mxu0 %v3605_v33  ;;  %v3625_v39 = vpack.c.bf16 %v2314_v57, %v2306_v29  ;;  %v2305_v33 = vld [vmem:[#allocation6 + $0x1d00] sm:$0xff]  ;;  %v2394_v29 = vld [vmem:[#allocation6 + $0x1fc8] sm:$0xff]  ;;  %v2388_v57 = vld [vmem:[#allocation6 + $0x1f98] sm:$0xff] }
 0x39b   : > { %3670 = vmatprep.subr.bf16.mxu1 %v3669_v35  ;;  %v2315_v35 = vld [vmem:[#allocation6 + $0x1d50] sm:$0xff]  ;;  %v3627_v38 = vpack.c.bf16 %v2313_v40, %v2305_v33  ;;  %v2393_v33 = vld [vmem:[#allocation6 + $0x1fc0] sm:$0xff]  ;;  %v2200_v14 = vld [vmem:[#allocation6 + $0x19b8] sm:$0xff] }
 0x39c   : > { %v2387_v40 = vld [vmem:[#allocation6 + $0x1f90] sm:$0xff]  ;;  %v2208_v15 = vld [vmem:[#allocation6 + $0x19f8] sm:$0xff] }
 0x39d   : > { %3608 = vmatpush1.bf16.msra.mxu0 %v3607_v47  ;;  %v3691_v47 = vpack.c.bf16 %v2315_v35, %v2307_v19  ;;  %v3709_v19 = vpack.c.bf16 %v2396_v30, %v2388_v57  ;;  %v486_v35 = vmul.f32 %v4335_v52, %v4308_v55  ;;  %v2174_v55 = vld [vmem:[#allocation6 + $0x18e8] sm:$0xff]  ;;  %v2224_v57 = vld [vmem:[#allocation6 + $0x1a78] sm:$0xff] }
 0x39e   : > { %3672 = vmatpush1.bf16.msra.mxu1 %v3671_v48  ;;  %3610 = vmatprep.subr.bf16.mxu0 %v3609_v56  ;;  %v3629_v48 = vpack.c.bf16 %v2330_v43, %v2322_v36  ;;  %v2321_v56 = vld [vmem:[#allocation6 + $0x1d80] sm:$0xff]  ;;  %v2150_v36 = vld [vmem:[#allocation6 + $0x1828] sm:$0xff] }
 0x39f   : > { %3674 = vmatprep.subr.bf16.mxu1 %v3673_v6  ;;  %v2331_v6 = vld [vmem:[#allocation6 + $0x1dd0] sm:$0xff]  ;;  %v3631_v46 = vpack.c.bf16 %v2329_v51, %v2321_v56  ;;  %v2158_v43 = vld [vmem:[#allocation6 + $0x1868] sm:$0xff]  ;;  %v2149_v56 = vld [vmem:[#allocation6 + $0x1820] sm:$0xff]  ;;  %vm488_vm7 = vcmp.ge.f32.partialorder %v486_v35, 0.0 }
 0x3a0   : > { %v2157_v51 = vld [vmem:[#allocation6 + $0x1860] sm:$0xff] }
 0x3a1   : > { %3612 = vmatpush1.bf16.msra.mxu0 %v3611_v37  ;;  %v3695_v37 = vpack.c.bf16 %v2331_v6, %v2323_v4  ;;  %v490_v4 = vmul.f32 0.2, %v486_v35  ;;  %v2151_v6 = vld [vmem:[#allocation6 + $0x1830] sm:$0xff]  ;;  %v3715_v52 = vpack.c.bf16 %v2157_v51, %v2149_v56 }
 0x3a2   : > { %3676 = vmatpush1.bf16.msra.mxu1 %v3675_v59  ;;  %3614 = vmatprep.subr.bf16.mxu0 %v3613_v61  ;;  %v3633_v59 = vpack.c.bf16 %v2346_v17, %v2338_v49  ;;  %v2337_v61 = vld [vmem:[#allocation6 + $0x1e00] sm:$0xff]  ;;  %v2159_v49 = vld [vmem:[#allocation6 + $0x1870] sm:$0xff]  ;;  %v2166_v17 = vld [vmem:[#allocation6 + $0x18a8] sm:$0xff] }
 0x3a3   : > { %3678 = vmatprep.subr.bf16.mxu1 %v3677_v42  ;;  %v2347_v42 = vld [vmem:[#allocation6 + $0x1e50] sm:$0xff]  ;;  %v3635_v54 = vpack.c.bf16 %v2345_v62, %v2337_v61  ;;  %v4389_v62 = vsel %vm488_vm7, %v486_v35, %v490_v4  ;;  %v2238_v35 = vld [vmem:[#allocation6 + $0x1ae8] sm:$0xff] }
 0x3a4   : > { %v2167_v61 = vld [vmem:[#allocation6 + $0x18b0] sm:$0xff] }
 0x3a5   : > { %3616 = vmatpush1.bf16.msra.mxu0 %v3615_v7  ;;  %v3699_v7 = vpack.c.bf16 %v2347_v42, %v2339_v63  ;;  %v3717_v63 = vpack.c.bf16 %v2174_v55, %v2166_v17  ;;  %v2182_v42 = vld [vmem:[#allocation6 + $0x1928] sm:$0xff]  ;;  %v2231_v56 = vld [vmem:[#allocation6 + $0x1ab0] sm:$0xff]  ;;  %v2256_v17 = vld [vmem:[#allocation6 + $0x1b78] sm:$0xff] }
 0x3a6   : > { %3680 = vmatpush1.bf16.msra.mxu1 %v3679_v53  ;;  %3618 = vmatprep.subr.bf16.mxu0 %v3617_v8  ;;  %v3637_v53 = vpack.c.bf16 %v2362_v2, %v2354_v1  ;;  %v2353_v8 = vld [vmem:[#allocation6 + $0x1e80] sm:$0xff]  ;;  %v2190_v1 = vld [vmem:[#allocation6 + $0x1968] sm:$0xff]  ;;  %v3781_v2 = vpack.c.bf16 %v2176_v20, %v2168_v41  ;;  %v2239_v4 = vld [vmem:[#allocation6 + $0x1af0] sm:$0xff] }
 0x3a7   : > { %3682 = vmatprep.subr.bf16.mxu1 %v3681_v12  ;;  %v2363_v12 = vld [vmem:[#allocation6 + $0x1ed0] sm:$0xff]  ;;  %v3639_v18 = vpack.c.bf16 %v2361_v9, %v2353_v8  ;;  %v2181_v8 = vld [vmem:[#allocation6 + $0x1920] sm:$0xff] }
 0x3a8   : > { %v2189_v9 = vld [vmem:[#allocation6 + $0x1960] sm:$0xff] }
 0x3a9   : > { %3620 = vmatpush1.bf16.msra.mxu0 %v3619_v21  ;;  %v3703_v21 = vpack.c.bf16 %v2363_v12, %v2355_v10  ;;  %v2183_v10 = vld [vmem:[#allocation6 + $0x1930] sm:$0xff]  ;;  %v2245_v20 = vld [vmem:[#allocation6 + $0x1b20] sm:$0xff] }
 0x3aa   : > { %3684 = vmatpush1.bf16.msra.mxu1 %v3683_v22  ;;  %3622 = vmatprep.subr.bf16.mxu0 %v3621_v23  ;;  %v3641_v22 = vpack.c.bf16 %v2378_v3, %v2370_v13  ;;  %v2369_v23 = vld [vmem:[#allocation6 + $0x1f00] sm:$0xff]  ;;  %v2191_v12 = vld [vmem:[#allocation6 + $0x1970] sm:$0xff]  ;;  %v2198_v13 = vld [vmem:[#allocation6 + $0x19a8] sm:$0xff] }
 0x3ab   : > { %3686 = vmatprep.subr.bf16.mxu1 %v3685_v27  ;;  %v2379_v27 = vld [vmem:[#allocation6 + $0x1f50] sm:$0xff]  ;;  %v3643_v50 = vpack.c.bf16 %v2377_v24, %v2369_v23  ;;  %v2206_v3 = vld [vmem:[#allocation6 + $0x19e8] sm:$0xff]  ;;  %v2197_v23 = vld [vmem:[#allocation6 + $0x19a0] sm:$0xff] }
 0x3ac   : > { %v2205_v24 = vld [vmem:[#allocation6 + $0x19e0] sm:$0xff] }
 0x3ad   : > { %3624 = vmatpush1.bf16.msra.mxu0 %v3623_v31  ;;  %v3707_v31 = vpack.c.bf16 %v2379_v27, %v2371_v25  ;;  %v2199_v25 = vld [vmem:[#allocation6 + $0x19b0] sm:$0xff]  ;;  %v2214_v27 = vld [vmem:[#allocation6 + $0x1a28] sm:$0xff]  ;;  %v3727_v30 = vpack.c.bf16 %v2205_v24, %v2197_v23 }
 0x3ae   : > { %3688 = vmatpush1.bf16.msra.mxu1 %v3687_v32  ;;  %3626 = vmatprep.subr.bf16.mxu0 %v3625_v39  ;;  %v3645_v32 = vpack.c.bf16 %v2394_v29, %v2386_v28  ;;  %v2385_v39 = vld [vmem:[#allocation6 + $0x1f80] sm:$0xff]  ;;  %v2222_v28 = vld [vmem:[#allocation6 + $0x1a68] sm:$0xff]  ;;  %v2216_v29 = vld [vmem:[#allocation6 + $0x1a38] sm:$0xff] }
 0x3af   : > { %3690 = vmatprep.subr.bf16.mxu1 %v3689_v34  ;;  %v2395_v34 = vld [vmem:[#allocation6 + $0x1fd0] sm:$0xff] }
 0x3b0   : > { %v2287_v24 = vld [vmem:[#allocation6 + $0x1c70] sm:$0xff] }
 0x3b1   : > { %3628 = vmatpush1.bf16.msra.mxu0 %v3627_v38  ;;  %v3647_v38 = vpack.c.bf16 %v2393_v33, %v2385_v39  ;;  %v2221_v39 = vld [vmem:[#allocation6 + $0x1a60] sm:$0xff]  ;;  %v2215_v33 = vld [vmem:[#allocation6 + $0x1a30] sm:$0xff] }
 0x3b2   : > { %3692 = vmatpush1.bf16.msra.mxu1 %v3691_v47  ;;  %3630 = vmatprep.subr.bf16.mxu0 %v3629_v48  ;;  %v3711_v47 = vpack.c.bf16 %v2395_v34, %v2387_v40  ;;  %v3713_v48 = vpack.c.bf16 %v2158_v43, %v2150_v36  ;;  %v3793_v40 = vpack.c.bf16 %v2224_v57, %v2216_v29  ;;  %v2230_v34 = vld [vmem:[#allocation6 + $0x1aa8] sm:$0xff]  ;;  %v2232_v36 = vld [vmem:[#allocation6 + $0x1ab8] sm:$0xff] }
 0x3b3   : > { %3694 = vmatprep.subr.bf16.mxu1 %v3693_v16  ;;  %v3777_v16 = vpack.c.bf16 %v2160_v45, %v2152_v44  ;;  %v2240_v43 = vld [vmem:[#allocation6 + $0x1af8] sm:$0xff] }
 0x3b4   : > { %v3797_v51 = vpack.c.bf16 %v2240_v43, %v2232_v36 }
 0x3b5   : > { %3632 = vmatpush1.bf16.msra.mxu0 %v3631_v46  ;;  %v3779_v46 = vpack.c.bf16 %v2159_v49, %v2151_v6  ;;  %v2254_v6 = vld [vmem:[#allocation6 + $0x1b68] sm:$0xff]  ;;  %v2248_v49 = vld [vmem:[#allocation6 + $0x1b38] sm:$0xff] }
 0x3b6   : > { %3696 = vmatpush1.bf16.msra.mxu1 %v3695_v37  ;;  %3634 = vmatprep.subr.bf16.mxu0 %v3633_v59  ;;  %v2165_v37 = vld [vmem:[#allocation6 + $0x18a0] sm:$0xff] }
 0x3b7   : > { %3698 = vmatprep.subr.bf16.mxu1 %v3697_v0  ;;  %v2173_v59 = vld [vmem:[#allocation6 + $0x18e0] sm:$0xff]  ;;  %v2175_v0 = vld [vmem:[#allocation6 + $0x18f0] sm:$0xff] }
 0x3b9   : > { %3636 = vmatpush1.bf16.msra.mxu0 %v3635_v54  ;;  %v3719_v54 = vpack.c.bf16 %v2173_v59, %v2165_v37  ;;  %v2247_v37 = vld [vmem:[#allocation6 + $0x1b30] sm:$0xff]  ;;  %v3801_v59 = vpack.c.bf16 %v2256_v17, %v2248_v49 }
 0x3ba   : > { %3700 = vmatpush1.bf16.msra.mxu1 %v3699_v7  ;;  %3638 = vmatprep.subr.bf16.mxu0 %v3637_v53  ;;  %v3783_v7 = vpack.c.bf16 %v2175_v0, %v2167_v61  ;;  %v3721_v53 = vpack.c.bf16 %v2190_v1, %v2182_v42  ;;  %v2255_v61 = vld [vmem:[#allocation6 + $0x1b70] sm:$0xff]  ;;  %v2270_v0 = vld [vmem:[#allocation6 + $0x1be8] sm:$0xff]  ;;  %v2264_v42 = vld [vmem:[#allocation6 + $0x1bb8] sm:$0xff] }
 0x3bb   : > { %3702 = vmatprep.subr.bf16.mxu1 %v3701_v11  ;;  %v3785_v11 = vpack.c.bf16 %v2192_v60, %v2184_v5  ;;  %v2272_v1 = vld [vmem:[#allocation6 + $0x1bf8] sm:$0xff]  ;;  %v3803_v5 = vpack.c.bf16 %v2255_v61, %v2247_v37  ;;  %v2342_v37 = vld [vmem:[#allocation6 + $0x1e28] sm:$0xff] }
 0x3bc   : > { %v2344_v61 = vld [vmem:[#allocation6 + $0x1e38] sm:$0xff] }
 0x3bd   : > { %3640 = vmatpush1.bf16.msra.mxu0 %v3639_v18  ;;  %v3723_v18 = vpack.c.bf16 %v2189_v9, %v2181_v8  ;;  %v3805_v8 = vpack.c.bf16 %v2272_v1, %v2264_v42  ;;  %v2271_v9 = vld [vmem:[#allocation6 + $0x1bf0] sm:$0xff] }
 0x3be   : > { %3704 = vmatpush1.bf16.msra.mxu1 %v3703_v21  ;;  %3642 = vmatprep.subr.bf16.mxu0 %v3641_v22  ;;  %v3787_v21 = vpack.c.bf16 %v2191_v12, %v2183_v10  ;;  %v3725_v22 = vpack.c.bf16 %v2206_v3, %v2198_v13  ;;  %v2278_v10 = vld [vmem:[#allocation6 + $0x1c28] sm:$0xff]  ;;  %v2280_v12 = vld [vmem:[#allocation6 + $0x1c38] sm:$0xff] }
 0x3bf   : > { %3706 = vmatprep.subr.bf16.mxu1 %v3705_v26  ;;  %v3789_v26 = vpack.c.bf16 %v2208_v15, %v2200_v14  ;;  %v2288_v13 = vld [vmem:[#allocation6 + $0x1c78] sm:$0xff] }
 0x3c0   : > { %v3809_v23 = vpack.c.bf16 %v2288_v13, %v2280_v12 }
 0x3c1   : > { %3644 = vmatpush1.bf16.msra.mxu0 %v3643_v50 }
 0x3c2   : > { %3708 = vmatpush1.bf16.msra.mxu1 %v3707_v31  ;;  %3646 = vmatprep.subr.bf16.mxu0 %v3645_v32  ;;  %v3729_v31 = vpack.c.bf16 %v2222_v28, %v2214_v27  ;;  %v2213_v32 = vld [vmem:[#allocation6 + $0x1a20] sm:$0xff]  ;;  %v2304_v27 = vld [vmem:[#allocation6 + $0x1cf8] sm:$0xff] }
 0x3c3   : > { %3710 = vmatprep.subr.bf16.mxu1 %v3709_v19  ;;  %v2223_v19 = vld [vmem:[#allocation6 + $0x1a70] sm:$0xff]  ;;  %v3731_v44 = vpack.c.bf16 %v2221_v39, %v2213_v32 }
 0x3c4   : > { %v3795_v45 = vpack.c.bf16 %v2223_v19, %v2215_v33  ;;  %v2303_v39 = vld [vmem:[#allocation6 + $0x1cf0] sm:$0xff]  ;;  %v2310_v33 = vld [vmem:[#allocation6 + $0x1d28] sm:$0xff]  ;;  %v2312_v19 = vld [vmem:[#allocation6 + $0x1d38] sm:$0xff] }
 0x3c5   : > { %3648 = vmatpush1.bf16.msra.mxu0 %v3647_v38  ;;  %v3733_v38 = vpack.c.bf16 %v2238_v35, %v2230_v34  ;;  %v2320_v34 = vld [vmem:[#allocation6 + $0x1d78] sm:$0xff] }
 0x3c6   : > { %3712 = vmatpush1.bf16.msra.mxu1 %v3711_v47  ;;  %3714 = vmatprep.subr.bf16.mxu0 %v3713_v48  ;;  %v2229_v47 = vld [vmem:[#allocation6 + $0x1aa0] sm:$0xff] }
 0x3c7   : > { %3778 = vmatprep.subr.bf16.mxu1 %v3777_v16  ;;  %v2237_v48 = vld [vmem:[#allocation6 + $0x1ae0] sm:$0xff]  ;;  %v2246_v16 = vld [vmem:[#allocation6 + $0x1b28] sm:$0xff] }
 0x3c8   : > { %2466 = vmatmul.mubr.f32.vlgmr.msra.gmra.mrb[0].mxu0 %v4389_v62  ;;  %v3735_v55 = vpack.c.bf16 %v2237_v48, %v2229_v47  ;;  %v3737_v41 = vpack.c.bf16 %v2254_v6, %v2246_v16  ;;  %v3817_v47 = vpack.c.bf16 %v2320_v34, %v2312_v19  ;;  %v2319_v48 = vld [vmem:[#allocation6 + $0x1d70] sm:$0xff]  ;;  %v2336_v16 = vld [vmem:[#allocation6 + $0x1df8] sm:$0xff] }
 0x3c9   : > { %2537 = vmatmul.mubr.f32.vlgmr.msra.gmra.mrb[0].mxu1 %v4389_v62  ;;  %3716 = vmatpush1.bf16.msra.mxu0 %v3715_v52  ;;  %v3799_v52 = vpack.c.bf16 %v2239_v4, %v2231_v56  ;;  %v2326_v56 = vld [vmem:[#allocation6 + $0x1da8] sm:$0xff]  ;;  %v2328_v4 = vld [vmem:[#allocation6 + $0x1db8] sm:$0xff] }
 0x3ca   : > { %2607 = vmatprep.mubr.f32.mxu0 %v4383_v58  ;;  %3780 = vmatpush1.bf16.msra.mxu1 %v3779_v46  ;;  %v2253_v46 = vld [vmem:[#allocation6 + $0x1b60] sm:$0xff] }
 0x3cb   : > { %2678 = vmatprep.mubr.f32.mxu1 %v4383_v58  ;;  %3718 = vmatprep.subr.bf16.mxu0 %v3717_v63  ;;  %v2207_v58 = vld [vmem:[#allocation6 + $0x19f0] sm:$0xff]  ;;  %v2262_v63 = vld [vmem:[#allocation6 + $0x1ba8] sm:$0xff] }
 0x3cc   : > { %3782 = vmatprep.subr.bf16.mxu1 %v3781_v2  ;;  %v3791_v50 = vpack.c.bf16 %v2207_v58, %v2199_v25  ;;  %v3739_v2 = vpack.c.bf16 %v2253_v46, %v2245_v20  ;;  %v3741_v60 = vpack.c.bf16 %v2270_v0, %v2262_v63  ;;  %v2294_v25 = vld [vmem:[#allocation6 + $0x1ca8] sm:$0xff]  ;;  %v2296_v58 = vld [vmem:[#allocation6 + $0x1cb8] sm:$0xff]  ;;  %v3821_v20 = vpack.c.bf16 %v2336_v16, %v2328_v4  ;;  %v2335_v46 = vld [vmem:[#allocation6 + $0x1df0] sm:$0xff] }
 0x3cd   : > { %3720 = vmatpush1.bf16.msra.mxu0 %v3719_v54  ;;  %v2261_v54 = vld [vmem:[#allocation6 + $0x1ba0] sm:$0xff]  ;;  %v3813_v32 = vpack.c.bf16 %v2304_v27, %v2296_v58  ;;  %v2352_v63 = vld [vmem:[#allocation6 + $0x1e78] sm:$0xff] }
 0x3ce   : > { %3784 = vmatpush1.bf16.msra.mxu1 %v3783_v7  ;;  %3722 = vmatprep.subr.bf16.mxu0 %v3721_v53  ;;  %v2269_v7 = vld [vmem:[#allocation6 + $0x1be0] sm:$0xff]  ;;  %v2263_v53 = vld [vmem:[#allocation6 + $0x1bb0] sm:$0xff] }
 0x3cf   : > { %3786 = vmatprep.subr.bf16.mxu1 %v3785_v11  ;;  %v2286_v11 = vld [vmem:[#allocation6 + $0x1c68] sm:$0xff]  ;;  %v3743_v3 = vpack.c.bf16 %v2269_v7, %v2261_v54  ;;  %v3807_v14 = vpack.c.bf16 %v2271_v9, %v2263_v53  ;;  %v3825_v54 = vpack.c.bf16 %v2352_v63, %v2344_v61  ;;  %v2351_v7 = vld [vmem:[#allocation6 + $0x1e70] sm:$0xff]  ;;  %v2360_v9 = vld [vmem:[#allocation6 + $0x1eb8] sm:$0xff] }
 0x3d0   : > { %v3745_v15 = vpack.c.bf16 %v2286_v11, %v2278_v10  ;;  %v2358_v53 = vld [vmem:[#allocation6 + $0x1ea8] sm:$0xff]  ;;  %v2368_v10 = vld [vmem:[#allocation6 + $0x1ef8] sm:$0xff] }
 0x3d1   : > { %3724 = vmatpush1.bf16.msra.mxu0 %v3723_v18  ;;  %v2277_v18 = vld [vmem:[#allocation6 + $0x1c20] sm:$0xff] }
 0x3d2   : > { %3788 = vmatpush1.bf16.msra.mxu1 %v3787_v21  ;;  %3726 = vmatprep.subr.bf16.mxu0 %v3725_v22  ;;  %v2285_v21 = vld [vmem:[#allocation6 + $0x1c60] sm:$0xff]  ;;  %v2279_v22 = vld [vmem:[#allocation6 + $0x1c30] sm:$0xff] }
 0x3d3   : > { %3790 = vmatprep.subr.bf16.mxu1 %v3789_v26  ;;  %v2302_v26 = vld [vmem:[#allocation6 + $0x1ce8] sm:$0xff]  ;;  %v3747_v28 = vpack.c.bf16 %v2285_v21, %v2277_v18  ;;  %v3811_v29 = vpack.c.bf16 %v2287_v24, %v2279_v22  ;;  %v3829_v18 = vpack.c.bf16 %v2368_v10, %v2360_v9  ;;  %v2367_v21 = vld [vmem:[#allocation6 + $0x1ef0] sm:$0xff]  ;;  %v2376_v24 = vld [vmem:[#allocation6 + $0x1f38] sm:$0xff] }
 0x3d4   : > { %v3749_v57 = vpack.c.bf16 %v2302_v26, %v2294_v25  ;;  %v2374_v22 = vld [vmem:[#allocation6 + $0x1f28] sm:$0xff]  ;;  %v2384_v25 = vld [vmem:[#allocation6 + $0x1f78] sm:$0xff] }
 0x3d5   : > { %3728 = vmatpush1.bf16.msra.mxu0 %v3727_v30  ;;  %v2293_v30 = vld [vmem:[#allocation6 + $0x1ca0] sm:$0xff] }
 0x3d6   : > { %3792 = vmatpush1.bf16.msra.mxu1 %v3791_v50  ;;  %3730 = vmatprep.subr.bf16.mxu0 %v3729_v31  ;;  %v2301_v50 = vld [vmem:[#allocation6 + $0x1ce0] sm:$0xff]  ;;  %v2295_v31 = vld [vmem:[#allocation6 + $0x1cb0] sm:$0xff] }
 0x3d7   : > { %3794 = vmatprep.subr.bf16.mxu1 %v3793_v40  ;;  %v2318_v40 = vld [vmem:[#allocation6 + $0x1d68] sm:$0xff]  ;;  %v3751_v35 = vpack.c.bf16 %v2301_v50, %v2293_v30  ;;  %v3815_v36 = vpack.c.bf16 %v2303_v39, %v2295_v31  ;;  %v3833_v30 = vpack.c.bf16 %v2384_v25, %v2376_v24  ;;  %v2383_v50 = vld [vmem:[#allocation6 + $0x1f70] sm:$0xff]  ;;  %v2392_v39 = vld [vmem:[#allocation6 + $0x1fb8] sm:$0xff] }
 0x3d8   : > { %v3753_v43 = vpack.c.bf16 %v2318_v40, %v2310_v33  ;;  %v2390_v31 = vld [vmem:[#allocation6 + $0x1fa8] sm:$0xff]  ;;  %v2400_v33 = vld [vmem:[#allocation6 + $0x1ff8] sm:$0xff] }
 0x3d9   : > { %3732 = vmatpush1.bf16.msra.mxu0 %v3731_v44  ;;  %v2309_v44 = vld [vmem:[#allocation6 + $0x1d20] sm:$0xff] }
 0x3da   : > { %3796 = vmatpush1.bf16.msra.mxu1 %v3795_v45  ;;  %3734 = vmatprep.subr.bf16.mxu0 %v3733_v38  ;;  %v2317_v45 = vld [vmem:[#allocation6 + $0x1d60] sm:$0xff]  ;;  %v2311_v38 = vld [vmem:[#allocation6 + $0x1d30] sm:$0xff] }
 0x3db   : > { %3798 = vmatprep.subr.bf16.mxu1 %v3797_v51  ;;  %v2334_v51 = vld [vmem:[#allocation6 + $0x1de8] sm:$0xff]  ;;  %v3755_v6 = vpack.c.bf16 %v2317_v45, %v2309_v44  ;;  %v3819_v49 = vpack.c.bf16 %v2319_v48, %v2311_v38  ;;  %v2391_v44 = vld [vmem:[#allocation6 + $0x1fb0] sm:$0xff] }
 0x3dc   : > { %v3757_v17 = vpack.c.bf16 %v2334_v51, %v2326_v56  ;;  %v2399_v45 = vld [vmem:[#allocation6 + $0x1ff0] sm:$0xff] }
 0x3dd   : > { %3736 = vmatpush1.bf16.msra.mxu0 %v3735_v55  ;;  %v2325_v55 = vld [vmem:[#allocation6 + $0x1da0] sm:$0xff] }
 0x3de   : > { %3800 = vmatpush1.bf16.msra.mxu1 %v3799_v52  ;;  %3738 = vmatprep.subr.bf16.mxu0 %v3737_v41  ;;  %v2333_v52 = vld [vmem:[#allocation6 + $0x1de0] sm:$0xff]  ;;  %v2327_v41 = vld [vmem:[#allocation6 + $0x1db0] sm:$0xff] }
 0x3df   : > { %3802 = vmatprep.subr.bf16.mxu1 %v3801_v59  ;;  %v2350_v59 = vld [vmem:[#allocation6 + $0x1e68] sm:$0xff]  ;;  %v3759_v0 = vpack.c.bf16 %v2333_v52, %v2325_v55  ;;  %v3823_v42 = vpack.c.bf16 %v2335_v46, %v2327_v41 }
 0x3e0   : > { %v3761_v1 = vpack.c.bf16 %v2350_v59, %v2342_v37 }
 0x3e1   : > { %3740 = vmatpush1.bf16.msra.mxu0 %v3739_v2  ;;  %v2341_v2 = vld [vmem:[#allocation6 + $0x1e20] sm:$0xff] }
 0x3e2   : > { %3804 = vmatpush1.bf16.msra.mxu1 %v3803_v5  ;;  %3742 = vmatprep.subr.bf16.mxu0 %v3741_v60  ;;  %v2349_v5 = vld [vmem:[#allocation6 + $0x1e60] sm:$0xff]  ;;  %v2343_v60 = vld [vmem:[#allocation6 + $0x1e30] sm:$0xff] }
 0x3e3   : > { %3806 = vmatprep.subr.bf16.mxu1 %v3805_v8  ;;  %v2366_v8 = vld [vmem:[#allocation6 + $0x1ee8] sm:$0xff]  ;;  %v3763_v11 = vpack.c.bf16 %v2349_v5, %v2341_v2  ;;  %v3827_v12 = vpack.c.bf16 %v2351_v7, %v2343_v60 }
 0x3e4   : > { %v3765_v13 = vpack.c.bf16 %v2366_v8, %v2358_v53 }
 0x3e5   : > { %3744 = vmatpush1.bf16.msra.mxu0 %v3743_v3  ;;  %v2357_v3 = vld [vmem:[#allocation6 + $0x1ea0] sm:$0xff] }
 0x3e6   : > { %3808 = vmatpush1.bf16.msra.mxu1 %v3807_v14  ;;  %3746 = vmatprep.subr.bf16.mxu0 %v3745_v15  ;;  %v2365_v14 = vld [vmem:[#allocation6 + $0x1ee0] sm:$0xff]  ;;  %v2359_v15 = vld [vmem:[#allocation6 + $0x1eb0] sm:$0xff] }
 0x3e7   : > { %3810 = vmatprep.subr.bf16.mxu1 %v3809_v23  ;;  %v2382_v23 = vld [vmem:[#allocation6 + $0x1f68] sm:$0xff]  ;;  %v3767_v26 = vpack.c.bf16 %v2365_v14, %v2357_v3  ;;  %v3831_v58 = vpack.c.bf16 %v2367_v21, %v2359_v15 }
 0x3e8   : > { %v3769_v27 = vpack.c.bf16 %v2382_v23, %v2374_v22 }
 0x3e9   : > { %3748 = vmatpush1.bf16.msra.mxu0 %v3747_v28  ;;  %v2373_v28 = vld [vmem:[#allocation6 + $0x1f20] sm:$0xff] }
 0x3ea   : > { %3812 = vmatpush1.bf16.msra.mxu1 %v3811_v29  ;;  %3750 = vmatprep.subr.bf16.mxu0 %v3749_v57  ;;  %v2381_v29 = vld [vmem:[#allocation6 + $0x1f60] sm:$0xff]  ;;  %v2375_v57 = vld [vmem:[#allocation6 + $0x1f30] sm:$0xff] }
 0x3eb   : > { %3814 = vmatprep.subr.bf16.mxu1 %v3813_v32  ;;  %v2398_v32 = vld [vmem:[#allocation6 + $0x1fe8] sm:$0xff]  ;;  %v3771_v40 = vpack.c.bf16 %v2381_v29, %v2373_v28  ;;  %v3835_v19 = vpack.c.bf16 %v2383_v50, %v2375_v57 }
 0x3ec   : > { %v3773_v34 = vpack.c.bf16 %v2398_v32, %v2390_v31 }
 0x3ed   : > { %3752 = vmatpush1.bf16.msra.mxu0 %v3751_v35  ;;  %v2389_v35 = vld [vmem:[#allocation6 + $0x1fa0] sm:$0xff] }
 0x3ee   : > { %3816 = vmatpush1.bf16.msra.mxu1 %v3815_v36  ;;  %3754 = vmatprep.subr.bf16.mxu0 %v3753_v43  ;;  %v2397_v36 = vld [vmem:[#allocation6 + $0x1fe0] sm:$0xff]  ;;  %v3837_v43 = vpack.c.bf16 %v2400_v33, %v2392_v39 }
 0x3ef   : > { %3818 = vmatprep.subr.bf16.mxu1 %v3817_v47  ;;  %v3775_v38 = vpack.c.bf16 %v2397_v36, %v2389_v35  ;;  %v3839_v47 = vpack.c.bf16 %v2399_v45, %v2391_v44 }
 0x3f1   : > { %3756 = vmatpush1.bf16.msra.mxu0 %v3755_v6 }
 0x3f2   : > { %3820 = vmatpush1.bf16.msra.mxu1 %v3819_v49  ;;  %3758 = vmatprep.subr.bf16.mxu0 %v3757_v17 }
 0x3f3   : > { %3822 = vmatprep.subr.bf16.mxu1 %v3821_v20 }
 0x3f5   : > { %3760 = vmatpush1.bf16.msra.mxu0 %v3759_v0 }
 0x3f6   : > { %3824 = vmatpush1.bf16.msra.mxu1 %v3823_v42  ;;  %3762 = vmatprep.subr.bf16.mxu0 %v3761_v1 }
 0x3f7   : > { %3826 = vmatprep.subr.bf16.mxu1 %v3825_v54 }
 0x3f9   : > { %3764 = vmatpush1.bf16.msra.mxu0 %v3763_v11 }
 0x3fa   : > { %3828 = vmatpush1.bf16.msra.mxu1 %v3827_v12  ;;  %3766 = vmatprep.subr.bf16.mxu0 %v3765_v13 }
 0x3fb   : > { %3830 = vmatprep.subr.bf16.mxu1 %v3829_v18 }
 0x3fd   : > { %3768 = vmatpush1.bf16.msra.mxu0 %v3767_v26 }
 0x3fe   : > { %3832 = vmatpush1.bf16.msra.mxu1 %v3831_v58  ;;  %3770 = vmatprep.subr.bf16.mxu0 %v3769_v27 }
 0x3ff   : > { %3834 = vmatprep.subr.bf16.mxu1 %v3833_v30 }
 0x401   : > { %3772 = vmatpush1.bf16.msra.mxu0 %v3771_v40 }
 0x402   : > { %3836 = vmatpush1.bf16.msra.mxu1 %v3835_v19  ;;  %3774 = vmatprep.subr.bf16.mxu0 %v3773_v34 }
 0x403   : > { %3838 = vmatprep.subr.bf16.mxu1 %v3837_v43 }
 0x405   : > { %3776 = vmatpush1.bf16.msra.mxu0 %v3775_v38 }
 0x406   : > { %3840 = vmatpush1.bf16.msra.mxu1 %v3839_v47 }
 0x408   : > { %2608 = vmatmul.mubr.f32.vlgmr.msra.gmra.mrb[2].mxu0 %v4389_v62 }
 0x409   : > { %2679 = vmatmul.mubr.f32.vlgmr.msra.gmra.mrb[2].mxu1 %v4389_v62 }
 0x49b   : > { %v2467_v48 = vpop.f32.mrb[0].mxu0 }
 0x49c   : > { %2693 = vst [vmem:[%s201_s11] sm:$0xff] %v2467_v48  ;;  %v2538_v56 = vpop.f32.mrb[0].mxu1  ;;  %v2469_v51 = vpop.f32.mrb[1].mxu0 }
 0x49d   : > { %2695 = vst [vmem:[%s201_s11 + $0x10] sm:$0xff] %v2538_v56  ;;  %2694 = vst [vmem:[%s201_s11 + $0x8] sm:$0xff] %v2469_v51  ;;  %v2540_v4 = vpop.f32.mrb[1].mxu1 }
 0x49e   : > { %2696 = vst [vmem:[%s201_s11 + $0x18] sm:$0xff] %v2540_v4 }
 0x4db   : > { %v2609_v16 = vpop.f32.mrb[2].mxu0 }
 0x4dc   : > { %2697 = vst [vmem:[%s201_s11 + $0x20] sm:$0xff] %v2609_v16  ;;  %v2680_v6 = vpop.f32.mrb[2].mxu1  ;;  %v2611_v49 = vpop.f32.mrb[3].mxu0 }
 0x4dd   : > { %2699 = vst [vmem:[%s201_s11 + $0x30] sm:$0xff] %v2680_v6  ;;  %2698 = vst [vmem:[%s201_s11 + $0x28] sm:$0xff] %v2611_v49  ;;  %v2682_v62 = vpop.f32.mrb[3].mxu1 }
 0x4de   : > { %2700 = vst [vmem:[%s201_s11 + $0x38] sm:$0xff] %v2682_v62 }
 0x4df   : > { %4012 = shalt.err (!%p4009_p7)
}
 0x4e0   : > { %s4013_s30 = scalar_lea.hbm %s4402_s22, 1024  ;;  %s4017_s18 = scalar_lea.hbm %s4449_s3, 2048 }
 0x4e1   : > { %p4014_p9 = scmp.ne.s32.totalorder %s4402_s22, %s4013_s30  ;;  %p4018_p0 = scmp.lt.u32.totalorder %s4402_s22, %s4449_s3 }
 0x4e2   : > { %p4019_p11 = scmp.lt.u32.totalorder %s4017_s18, %s4013_s30  ;;  %p4021_p4 = scmp.lt.u32.totalorder %s4013_s30, %s4402_s22 }
 0x4e3   : > { %p4015_p2 = pnand %p4014_p9, %p4191_p12 }
 0x4e4   : > { %p4020_p1 = por %p4019_p11, %p4018_p0 }
 0x4e5   : > { %p4016_p5 = pneg %p4015_p2 }
 0x4e6   : > { %p4022_p6 = por %p4021_p4, %p4020_p1 }
 0x4e8   : > { %p4023_p8 = pnand %p4022_p6, %p4016_p5 }
 0x4ea   : > { %4026 = shalt.err (!%p4023_p8)
}
 0x4eb   : > { %3871 = dma.vmem_to_hbm [thread:$0]  (%p4191_p12), %s4404_s28, 1024, %s4402_s22, %s2702_s16  }
 0x4ec PF: > { %s2728_s9 = sand.u32 1, %s4057_s12   ;;  %p4464_p10 = scmp.ne.s32.totalorder %s4454_s19, 0 }
 0x4ed   : > { %p4465_p13 = scmp.ge.s32.totalorder %s4069_s15, 2  ;;  %s2729_s10 = scalar_lea.sflag [#allocation5], %s2728_s9 }
 0x4ef   : > { %p3882_p3 = pnand %p4465_p13, %p4464_p10 }
 0x4f1   : > { %4052 = dma.done.wait (!%p3882_p3), %s2729_s10, 1024  }
 0x4f2   : > { %4054 = vsyncadd (!%p3882_p3), %s2729_s10, 4294966272  ;;  %p17_p7 = scmp.ge.s32.totalorder %s4156_s24, 4   ;;  %s4466_s12 = smov %s4061_s13 }
 0x4f3   : > { %s4467_s13 = smov %s4065_s14  ;;  %s4468_s14 = smov %s4187_s17 }
 0x4f4   : > { %s4469_s15 = smov %s4156_s24  ;;  %19 = sbr.rel (!%p17_p7) target bundleno = 6 (0x6), region = 90 }
 0x4fb   :  { %2734 = vsyncpa [#allocation4], 1 }
 0x4fc   :  { %2736 = vsyncpa [#allocation4 + $0x1], 1 }
 0x4fd   :  { %2737 = vsyncpa [#allocation7], 1 }
 0x4fe   :  { %2738 = vsyncpa [#allocation5], 1 }
 0x4ff   :  { %2740 = vsyncpa [#allocation5 + $0x1], 1 }

</bundles_post_ra>
